<compile_context>
chip_gen: v7x
topology: tpu7x:2x2x1
jax: 0.10.0
libtpu: 0.0.40
codegen_flags: <defaults>
</compile_context>

<pallas_src>
import collections
import functools

import jax
import jax.numpy as jnp
from jax import lax
from jax.experimental import pallas as pl
from jax.experimental.pallas import tpu as pltpu


Config = collections.namedtuple(
    "Config",
    ["input_dim", "hidden_dim", "layer_dim", "output_dim", "hidden_pad", "out_pad"],
)


# ----------------------------------------------------------------------------
# Helpers
# ----------------------------------------------------------------------------
def _round_up(x, m):
    return (x + m - 1) // m * m


def _full_spec(shape):
    # Single grid point; block == full array.
    return pl.BlockSpec(shape, lambda i: tuple(0 for _ in shape))


def _sigmoid(x):
    # 1 / (1 + exp(-x)) with the divide pushed to the EUP (approx reciprocal),
    # keeping the serial recurrence's elementwise work off the VALU divide path.
    return pl.reciprocal(1.0 + jnp.exp(-x), approx=True)


# ----------------------------------------------------------------------------
# Fused kernel: all LSTM layers + final Linear in one pallas_call
# ----------------------------------------------------------------------------
def make_fused_lstm_kernel(num_layers, seq, batch_p, unroll):
    """Builds the fused kernel.

    Inputs  : x2d (seq*batch_p, in_dim),
              per layer: w_ih (in_l, 4*Hp), w_hh (Hp, 4*Hp), b (1, 4*Hp),
              fc_w (Hp, out_pad), fc_b (1, out_pad)
    Output  : out (batch_p, out_pad)
    Scratch : n_act ping-pong activation buffers (seq*batch_p, Hp),
              gates_x (seq*batch_p, 4*Hp), h (batch_p, Hp), c (batch_p, Hp)
    """
    n_act = min(2, max(num_layers - 1, 0))
    n_in = 1 + 3 * num_layers + 2

    def kernel(*refs):
        x_ref = refs[0]
        layer_refs = refs[1:1 + 3 * num_layers]
        fc_w_ref = refs[1 + 3 * num_layers]
        fc_b_ref = refs[2 + 3 * num_layers]
        out_ref = refs[n_in]
        scratch = refs[n_in + 1:]
        act_bufs = scratch[:n_act]
        gx_scr, h_scr, c_scr = scratch[n_act:]

        Hp = h_scr.shape[1]

        def run_layer(src_ref, wih_ref, whh_ref, b_ref, dst_ref):
            # (1) Hoisted input projection for ALL timesteps in one MXU matmul.
            gx_scr[...] = (
                jnp.dot(src_ref[...], wih_ref[...],
                        preferred_element_type=jnp.float32)
                + b_ref[...])

            # h0 = c0 = 0 (matches the PyTorch module when h0/c0 are None).
            h_scr[...] = jnp.zeros_like(h_scr)
            c_scr[...] = jnp.zeros_like(c_scr)
            whh = whh_ref[...]

            def step(t, carry):
                row = pl.multiple_of(t * batch_p, batch_p)
                h_prev = h_scr[...]
                c_prev = c_scr[...]
                # Only the recurrent matmul is on the serial critical path.
                gates = (gx_scr[pl.ds(row, batch_p), :]
                         + jnp.dot(h_prev, whh,
                                   preferred_element_type=jnp.float32))
                # PyTorch gate order: i, f, g, o — each slice is a full
                # 128-lane block (Hp = multiple of 128).
                i_g = _sigmoid(gates[:, 0 * Hp:1 * Hp])
                f_g = _sigmoid(gates[:, 1 * Hp:2 * Hp])
                g_g = jnp.tanh(gates[:, 2 * Hp:3 * Hp])
                o_g = _sigmoid(gates[:, 3 * Hp:4 * Hp])
                c_new = f_g * c_prev + i_g * g_g
                h_new = o_g * jnp.tanh(c_new)
                c_scr[...] = c_new
                h_scr[...] = h_new
                if dst_ref is not None:
                    # Non-last layers stage their sequence output in VMEM only.
                    dst_ref[pl.ds(row, batch_p), :] = h_new
                return carry

            lax.fori_loop(0, seq, step, 0, unroll=unroll)

        # Layers are a static Python unroll (num_layers is small & fixed).
        src = x_ref
        for l in range(num_layers):
            wih_ref, whh_ref, b_ref = layer_refs[3 * l:3 * l + 3]
            is_last = (l == num_layers - 1)
            dst = None if is_last else act_bufs[l % 2]
            run_layer(src, wih_ref, whh_ref, b_ref, dst)
            src = dst

        # (2) Final Linear fused as an epilogue on the resident final hidden state.
        out_ref[...] = (jnp.dot(h_scr[...], fc_w_ref[...],
                                preferred_element_type=jnp.float32)
                        + fc_b_ref[...])

    return kernel


# ----------------------------------------------------------------------------
# Parameter init (PyTorch-like) + padding to TPU-friendly layouts
# ----------------------------------------------------------------------------
def _pad_gate_cols(w_t, H, Hp):
    """(rows, 4H) -> (rows, 4*Hp): each gate's H columns go to the head of its
    Hp-wide, lane-aligned block (PyTorch gate order i, f, g, o preserved)."""
    rows = w_t.shape[0]
    w4 = w_t.reshape(rows, 4, H)
    out = jnp.zeros((rows, 4, Hp), w_t.dtype).at[:, :, :H].set(w4)
    return out.reshape(rows, 4 * Hp)


def _pad_rows(w, rows_p):
    return jnp.zeros((rows_p,) + w.shape[1:], w.dtype).at[:w.shape[0]].set(w)


def init_lstm_model(key, input_dim, hidden_dim, layer_dim, output_dim):
    """PyTorch-default init (U(-1/sqrt(H), 1/sqrt(H))), then zero-pad weights so the
    hidden/output lane dims are multiples of 128.  Padding is numerically inert."""
    H = hidden_dim
    Hp = max(128, _round_up(H, 128))
    Op = max(128, _round_up(output_dim, 128))
    k = 1.0 / jnp.sqrt(jnp.float32(H))

    layers = []
    for l in range(layer_dim):
        in_dim = input_dim if l == 0 else H
        key, k1, k2, k3, k4 = jax.random.split(key, 5)
        w_ih = jax.random.uniform(k1, (4 * H, in_dim), jnp.float32, -k, k)
        w_hh = jax.random.uniform(k2, (4 * H, H), jnp.float32, -k, k)
        b_ih = jax.random.uniform(k3, (4 * H,), jnp.float32, -k, k)
        b_hh = jax.random.uniform(k4, (4 * H,), jnp.float32, -k, k)

        wih_p = _pad_gate_cols(w_ih.T, H, Hp)                 # (in_dim, 4Hp)
        if l > 0:
            wih_p = _pad_rows(wih_p, Hp)                      # (Hp, 4Hp)
        whh_p = _pad_rows(_pad_gate_cols(w_hh.T, H, Hp), Hp)  # (Hp, 4Hp)
        b_p = _pad_gate_cols((b_ih + b_hh).reshape(1, 4 * H), H, Hp)  # (1, 4Hp)
        layers.append({"wih": wih_p, "whh": whh_p, "b": b_p})

    key, k5, k6 = jax.random.split(key, 3)
    fc_w = jax.random.uniform(k5, (output_dim, H), jnp.float32, -k, k)
    fc_b = jax.random.uniform(k6, (output_dim,), jnp.float32, -k, k)
    fc_w_p = jnp.zeros((Hp, Op), jnp.float32).at[:H, :output_dim].set(fc_w.T)
    fc_b_p = jnp.zeros((1, Op), jnp.float32).at[0, :output_dim].set(fc_b)

    params = {"layers": layers, "fc_w": fc_w_p, "fc_b": fc_b_p}
    config = Config(input_dim, H, layer_dim, output_dim, Hp, Op)
    return params, config


# ----------------------------------------------------------------------------
# Forward
# ----------------------------------------------------------------------------
@functools.partial(jax.jit, static_argnums=(2,))
def lstm_model_forward(params, x, config, base_val=None):
    """x: (batch, seq, input_dim) -> (batch, output_dim). Matches LSTMModel.forward
    (inference path, h0 = c0 = 0)."""
    batch, seq, in_dim = x.shape
    Hp, Op = config.hidden_pad, config.out_pad
    batch_p = _round_up(batch, 8)           # f32 sublane quantum

    # layout: batch-first -> time-major, pad batch, flatten to (seq*batch_p, in_dim)
    # so the kernel needs no in-kernel reshapes and timestep t is rows
    # [t*batch_p, (t+1)*batch_p).
    xt = jnp.transpose(x, (1, 0, 2)).astype(jnp.float32)      # (seq, batch, in)
    xt = jnp.pad(xt, ((0, 0), (0, batch_p - batch), (0, 0)))  # (seq, batch_p, in)
    x2d = xt.reshape(seq * batch_p, in_dim)

    unroll = True if seq <= 32 else 4
    kernel = make_fused_lstm_kernel(config.layer_dim, seq, batch_p, unroll)

    inputs = [x2d]
    in_specs = [_full_spec((seq * batch_p, in_dim))]
    for lp in params["layers"]:
        inputs += [lp["wih"], lp["whh"], lp["b"]]
        in_specs += [_full_spec(lp["wih"].shape),
                     _full_spec(lp["whh"].shape),
                     _full_spec(lp["b"].shape)]
    inputs += [params["fc_w"], params["fc_b"]]
    in_specs += [_full_spec(params["fc_w"].shape),
                 _full_spec(params["fc_b"].shape)]

    n_act = min(2, max(config.layer_dim - 1, 0))
    scratch_shapes = (
        [pltpu.VMEM((seq * batch_p, Hp), jnp.float32) for _ in range(n_act)]
        + [pltpu.VMEM((seq * batch_p, 4 * Hp), jnp.float32),   # hoisted x-gates
           pltpu.VMEM((batch_p, Hp), jnp.float32),             # h state
           pltpu.VMEM((batch_p, Hp), jnp.float32)]             # c state
    )

    out_p = pl.pallas_call(
        kernel,
        out_shape=jax.ShapeDtypeStruct((batch_p, Op), jnp.float32),
        grid=(1,),
        in_specs=in_specs,
        out_specs=_full_spec((batch_p, Op)),
        scratch_shapes=scratch_shapes,
        compiler_params=pltpu.CompilerParams(
            dimension_semantics=("arbitrary",)),
    )(*inputs)

    out = out_p[:batch, :config.output_dim]
    if base_val is not None:
        out = out + base_val.reshape(-1, 1)
    return out


# ----------------------------------------------------------------------------
# Main
# ----------------------------------------------------------------------------
if __name__ == "__main__":
    batch, seq = 2, 8
    input_dim, hidden_dim, layer_dim, output_dim = 16, 32, 2, 4
    dropout_prob = 0.1  # inactive at inference

    key = jax.random.PRNGKey(0)
    key, pkey, xkey = jax.random.split(key, 3)

    params, config = init_lstm_model(pkey, input_dim, hidden_dim, layer_dim,
                                     output_dim)
    x = jax.random.normal(xkey, (batch, seq, input_dim), dtype=jnp.float32)

    out = lstm_model_forward(params, x, config)
    out = jax.block_until_ready(out)
    assert out.shape == (batch, output_dim)
    print("KERNEL_OK")
</pallas_src>

<mosaic_0001>
module attributes {stable_mosaic.version = 11 : i64} {
  func.func @kernel(%arg0: i32, %arg1: memref<64x16xf32, #tpu.memory_space<vmem>>, %arg2: memref<16x512xf32, #tpu.memory_space<vmem>>, %arg3: memref<128x512xf32, #tpu.memory_space<vmem>>, %arg4: memref<1x512xf32, #tpu.memory_space<vmem>>, %arg5: memref<128x512xf32, #tpu.memory_space<vmem>>, %arg6: memref<128x512xf32, #tpu.memory_space<vmem>>, %arg7: memref<1x512xf32, #tpu.memory_space<vmem>>, %arg8: memref<128x128xf32, #tpu.memory_space<vmem>>, %arg9: memref<1x128xf32, #tpu.memory_space<vmem>>, %arg10: memref<8x128xf32, #tpu.memory_space<vmem>>, %arg11: memref<64x128xf32, #tpu.memory_space<vmem>>, %arg12: memref<64x512xf32, #tpu.memory_space<vmem>>, %arg13: memref<8x128xf32, #tpu.memory_space<vmem>>, %arg14: memref<8x128xf32, #tpu.memory_space<vmem>>) attributes {dimension_semantics = [#tpu.dimension_semantics<arbitrary>], iteration_bounds = array<i64: 1>, scalar_prefetch = 0 : i64, scratch_operands = 4 : i64, tpu.core_type = #tpu.core_type<tc>, window_params = [{pipeline_mode = #tpu.pipeline_mode<synchronous>, transform_indices = @transform_0, window_bounds = array<i64: 64, 16>}, {pipeline_mode = #tpu.pipeline_mode<synchronous>, transform_indices = @transform_1, window_bounds = array<i64: 16, 512>}, {pipeline_mode = #tpu.pipeline_mode<synchronous>, transform_indices = @transform_2, window_bounds = array<i64: 128, 512>}, {pipeline_mode = #tpu.pipeline_mode<synchronous>, transform_indices = @transform_3, window_bounds = array<i64: 1, 512>}, {pipeline_mode = #tpu.pipeline_mode<synchronous>, transform_indices = @transform_4, window_bounds = array<i64: 128, 512>}, {pipeline_mode = #tpu.pipeline_mode<synchronous>, transform_indices = @transform_5, window_bounds = array<i64: 128, 512>}, {pipeline_mode = #tpu.pipeline_mode<synchronous>, transform_indices = @transform_6, window_bounds = array<i64: 1, 512>}, {pipeline_mode = #tpu.pipeline_mode<synchronous>, transform_indices = @transform_7, window_bounds = array<i64: 128, 128>}, {pipeline_mode = #tpu.pipeline_mode<synchronous>, transform_indices = @transform_8, window_bounds = array<i64: 1, 128>}, {pipeline_mode = #tpu.pipeline_mode<synchronous>, transform_indices = @transform_9, window_bounds = array<i64: 8, 128>}]} {
    %c0 = arith.constant 0 : index
    %c0_0 = arith.constant 0 : index
    %0 = vector.load %arg1[%c0, %c0_0] : memref<64x16xf32, #tpu.memory_space<vmem>>, vector<64x16xf32>
    %c0_1 = arith.constant 0 : index
    %c0_2 = arith.constant 0 : index
    %1 = vector.load %arg2[%c0_1, %c0_2] : memref<16x512xf32, #tpu.memory_space<vmem>>, vector<16x512xf32>
    %cst = arith.constant dense<0.000000e+00> : vector<64x512xf32>
    %2 = tpu.matmul %0, %1, %cst {dimension_numbers = #tpu.dot_dimension_numbers<[1], [0], [0], [1], [0, 0, 1, 1], [], []>} : vector<64x16xf32>, vector<16x512xf32>, vector<64x512xf32> -> vector<64x512xf32>
    %c0_3 = arith.constant 0 : index
    %c0_4 = arith.constant 0 : index
    %3 = vector.load %arg4[%c0_3, %c0_4] : memref<1x512xf32, #tpu.memory_space<vmem>>, vector<1x512xf32>
    %4 = vector.broadcast %3 : vector<1x512xf32> to vector<64x512xf32>
    %5 = arith.addf %2, %4 : vector<64x512xf32>
    %c0_5 = arith.constant 0 : index
    %c0_6 = arith.constant 0 : index
    %6 = vector.load %arg12[%c0_5, %c0_6] : memref<64x512xf32, #tpu.memory_space<vmem>>, vector<64x512xf32>
    tpu.vector_store %arg12[%c0_5, %c0_6], %5 {strides = array<i32>} : memref<64x512xf32, #tpu.memory_space<vmem>>, vector<64x512xf32>,
    %cst_7 = arith.constant 0.000000e+00 : f32
    %7 = vector.broadcast %cst_7 : f32 to vector<8x128xf32>
    %c0_8 = arith.constant 0 : index
    %c0_9 = arith.constant 0 : index
    %8 = vector.load %arg13[%c0_8, %c0_9] : memref<8x128xf32, #tpu.memory_space<vmem>>, vector<8x128xf32>
    tpu.vector_store %arg13[%c0_8, %c0_9], %7 {strides = array<i32>} : memref<8x128xf32, #tpu.memory_space<vmem>>, vector<8x128xf32>,
    %cst_10 = arith.constant 0.000000e+00 : f32
    %9 = vector.broadcast %cst_10 : f32 to vector<8x128xf32>
    %c0_11 = arith.constant 0 : index
    %c0_12 = arith.constant 0 : index
    %10 = vector.load %arg14[%c0_11, %c0_12] : memref<8x128xf32, #tpu.memory_space<vmem>>, vector<8x128xf32>
    tpu.vector_store %arg14[%c0_11, %c0_12], %9 {strides = array<i32>} : memref<8x128xf32, #tpu.memory_space<vmem>>, vector<8x128xf32>,
    %c0_13 = arith.constant 0 : index
    %c0_14 = arith.constant 0 : index
    %11 = vector.load %arg3[%c0_13, %c0_14] : memref<128x512xf32, #tpu.memory_space<vmem>>, vector<128x512xf32>
    %c0_i32 = arith.constant 0 : i32
    %c8_i32 = arith.constant 8 : i32
    %12 = arith.muli %c0_i32, %c8_i32 : i32
    %13 = tpu.assume_multiple %12, 8 : i32
    %c0_15 = arith.constant 0 : index
    %c0_16 = arith.constant 0 : index
    %14 = vector.load %arg13[%c0_15, %c0_16] : memref<8x128xf32, #tpu.memory_space<vmem>>, vector<8x128xf32>
    %c0_17 = arith.constant 0 : index
    %c0_18 = arith.constant 0 : index
    %15 = vector.load %arg14[%c0_17, %c0_18] : memref<8x128xf32, #tpu.memory_space<vmem>>, vector<8x128xf32>
    %16 = arith.index_cast %13 : i32 to index
    %c0_19 = arith.constant 0 : index
    %17 = vector.load %arg12[%16, %c0_19] : memref<64x512xf32, #tpu.memory_space<vmem>>, vector<8x512xf32>
    %cst_20 = arith.constant dense<0.000000e+00> : vector<8x512xf32>
    %18 = tpu.matmul %14, %11, %cst_20 {dimension_numbers = #tpu.dot_dimension_numbers<[1], [0], [0], [1], [0, 0, 1, 1], [], []>} : vector<8x128xf32>, vector<128x512xf32>, vector<8x512xf32> -> vector<8x512xf32>
    %19 = arith.addf %17, %18 : vector<8x512xf32>
    %20 = vector.extract_strided_slice %19 {offsets = [0, 0], sizes = [8, 128], strides = [1, 1]} : vector<8x512xf32> to vector<8x128xf32>
    %cst_21 = arith.constant 0.000000e+00 : f32
    %21 = vector.broadcast %cst_21 : f32 to vector<8x128xf32>
    %22 = arith.subf %21, %20 : vector<8x128xf32>
    %23 = math.exp %22 : vector<8x128xf32>
    %cst_22 = arith.constant 1.000000e+00 : f32
    %24 = vector.broadcast %cst_22 : f32 to vector<8x128xf32>
    %25 = arith.addf %24, %23 : vector<8x128xf32>
    %26 = tpu.reciprocal %25 {approx = true} : vector<8x128xf32> -> vector<8x128xf32>
    %27 = vector.extract_strided_slice %19 {offsets = [0, 128], sizes = [8, 128], strides = [1, 1]} : vector<8x512xf32> to vector<8x128xf32>
    %cst_23 = arith.constant 0.000000e+00 : f32
    %28 = vector.broadcast %cst_23 : f32 to vector<8x128xf32>
    %29 = arith.subf %28, %27 : vector<8x128xf32>
    %30 = math.exp %29 : vector<8x128xf32>
    %cst_24 = arith.constant 1.000000e+00 : f32
    %31 = vector.broadcast %cst_24 : f32 to vector<8x128xf32>
    %32 = arith.addf %31, %30 : vector<8x128xf32>
    %33 = tpu.reciprocal %32 {approx = true} : vector<8x128xf32> -> vector<8x128xf32>
    %34 = vector.extract_strided_slice %19 {offsets = [0, 256], sizes = [8, 128], strides = [1, 1]} : vector<8x512xf32> to vector<8x128xf32>
    %35 = math.tanh %34 : vector<8x128xf32>
    %36 = vector.extract_strided_slice %19 {offsets = [0, 384], sizes = [8, 128], strides = [1, 1]} : vector<8x512xf32> to vector<8x128xf32>
    %cst_25 = arith.constant 0.000000e+00 : f32
    %37 = vector.broadcast %cst_25 : f32 to vector<8x128xf32>
    %38 = arith.subf %37, %36 : vector<8x128xf32>
    %39 = math.exp %38 : vector<8x128xf32>
    %cst_26 = arith.constant 1.000000e+00 : f32
    %40 = vector.broadcast %cst_26 : f32 to vector<8x128xf32>
    %41 = arith.addf %40, %39 : vector<8x128xf32>
    %42 = tpu.reciprocal %41 {approx = true} : vector<8x128xf32> -> vector<8x128xf32>
    %43 = arith.mulf %33, %15 : vector<8x128xf32>
    %44 = arith.mulf %26, %35 : vector<8x128xf32>
    %45 = arith.addf %43, %44 : vector<8x128xf32>
    %46 = math.tanh %45 : vector<8x128xf32>
    %47 = arith.mulf %42, %46 : vector<8x128xf32>
    %c0_27 = arith.constant 0 : index
    %c0_28 = arith.constant 0 : index
    %48 = vector.load %arg14[%c0_27, %c0_28] : memref<8x128xf32, #tpu.memory_space<vmem>>, vector<8x128xf32>
    tpu.vector_store %arg14[%c0_27, %c0_28], %45 {strides = array<i32>} : memref<8x128xf32, #tpu.memory_space<vmem>>, vector<8x128xf32>,
    %c0_29 = arith.constant 0 : index
    %c0_30 = arith.constant 0 : index
    %49 = vector.load %arg13[%c0_29, %c0_30] : memref<8x128xf32, #tpu.memory_space<vmem>>, vector<8x128xf32>
    tpu.vector_store %arg13[%c0_29, %c0_30], %47 {strides = array<i32>} : memref<8x128xf32, #tpu.memory_space<vmem>>, vector<8x128xf32>,
    %50 = arith.index_cast %13 : i32 to index
    %c0_31 = arith.constant 0 : index
    %51 = vector.load %arg11[%50, %c0_31] : memref<64x128xf32, #tpu.memory_space<vmem>>, vector<8x128xf32>
    tpu.vector_store %arg11[%50, %c0_31], %47 {strides = array<i32>} : memref<64x128xf32, #tpu.memory_space<vmem>>, vector<8x128xf32>,
    %c1_i32 = arith.constant 1 : i32
    %c8_i32_32 = arith.constant 8 : i32
    %52 = arith.muli %c1_i32, %c8_i32_32 : i32
    %53 = tpu.assume_multiple %52, 8 : i32
    %c0_33 = arith.constant 0 : index
    %c0_34 = arith.constant 0 : index
    %54 = vector.load %arg13[%c0_33, %c0_34] : memref<8x128xf32, #tpu.memory_space<vmem>>, vector<8x128xf32>
    %c0_35 = arith.constant 0 : index
    %c0_36 = arith.constant 0 : index
    %55 = vector.load %arg14[%c0_35, %c0_36] : memref<8x128xf32, #tpu.memory_space<vmem>>, vector<8x128xf32>
    %56 = arith.index_cast %53 : i32 to index
    %c0_37 = arith.constant 0 : index
    %57 = vector.load %arg12[%56, %c0_37] : memref<64x512xf32, #tpu.memory_space<vmem>>, vector<8x512xf32>
    %cst_38 = arith.constant dense<0.000000e+00> : vector<8x512xf32>
    %58 = tpu.matmul %54, %11, %cst_38 {dimension_numbers = #tpu.dot_dimension_numbers<[1], [0], [0], [1], [0, 0, 1, 1], [], []>} : vector<8x128xf32>, vector<128x512xf32>, vector<8x512xf32> -> vector<8x512xf32>
    %59 = arith.addf %57, %58 : vector<8x512xf32>
    %60 = vector.extract_strided_slice %59 {offsets = [0, 0], sizes = [8, 128], strides = [1, 1]} : vector<8x512xf32> to vector<8x128xf32>
    %cst_39 = arith.constant 0.000000e+00 : f32
    %61 = vector.broadcast %cst_39 : f32 to vector<8x128xf32>
    %62 = arith.subf %61, %60 : vector<8x128xf32>
    %63 = math.exp %62 : vector<8x128xf32>
    %cst_40 = arith.constant 1.000000e+00 : f32
    %64 = vector.broadcast %cst_40 : f32 to vector<8x128xf32>
    %65 = arith.addf %64, %63 : vector<8x128xf32>
    %66 = tpu.reciprocal %65 {approx = true} : vector<8x128xf32> -> vector<8x128xf32>
    %67 = vector.extract_strided_slice %59 {offsets = [0, 128], sizes = [8, 128], strides = [1, 1]} : vector<8x512xf32> to vector<8x128xf32>
    %cst_41 = arith.constant 0.000000e+00 : f32
    %68 = vector.broadcast %cst_41 : f32 to vector<8x128xf32>
    %69 = arith.subf %68, %67 : vector<8x128xf32>
    %70 = math.exp %69 : vector<8x128xf32>
    %cst_42 = arith.constant 1.000000e+00 : f32
    %71 = vector.broadcast %cst_42 : f32 to vector<8x128xf32>
    %72 = arith.addf %71, %70 : vector<8x128xf32>
    %73 = tpu.reciprocal %72 {approx = true} : vector<8x128xf32> -> vector<8x128xf32>
    %74 = vector.extract_strided_slice %59 {offsets = [0, 256], sizes = [8, 128], strides = [1, 1]} : vector<8x512xf32> to vector<8x128xf32>
    %75 = math.tanh %74 : vector<8x128xf32>
    %76 = vector.extract_strided_slice %59 {offsets = [0, 384], sizes = [8, 128], strides = [1, 1]} : vector<8x512xf32> to vector<8x128xf32>
    %cst_43 = arith.constant 0.000000e+00 : f32
    %77 = vector.broadcast %cst_43 : f32 to vector<8x128xf32>
    %78 = arith.subf %77, %76 : vector<8x128xf32>
    %79 = math.exp %78 : vector<8x128xf32>
    %cst_44 = arith.constant 1.000000e+00 : f32
    %80 = vector.broadcast %cst_44 : f32 to vector<8x128xf32>
    %81 = arith.addf %80, %79 : vector<8x128xf32>
    %82 = tpu.reciprocal %81 {approx = true} : vector<8x128xf32> -> vector<8x128xf32>
    %83 = arith.mulf %73, %55 : vector<8x128xf32>
    %84 = arith.mulf %66, %75 : vector<8x128xf32>
    %85 = arith.addf %83, %84 : vector<8x128xf32>
    %86 = math.tanh %85 : vector<8x128xf32>
    %87 = arith.mulf %82, %86 : vector<8x128xf32>
    %c0_45 = arith.constant 0 : index
    %c0_46 = arith.constant 0 : index
    %88 = vector.load %arg14[%c0_45, %c0_46] : memref<8x128xf32, #tpu.memory_space<vmem>>, vector<8x128xf32>
    tpu.vector_store %arg14[%c0_45, %c0_46], %85 {strides = array<i32>} : memref<8x128xf32, #tpu.memory_space<vmem>>, vector<8x128xf32>,
    %c0_47 = arith.constant 0 : index
    %c0_48 = arith.constant 0 : index
    %89 = vector.load %arg13[%c0_47, %c0_48] : memref<8x128xf32, #tpu.memory_space<vmem>>, vector<8x128xf32>
    tpu.vector_store %arg13[%c0_47, %c0_48], %87 {strides = array<i32>} : memref<8x128xf32, #tpu.memory_space<vmem>>, vector<8x128xf32>,
    %90 = arith.index_cast %53 : i32 to index
    %c0_49 = arith.constant 0 : index
    %91 = vector.load %arg11[%90, %c0_49] : memref<64x128xf32, #tpu.memory_space<vmem>>, vector<8x128xf32>
    tpu.vector_store %arg11[%90, %c0_49], %87 {strides = array<i32>} : memref<64x128xf32, #tpu.memory_space<vmem>>, vector<8x128xf32>,
    %c2_i32 = arith.constant 2 : i32
    %c8_i32_50 = arith.constant 8 : i32
    %92 = arith.muli %c2_i32, %c8_i32_50 : i32
    %93 = tpu.assume_multiple %92, 8 : i32
    %c0_51 = arith.constant 0 : index
    %c0_52 = arith.constant 0 : index
    %94 = vector.load %arg13[%c0_51, %c0_52] : memref<8x128xf32, #tpu.memory_space<vmem>>, vector<8x128xf32>
    %c0_53 = arith.constant 0 : index
    %c0_54 = arith.constant 0 : index
    %95 = vector.load %arg14[%c0_53, %c0_54] : memref<8x128xf32, #tpu.memory_space<vmem>>, vector<8x128xf32>
    %96 = arith.index_cast %93 : i32 to index
    %c0_55 = arith.constant 0 : index
    %97 = vector.load %arg12[%96, %c0_55] : memref<64x512xf32, #tpu.memory_space<vmem>>, vector<8x512xf32>
    %cst_56 = arith.constant dense<0.000000e+00> : vector<8x512xf32>
    %98 = tpu.matmul %94, %11, %cst_56 {dimension_numbers = #tpu.dot_dimension_numbers<[1], [0], [0], [1], [0, 0, 1, 1], [], []>} : vector<8x128xf32>, vector<128x512xf32>, vector<8x512xf32> -> vector<8x512xf32>
    %99 = arith.addf %97, %98 : vector<8x512xf32>
    %100 = vector.extract_strided_slice %99 {offsets = [0, 0], sizes = [8, 128], strides = [1, 1]} : vector<8x512xf32> to vector<8x128xf32>
    %cst_57 = arith.constant 0.000000e+00 : f32
    %101 = vector.broadcast %cst_57 : f32 to vector<8x128xf32>
    %102 = arith.subf %101, %100 : vector<8x128xf32>
    %103 = math.exp %102 : vector<8x128xf32>
    %cst_58 = arith.constant 1.000000e+00 : f32
    %104 = vector.broadcast %cst_58 : f32 to vector<8x128xf32>
    %105 = arith.addf %104, %103 : vector<8x128xf32>
    %106 = tpu.reciprocal %105 {approx = true} : vector<8x128xf32> -> vector<8x128xf32>
    %107 = vector.extract_strided_slice %99 {offsets = [0, 128], sizes = [8, 128], strides = [1, 1]} : vector<8x512xf32> to vector<8x128xf32>
    %cst_59 = arith.constant 0.000000e+00 : f32
    %108 = vector.broadcast %cst_59 : f32 to vector<8x128xf32>
    %109 = arith.subf %108, %107 : vector<8x128xf32>
    %110 = math.exp %109 : vector<8x128xf32>
    %cst_60 = arith.constant 1.000000e+00 : f32
    %111 = vector.broadcast %cst_60 : f32 to vector<8x128xf32>
    %112 = arith.addf %111, %110 : vector<8x128xf32>
    %113 = tpu.reciprocal %112 {approx = true} : vector<8x128xf32> -> vector<8x128xf32>
    %114 = vector.extract_strided_slice %99 {offsets = [0, 256], sizes = [8, 128], strides = [1, 1]} : vector<8x512xf32> to vector<8x128xf32>
    %115 = math.tanh %114 : vector<8x128xf32>
    %116 = vector.extract_strided_slice %99 {offsets = [0, 384], sizes = [8, 128], strides = [1, 1]} : vector<8x512xf32> to vector<8x128xf32>
    %cst_61 = arith.constant 0.000000e+00 : f32
    %117 = vector.broadcast %cst_61 : f32 to vector<8x128xf32>
    %118 = arith.subf %117, %116 : vector<8x128xf32>
    %119 = math.exp %118 : vector<8x128xf32>
    %cst_62 = arith.constant 1.000000e+00 : f32
    %120 = vector.broadcast %cst_62 : f32 to vector<8x128xf32>
    %121 = arith.addf %120, %119 : vector<8x128xf32>
    %122 = tpu.reciprocal %121 {approx = true} : vector<8x128xf32> -> vector<8x128xf32>
    %123 = arith.mulf %113, %95 : vector<8x128xf32>
    %124 = arith.mulf %106, %115 : vector<8x128xf32>
    %125 = arith.addf %123, %124 : vector<8x128xf32>
    %126 = math.tanh %125 : vector<8x128xf32>
    %127 = arith.mulf %122, %126 : vector<8x128xf32>
    %c0_63 = arith.constant 0 : index
    %c0_64 = arith.constant 0 : index
    %128 = vector.load %arg14[%c0_63, %c0_64] : memref<8x128xf32, #tpu.memory_space<vmem>>, vector<8x128xf32>
    tpu.vector_store %arg14[%c0_63, %c0_64], %125 {strides = array<i32>} : memref<8x128xf32, #tpu.memory_space<vmem>>, vector<8x128xf32>,
    %c0_65 = arith.constant 0 : index
    %c0_66 = arith.constant 0 : index
    %129 = vector.load %arg13[%c0_65, %c0_66] : memref<8x128xf32, #tpu.memory_space<vmem>>, vector<8x128xf32>
    tpu.vector_store %arg13[%c0_65, %c0_66], %127 {strides = array<i32>} : memref<8x128xf32, #tpu.memory_space<vmem>>, vector<8x128xf32>,
    %130 = arith.index_cast %93 : i32 to index
    %c0_67 = arith.constant 0 : index
    %131 = vector.load %arg11[%130, %c0_67] : memref<64x128xf32, #tpu.memory_space<vmem>>, vector<8x128xf32>
    tpu.vector_store %arg11[%130, %c0_67], %127 {strides = array<i32>} : memref<64x128xf32, #tpu.memory_space<vmem>>, vector<8x128xf32>,
    %c3_i32 = arith.constant 3 : i32
    %c8_i32_68 = arith.constant 8 : i32
    %132 = arith.muli %c3_i32, %c8_i32_68 : i32
    %133 = tpu.assume_multiple %132, 8 : i32
    %c0_69 = arith.constant 0 : index
    %c0_70 = arith.constant 0 : index
    %134 = vector.load %arg13[%c0_69, %c0_70] : memref<8x128xf32, #tpu.memory_space<vmem>>, vector<8x128xf32>
    %c0_71 = arith.constant 0 : index
    %c0_72 = arith.constant 0 : index
    %135 = vector.load %arg14[%c0_71, %c0_72] : memref<8x128xf32, #tpu.memory_space<vmem>>, vector<8x128xf32>
    %136 = arith.index_cast %133 : i32 to index
    %c0_73 = arith.constant 0 : index
    %137 = vector.load %arg12[%136, %c0_73] : memref<64x512xf32, #tpu.memory_space<vmem>>, vector<8x512xf32>
    %cst_74 = arith.constant dense<0.000000e+00> : vector<8x512xf32>
    %138 = tpu.matmul %134, %11, %cst_74 {dimension_numbers = #tpu.dot_dimension_numbers<[1], [0], [0], [1], [0, 0, 1, 1], [], []>} : vector<8x128xf32>, vector<128x512xf32>, vector<8x512xf32> -> vector<8x512xf32>
    %139 = arith.addf %137, %138 : vector<8x512xf32>
    %140 = vector.extract_strided_slice %139 {offsets = [0, 0], sizes = [8, 128], strides = [1, 1]} : vector<8x512xf32> to vector<8x128xf32>
    %cst_75 = arith.constant 0.000000e+00 : f32
    %141 = vector.broadcast %cst_75 : f32 to vector<8x128xf32>
    %142 = arith.subf %141, %140 : vector<8x128xf32>
    %143 = math.exp %142 : vector<8x128xf32>
    %cst_76 = arith.constant 1.000000e+00 : f32
    %144 = vector.broadcast %cst_76 : f32 to vector<8x128xf32>
    %145 = arith.addf %144, %143 : vector<8x128xf32>
    %146 = tpu.reciprocal %145 {approx = true} : vector<8x128xf32> -> vector<8x128xf32>
    %147 = vector.extract_strided_slice %139 {offsets = [0, 128], sizes = [8, 128], strides = [1, 1]} : vector<8x512xf32> to vector<8x128xf32>
    %cst_77 = arith.constant 0.000000e+00 : f32
    %148 = vector.broadcast %cst_77 : f32 to vector<8x128xf32>
    %149 = arith.subf %148, %147 : vector<8x128xf32>
    %150 = math.exp %149 : vector<8x128xf32>
    %cst_78 = arith.constant 1.000000e+00 : f32
    %151 = vector.broadcast %cst_78 : f32 to vector<8x128xf32>
    %152 = arith.addf %151, %150 : vector<8x128xf32>
    %153 = tpu.reciprocal %152 {approx = true} : vector<8x128xf32> -> vector<8x128xf32>
    %154 = vector.extract_strided_slice %139 {offsets = [0, 256], sizes = [8, 128], strides = [1, 1]} : vector<8x512xf32> to vector<8x128xf32>
    %155 = math.tanh %154 : vector<8x128xf32>
    %156 = vector.extract_strided_slice %139 {offsets = [0, 384], sizes = [8, 128], strides = [1, 1]} : vector<8x512xf32> to vector<8x128xf32>
    %cst_79 = arith.constant 0.000000e+00 : f32
    %157 = vector.broadcast %cst_79 : f32 to vector<8x128xf32>
    %158 = arith.subf %157, %156 : vector<8x128xf32>
    %159 = math.exp %158 : vector<8x128xf32>
    %cst_80 = arith.constant 1.000000e+00 : f32
    %160 = vector.broadcast %cst_80 : f32 to vector<8x128xf32>
    %161 = arith.addf %160, %159 : vector<8x128xf32>
    %162 = tpu.reciprocal %161 {approx = true} : vector<8x128xf32> -> vector<8x128xf32>
    %163 = arith.mulf %153, %135 : vector<8x128xf32>
    %164 = arith.mulf %146, %155 : vector<8x128xf32>
    %165 = arith.addf %163, %164 : vector<8x128xf32>
    %166 = math.tanh %165 : vector<8x128xf32>
    %167 = arith.mulf %162, %166 : vector<8x128xf32>
    %c0_81 = arith.constant 0 : index
    %c0_82 = arith.constant 0 : index
    %168 = vector.load %arg14[%c0_81, %c0_82] : memref<8x128xf32, #tpu.memory_space<vmem>>, vector<8x128xf32>
    tpu.vector_store %arg14[%c0_81, %c0_82], %165 {strides = array<i32>} : memref<8x128xf32, #tpu.memory_space<vmem>>, vector<8x128xf32>,
    %c0_83 = arith.constant 0 : index
    %c0_84 = arith.constant 0 : index
    %169 = vector.load %arg13[%c0_83, %c0_84] : memref<8x128xf32, #tpu.memory_space<vmem>>, vector<8x128xf32>
    tpu.vector_store %arg13[%c0_83, %c0_84], %167 {strides = array<i32>} : memref<8x128xf32, #tpu.memory_space<vmem>>, vector<8x128xf32>,
    %170 = arith.index_cast %133 : i32 to index
    %c0_85 = arith.constant 0 : index
    %171 = vector.load %arg11[%170, %c0_85] : memref<64x128xf32, #tpu.memory_space<vmem>>, vector<8x128xf32>
    tpu.vector_store %arg11[%170, %c0_85], %167 {strides = array<i32>} : memref<64x128xf32, #tpu.memory_space<vmem>>, vector<8x128xf32>,
    %c4_i32 = arith.constant 4 : i32
    %c8_i32_86 = arith.constant 8 : i32
    %172 = arith.muli %c4_i32, %c8_i32_86 : i32
    %173 = tpu.assume_multiple %172, 8 : i32
    %c0_87 = arith.constant 0 : index
    %c0_88 = arith.constant 0 : index
    %174 = vector.load %arg13[%c0_87, %c0_88] : memref<8x128xf32, #tpu.memory_space<vmem>>, vector<8x128xf32>
    %c0_89 = arith.constant 0 : index
    %c0_90 = arith.constant 0 : index
    %175 = vector.load %arg14[%c0_89, %c0_90] : memref<8x128xf32, #tpu.memory_space<vmem>>, vector<8x128xf32>
    %176 = arith.index_cast %173 : i32 to index
    %c0_91 = arith.constant 0 : index
    %177 = vector.load %arg12[%176, %c0_91] : memref<64x512xf32, #tpu.memory_space<vmem>>, vector<8x512xf32>
    %cst_92 = arith.constant dense<0.000000e+00> : vector<8x512xf32>
    %178 = tpu.matmul %174, %11, %cst_92 {dimension_numbers = #tpu.dot_dimension_numbers<[1], [0], [0], [1], [0, 0, 1, 1], [], []>} : vector<8x128xf32>, vector<128x512xf32>, vector<8x512xf32> -> vector<8x512xf32>
    %179 = arith.addf %177, %178 : vector<8x512xf32>
    %180 = vector.extract_strided_slice %179 {offsets = [0, 0], sizes = [8, 128], strides = [1, 1]} : vector<8x512xf32> to vector<8x128xf32>
    %cst_93 = arith.constant 0.000000e+00 : f32
    %181 = vector.broadcast %cst_93 : f32 to vector<8x128xf32>
    %182 = arith.subf %181, %180 : vector<8x128xf32>
    %183 = math.exp %182 : vector<8x128xf32>
    %cst_94 = arith.constant 1.000000e+00 : f32
    %184 = vector.broadcast %cst_94 : f32 to vector<8x128xf32>
    %185 = arith.addf %184, %183 : vector<8x128xf32>
    %186 = tpu.reciprocal %185 {approx = true} : vector<8x128xf32> -> vector<8x128xf32>
    %187 = vector.extract_strided_slice %179 {offsets = [0, 128], sizes = [8, 128], strides = [1, 1]} : vector<8x512xf32> to vector<8x128xf32>
    %cst_95 = arith.constant 0.000000e+00 : f32
    %188 = vector.broadcast %cst_95 : f32 to vector<8x128xf32>
    %189 = arith.subf %188, %187 : vector<8x128xf32>
    %190 = math.exp %189 : vector<8x128xf32>
    %cst_96 = arith.constant 1.000000e+00 : f32
    %191 = vector.broadcast %cst_96 : f32 to vector<8x128xf32>
    %192 = arith.addf %191, %190 : vector<8x128xf32>
    %193 = tpu.reciprocal %192 {approx = true} : vector<8x128xf32> -> vector<8x128xf32>
    %194 = vector.extract_strided_slice %179 {offsets = [0, 256], sizes = [8, 128], strides = [1, 1]} : vector<8x512xf32> to vector<8x128xf32>
    %195 = math.tanh %194 : vector<8x128xf32>
    %196 = vector.extract_strided_slice %179 {offsets = [0, 384], sizes = [8, 128], strides = [1, 1]} : vector<8x512xf32> to vector<8x128xf32>
    %cst_97 = arith.constant 0.000000e+00 : f32
    %197 = vector.broadcast %cst_97 : f32 to vector<8x128xf32>
    %198 = arith.subf %197, %196 : vector<8x128xf32>
    %199 = math.exp %198 : vector<8x128xf32>
    %cst_98 = arith.constant 1.000000e+00 : f32
    %200 = vector.broadcast %cst_98 : f32 to vector<8x128xf32>
    %201 = arith.addf %200, %199 : vector<8x128xf32>
    %202 = tpu.reciprocal %201 {approx = true} : vector<8x128xf32> -> vector<8x128xf32>
    %203 = arith.mulf %193, %175 : vector<8x128xf32>
    %204 = arith.mulf %186, %195 : vector<8x128xf32>
    %205 = arith.addf %203, %204 : vector<8x128xf32>
    %206 = math.tanh %205 : vector<8x128xf32>
    %207 = arith.mulf %202, %206 : vector<8x128xf32>
    %c0_99 = arith.constant 0 : index
    %c0_100 = arith.constant 0 : index
    %208 = vector.load %arg14[%c0_99, %c0_100] : memref<8x128xf32, #tpu.memory_space<vmem>>, vector<8x128xf32>
    tpu.vector_store %arg14[%c0_99, %c0_100], %205 {strides = array<i32>} : memref<8x128xf32, #tpu.memory_space<vmem>>, vector<8x128xf32>,
    %c0_101 = arith.constant 0 : index
    %c0_102 = arith.constant 0 : index
    %209 = vector.load %arg13[%c0_101, %c0_102] : memref<8x128xf32, #tpu.memory_space<vmem>>, vector<8x128xf32>
    tpu.vector_store %arg13[%c0_101, %c0_102], %207 {strides = array<i32>} : memref<8x128xf32, #tpu.memory_space<vmem>>, vector<8x128xf32>,
    %210 = arith.index_cast %173 : i32 to index
    %c0_103 = arith.constant 0 : index
    %211 = vector.load %arg11[%210, %c0_103] : memref<64x128xf32, #tpu.memory_space<vmem>>, vector<8x128xf32>
    tpu.vector_store %arg11[%210, %c0_103], %207 {strides = array<i32>} : memref<64x128xf32, #tpu.memory_space<vmem>>, vector<8x128xf32>,
    %c5_i32 = arith.constant 5 : i32
    %c8_i32_104 = arith.constant 8 : i32
    %212 = arith.muli %c5_i32, %c8_i32_104 : i32
    %213 = tpu.assume_multiple %212, 8 : i32
    %c0_105 = arith.constant 0 : index
    %c0_106 = arith.constant 0 : index
    %214 = vector.load %arg13[%c0_105, %c0_106] : memref<8x128xf32, #tpu.memory_space<vmem>>, vector<8x128xf32>
    %c0_107 = arith.constant 0 : index
    %c0_108 = arith.constant 0 : index
    %215 = vector.load %arg14[%c0_107, %c0_108] : memref<8x128xf32, #tpu.memory_space<vmem>>, vector<8x128xf32>
    %216 = arith.index_cast %213 : i32 to index
    %c0_109 = arith.constant 0 : index
    %217 = vector.load %arg12[%216, %c0_109] : memref<64x512xf32, #tpu.memory_space<vmem>>, vector<8x512xf32>
    %cst_110 = arith.constant dense<0.000000e+00> : vector<8x512xf32>
    %218 = tpu.matmul %214, %11, %cst_110 {dimension_numbers = #tpu.dot_dimension_numbers<[1], [0], [0], [1], [0, 0, 1, 1], [], []>} : vector<8x128xf32>, vector<128x512xf32>, vector<8x512xf32> -> vector<8x512xf32>
    %219 = arith.addf %217, %218 : vector<8x512xf32>
    %220 = vector.extract_strided_slice %219 {offsets = [0, 0], sizes = [8, 128], strides = [1, 1]} : vector<8x512xf32> to vector<8x128xf32>
    %cst_111 = arith.constant 0.000000e+00 : f32
    %221 = vector.broadcast %cst_111 : f32 to vector<8x128xf32>
    %222 = arith.subf %221, %220 : vector<8x128xf32>
    %223 = math.exp %222 : vector<8x128xf32>
    %cst_112 = arith.constant 1.000000e+00 : f32
    %224 = vector.broadcast %cst_112 : f32 to vector<8x128xf32>
    %225 = arith.addf %224, %223 : vector<8x128xf32>
    %226 = tpu.reciprocal %225 {approx = true} : vector<8x128xf32> -> vector<8x128xf32>
    %227 = vector.extract_strided_slice %219 {offsets = [0, 128], sizes = [8, 128], strides = [1, 1]} : vector<8x512xf32> to vector<8x128xf32>
    %cst_113 = arith.constant 0.000000e+00 : f32
    %228 = vector.broadcast %cst_113 : f32 to vector<8x128xf32>
    %229 = arith.subf %228, %227 : vector<8x128xf32>
    %230 = math.exp %229 : vector<8x128xf32>
    %cst_114 = arith.constant 1.000000e+00 : f32
    %231 = vector.broadcast %cst_114 : f32 to vector<8x128xf32>
    %232 = arith.addf %231, %230 : vector<8x128xf32>
    %233 = tpu.reciprocal %232 {approx = true} : vector<8x128xf32> -> vector<8x128xf32>
    %234 = vector.extract_strided_slice %219 {offsets = [0, 256], sizes = [8, 128], strides = [1, 1]} : vector<8x512xf32> to vector<8x128xf32>
    %235 = math.tanh %234 : vector<8x128xf32>
    %236 = vector.extract_strided_slice %219 {offsets = [0, 384], sizes = [8, 128], strides = [1, 1]} : vector<8x512xf32> to vector<8x128xf32>
    %cst_115 = arith.constant 0.000000e+00 : f32
    %237 = vector.broadcast %cst_115 : f32 to vector<8x128xf32>
    %238 = arith.subf %237, %236 : vector<8x128xf32>
    %239 = math.exp %238 : vector<8x128xf32>
    %cst_116 = arith.constant 1.000000e+00 : f32
    %240 = vector.broadcast %cst_116 : f32 to vector<8x128xf32>
    %241 = arith.addf %240, %239 : vector<8x128xf32>
    %242 = tpu.reciprocal %241 {approx = true} : vector<8x128xf32> -> vector<8x128xf32>
    %243 = arith.mulf %233, %215 : vector<8x128xf32>
    %244 = arith.mulf %226, %235 : vector<8x128xf32>
    %245 = arith.addf %243, %244 : vector<8x128xf32>
    %246 = math.tanh %245 : vector<8x128xf32>
    %247 = arith.mulf %242, %246 : vector<8x128xf32>
    %c0_117 = arith.constant 0 : index
    %c0_118 = arith.constant 0 : index
    %248 = vector.load %arg14[%c0_117, %c0_118] : memref<8x128xf32, #tpu.memory_space<vmem>>, vector<8x128xf32>
    tpu.vector_store %arg14[%c0_117, %c0_118], %245 {strides = array<i32>} : memref<8x128xf32, #tpu.memory_space<vmem>>, vector<8x128xf32>,
    %c0_119 = arith.constant 0 : index
    %c0_120 = arith.constant 0 : index
    %249 = vector.load %arg13[%c0_119, %c0_120] : memref<8x128xf32, #tpu.memory_space<vmem>>, vector<8x128xf32>
    tpu.vector_store %arg13[%c0_119, %c0_120], %247 {strides = array<i32>} : memref<8x128xf32, #tpu.memory_space<vmem>>, vector<8x128xf32>,
    %250 = arith.index_cast %213 : i32 to index
    %c0_121 = arith.constant 0 : index
    %251 = vector.load %arg11[%250, %c0_121] : memref<64x128xf32, #tpu.memory_space<vmem>>, vector<8x128xf32>
    tpu.vector_store %arg11[%250, %c0_121], %247 {strides = array<i32>} : memref<64x128xf32, #tpu.memory_space<vmem>>, vector<8x128xf32>,
    %c6_i32 = arith.constant 6 : i32
    %c8_i32_122 = arith.constant 8 : i32
    %252 = arith.muli %c6_i32, %c8_i32_122 : i32
    %253 = tpu.assume_multiple %252, 8 : i32
    %c0_123 = arith.constant 0 : index
    %c0_124 = arith.constant 0 : index
    %254 = vector.load %arg13[%c0_123, %c0_124] : memref<8x128xf32, #tpu.memory_space<vmem>>, vector<8x128xf32>
    %c0_125 = arith.constant 0 : index
    %c0_126 = arith.constant 0 : index
    %255 = vector.load %arg14[%c0_125, %c0_126] : memref<8x128xf32, #tpu.memory_space<vmem>>, vector<8x128xf32>
    %256 = arith.index_cast %253 : i32 to index
    %c0_127 = arith.constant 0 : index
    %257 = vector.load %arg12[%256, %c0_127] : memref<64x512xf32, #tpu.memory_space<vmem>>, vector<8x512xf32>
    %cst_128 = arith.constant dense<0.000000e+00> : vector<8x512xf32>
    %258 = tpu.matmul %254, %11, %cst_128 {dimension_numbers = #tpu.dot_dimension_numbers<[1], [0], [0], [1], [0, 0, 1, 1], [], []>} : vector<8x128xf32>, vector<128x512xf32>, vector<8x512xf32> -> vector<8x512xf32>
    %259 = arith.addf %257, %258 : vector<8x512xf32>
    %260 = vector.extract_strided_slice %259 {offsets = [0, 0], sizes = [8, 128], strides = [1, 1]} : vector<8x512xf32> to vector<8x128xf32>
    %cst_129 = arith.constant 0.000000e+00 : f32
    %261 = vector.broadcast %cst_129 : f32 to vector<8x128xf32>
    %262 = arith.subf %261, %260 : vector<8x128xf32>
    %263 = math.exp %262 : vector<8x128xf32>
    %cst_130 = arith.constant 1.000000e+00 : f32
    %264 = vector.broadcast %cst_130 : f32 to vector<8x128xf32>
    %265 = arith.addf %264, %263 : vector<8x128xf32>
    %266 = tpu.reciprocal %265 {approx = true} : vector<8x128xf32> -> vector<8x128xf32>
    %267 = vector.extract_strided_slice %259 {offsets = [0, 128], sizes = [8, 128], strides = [1, 1]} : vector<8x512xf32> to vector<8x128xf32>
    %cst_131 = arith.constant 0.000000e+00 : f32
    %268 = vector.broadcast %cst_131 : f32 to vector<8x128xf32>
    %269 = arith.subf %268, %267 : vector<8x128xf32>
    %270 = math.exp %269 : vector<8x128xf32>
    %cst_132 = arith.constant 1.000000e+00 : f32
    %271 = vector.broadcast %cst_132 : f32 to vector<8x128xf32>
    %272 = arith.addf %271, %270 : vector<8x128xf32>
    %273 = tpu.reciprocal %272 {approx = true} : vector<8x128xf32> -> vector<8x128xf32>
    %274 = vector.extract_strided_slice %259 {offsets = [0, 256], sizes = [8, 128], strides = [1, 1]} : vector<8x512xf32> to vector<8x128xf32>
    %275 = math.tanh %274 : vector<8x128xf32>
    %276 = vector.extract_strided_slice %259 {offsets = [0, 384], sizes = [8, 128], strides = [1, 1]} : vector<8x512xf32> to vector<8x128xf32>
    %cst_133 = arith.constant 0.000000e+00 : f32
    %277 = vector.broadcast %cst_133 : f32 to vector<8x128xf32>
    %278 = arith.subf %277, %276 : vector<8x128xf32>
    %279 = math.exp %278 : vector<8x128xf32>
    %cst_134 = arith.constant 1.000000e+00 : f32
    %280 = vector.broadcast %cst_134 : f32 to vector<8x128xf32>
    %281 = arith.addf %280, %279 : vector<8x128xf32>
    %282 = tpu.reciprocal %281 {approx = true} : vector<8x128xf32> -> vector<8x128xf32>
    %283 = arith.mulf %273, %255 : vector<8x128xf32>
    %284 = arith.mulf %266, %275 : vector<8x128xf32>
    %285 = arith.addf %283, %284 : vector<8x128xf32>
    %286 = math.tanh %285 : vector<8x128xf32>
    %287 = arith.mulf %282, %286 : vector<8x128xf32>
    %c0_135 = arith.constant 0 : index
    %c0_136 = arith.constant 0 : index
    %288 = vector.load %arg14[%c0_135, %c0_136] : memref<8x128xf32, #tpu.memory_space<vmem>>, vector<8x128xf32>
    tpu.vector_store %arg14[%c0_135, %c0_136], %285 {strides = array<i32>} : memref<8x128xf32, #tpu.memory_space<vmem>>, vector<8x128xf32>,
    %c0_137 = arith.constant 0 : index
    %c0_138 = arith.constant 0 : index
    %289 = vector.load %arg13[%c0_137, %c0_138] : memref<8x128xf32, #tpu.memory_space<vmem>>, vector<8x128xf32>
    tpu.vector_store %arg13[%c0_137, %c0_138], %287 {strides = array<i32>} : memref<8x128xf32, #tpu.memory_space<vmem>>, vector<8x128xf32>,
    %290 = arith.index_cast %253 : i32 to index
    %c0_139 = arith.constant 0 : index
    %291 = vector.load %arg11[%290, %c0_139] : memref<64x128xf32, #tpu.memory_space<vmem>>, vector<8x128xf32>
    tpu.vector_store %arg11[%290, %c0_139], %287 {strides = array<i32>} : memref<64x128xf32, #tpu.memory_space<vmem>>, vector<8x128xf32>,
    %c7_i32 = arith.constant 7 : i32
    %c8_i32_140 = arith.constant 8 : i32
    %292 = arith.muli %c7_i32, %c8_i32_140 : i32
    %293 = tpu.assume_multiple %292, 8 : i32
    %c0_141 = arith.constant 0 : index
    %c0_142 = arith.constant 0 : index
    %294 = vector.load %arg13[%c0_141, %c0_142] : memref<8x128xf32, #tpu.memory_space<vmem>>, vector<8x128xf32>
    %c0_143 = arith.constant 0 : index
    %c0_144 = arith.constant 0 : index
    %295 = vector.load %arg14[%c0_143, %c0_144] : memref<8x128xf32, #tpu.memory_space<vmem>>, vector<8x128xf32>
    %296 = arith.index_cast %293 : i32 to index
    %c0_145 = arith.constant 0 : index
    %297 = vector.load %arg12[%296, %c0_145] : memref<64x512xf32, #tpu.memory_space<vmem>>, vector<8x512xf32>
    %cst_146 = arith.constant dense<0.000000e+00> : vector<8x512xf32>
    %298 = tpu.matmul %294, %11, %cst_146 {dimension_numbers = #tpu.dot_dimension_numbers<[1], [0], [0], [1], [0, 0, 1, 1], [], []>} : vector<8x128xf32>, vector<128x512xf32>, vector<8x512xf32> -> vector<8x512xf32>
    %299 = arith.addf %297, %298 : vector<8x512xf32>
    %300 = vector.extract_strided_slice %299 {offsets = [0, 0], sizes = [8, 128], strides = [1, 1]} : vector<8x512xf32> to vector<8x128xf32>
    %cst_147 = arith.constant 0.000000e+00 : f32
    %301 = vector.broadcast %cst_147 : f32 to vector<8x128xf32>
    %302 = arith.subf %301, %300 : vector<8x128xf32>
    %303 = math.exp %302 : vector<8x128xf32>
    %cst_148 = arith.constant 1.000000e+00 : f32
    %304 = vector.broadcast %cst_148 : f32 to vector<8x128xf32>
    %305 = arith.addf %304, %303 : vector<8x128xf32>
    %306 = tpu.reciprocal %305 {approx = true} : vector<8x128xf32> -> vector<8x128xf32>
    %307 = vector.extract_strided_slice %299 {offsets = [0, 128], sizes = [8, 128], strides = [1, 1]} : vector<8x512xf32> to vector<8x128xf32>
    %cst_149 = arith.constant 0.000000e+00 : f32
    %308 = vector.broadcast %cst_149 : f32 to vector<8x128xf32>
    %309 = arith.subf %308, %307 : vector<8x128xf32>
    %310 = math.exp %309 : vector<8x128xf32>
    %cst_150 = arith.constant 1.000000e+00 : f32
    %311 = vector.broadcast %cst_150 : f32 to vector<8x128xf32>
    %312 = arith.addf %311, %310 : vector<8x128xf32>
    %313 = tpu.reciprocal %312 {approx = true} : vector<8x128xf32> -> vector<8x128xf32>
    %314 = vector.extract_strided_slice %299 {offsets = [0, 256], sizes = [8, 128], strides = [1, 1]} : vector<8x512xf32> to vector<8x128xf32>
    %315 = math.tanh %314 : vector<8x128xf32>
    %316 = vector.extract_strided_slice %299 {offsets = [0, 384], sizes = [8, 128], strides = [1, 1]} : vector<8x512xf32> to vector<8x128xf32>
    %cst_151 = arith.constant 0.000000e+00 : f32
    %317 = vector.broadcast %cst_151 : f32 to vector<8x128xf32>
    %318 = arith.subf %317, %316 : vector<8x128xf32>
    %319 = math.exp %318 : vector<8x128xf32>
    %cst_152 = arith.constant 1.000000e+00 : f32
    %320 = vector.broadcast %cst_152 : f32 to vector<8x128xf32>
    %321 = arith.addf %320, %319 : vector<8x128xf32>
    %322 = tpu.reciprocal %321 {approx = true} : vector<8x128xf32> -> vector<8x128xf32>
    %323 = arith.mulf %313, %295 : vector<8x128xf32>
    %324 = arith.mulf %306, %315 : vector<8x128xf32>
    %325 = arith.addf %323, %324 : vector<8x128xf32>
    %326 = math.tanh %325 : vector<8x128xf32>
    %327 = arith.mulf %322, %326 : vector<8x128xf32>
    %c0_153 = arith.constant 0 : index
    %c0_154 = arith.constant 0 : index
    %328 = vector.load %arg14[%c0_153, %c0_154] : memref<8x128xf32, #tpu.memory_space<vmem>>, vector<8x128xf32>
    tpu.vector_store %arg14[%c0_153, %c0_154], %325 {strides = array<i32>} : memref<8x128xf32, #tpu.memory_space<vmem>>, vector<8x128xf32>,
    %c0_155 = arith.constant 0 : index
    %c0_156 = arith.constant 0 : index
    %329 = vector.load %arg13[%c0_155, %c0_156] : memref<8x128xf32, #tpu.memory_space<vmem>>, vector<8x128xf32>
    tpu.vector_store %arg13[%c0_155, %c0_156], %327 {strides = array<i32>} : memref<8x128xf32, #tpu.memory_space<vmem>>, vector<8x128xf32>,
    %330 = arith.index_cast %293 : i32 to index
    %c0_157 = arith.constant 0 : index
    %331 = vector.load %arg11[%330, %c0_157] : memref<64x128xf32, #tpu.memory_space<vmem>>, vector<8x128xf32>
    tpu.vector_store %arg11[%330, %c0_157], %327 {strides = array<i32>} : memref<64x128xf32, #tpu.memory_space<vmem>>, vector<8x128xf32>,
    %c8_i32_158 = arith.constant 8 : i32
    %c0_159 = arith.constant 0 : index
    %c0_160 = arith.constant 0 : index
    %332 = vector.load %arg11[%c0_159, %c0_160] : memref<64x128xf32, #tpu.memory_space<vmem>>, vector<64x128xf32>
    %c0_161 = arith.constant 0 : index
    %c0_162 = arith.constant 0 : index
    %333 = vector.load %arg5[%c0_161, %c0_162] : memref<128x512xf32, #tpu.memory_space<vmem>>, vector<128x512xf32>
    %cst_163 = arith.constant dense<0.000000e+00> : vector<64x512xf32>
    %334 = tpu.matmul %332, %333, %cst_163 {dimension_numbers = #tpu.dot_dimension_numbers<[1], [0], [0], [1], [0, 0, 1, 1], [], []>} : vector<64x128xf32>, vector<128x512xf32>, vector<64x512xf32> -> vector<64x512xf32>
    %c0_164 = arith.constant 0 : index
    %c0_165 = arith.constant 0 : index
    %335 = vector.load %arg7[%c0_164, %c0_165] : memref<1x512xf32, #tpu.memory_space<vmem>>, vector<1x512xf32>
    %336 = vector.broadcast %335 : vector<1x512xf32> to vector<64x512xf32>
    %337 = arith.addf %334, %336 : vector<64x512xf32>
    %c0_166 = arith.constant 0 : index
    %c0_167 = arith.constant 0 : index
    %338 = vector.load %arg12[%c0_166, %c0_167] : memref<64x512xf32, #tpu.memory_space<vmem>>, vector<64x512xf32>
    tpu.vector_store %arg12[%c0_166, %c0_167], %337 {strides = array<i32>} : memref<64x512xf32, #tpu.memory_space<vmem>>, vector<64x512xf32>,
    %cst_168 = arith.constant 0.000000e+00 : f32
    %339 = vector.broadcast %cst_168 : f32 to vector<8x128xf32>
    %c0_169 = arith.constant 0 : index
    %c0_170 = arith.constant 0 : index
    %340 = vector.load %arg13[%c0_169, %c0_170] : memref<8x128xf32, #tpu.memory_space<vmem>>, vector<8x128xf32>
    tpu.vector_store %arg13[%c0_169, %c0_170], %339 {strides = array<i32>} : memref<8x128xf32, #tpu.memory_space<vmem>>, vector<8x128xf32>,
    %cst_171 = arith.constant 0.000000e+00 : f32
    %341 = vector.broadcast %cst_171 : f32 to vector<8x128xf32>
    %c0_172 = arith.constant 0 : index
    %c0_173 = arith.constant 0 : index
    %342 = vector.load %arg14[%c0_172, %c0_173] : memref<8x128xf32, #tpu.memory_space<vmem>>, vector<8x128xf32>
    tpu.vector_store %arg14[%c0_172, %c0_173], %341 {strides = array<i32>} : memref<8x128xf32, #tpu.memory_space<vmem>>, vector<8x128xf32>,
    %c0_174 = arith.constant 0 : index
    %c0_175 = arith.constant 0 : index
    %343 = vector.load %arg6[%c0_174, %c0_175] : memref<128x512xf32, #tpu.memory_space<vmem>>, vector<128x512xf32>
    %c0_i32_176 = arith.constant 0 : i32
    %c8_i32_177 = arith.constant 8 : i32
    %344 = arith.muli %c0_i32_176, %c8_i32_177 : i32
    %345 = tpu.assume_multiple %344, 8 : i32
    %c0_178 = arith.constant 0 : index
    %c0_179 = arith.constant 0 : index
    %346 = vector.load %arg13[%c0_178, %c0_179] : memref<8x128xf32, #tpu.memory_space<vmem>>, vector<8x128xf32>
    %c0_180 = arith.constant 0 : index
    %c0_181 = arith.constant 0 : index
    %347 = vector.load %arg14[%c0_180, %c0_181] : memref<8x128xf32, #tpu.memory_space<vmem>>, vector<8x128xf32>
    %348 = arith.index_cast %345 : i32 to index
    %c0_182 = arith.constant 0 : index
    %349 = vector.load %arg12[%348, %c0_182] : memref<64x512xf32, #tpu.memory_space<vmem>>, vector<8x512xf32>
    %cst_183 = arith.constant dense<0.000000e+00> : vector<8x512xf32>
    %350 = tpu.matmul %346, %343, %cst_183 {dimension_numbers = #tpu.dot_dimension_numbers<[1], [0], [0], [1], [0, 0, 1, 1], [], []>} : vector<8x128xf32>, vector<128x512xf32>, vector<8x512xf32> -> vector<8x512xf32>
    %351 = arith.addf %349, %350 : vector<8x512xf32>
    %352 = vector.extract_strided_slice %351 {offsets = [0, 0], sizes = [8, 128], strides = [1, 1]} : vector<8x512xf32> to vector<8x128xf32>
    %cst_184 = arith.constant 0.000000e+00 : f32
    %353 = vector.broadcast %cst_184 : f32 to vector<8x128xf32>
    %354 = arith.subf %353, %352 : vector<8x128xf32>
    %355 = math.exp %354 : vector<8x128xf32>
    %cst_185 = arith.constant 1.000000e+00 : f32
    %356 = vector.broadcast %cst_185 : f32 to vector<8x128xf32>
    %357 = arith.addf %356, %355 : vector<8x128xf32>
    %358 = tpu.reciprocal %357 {approx = true} : vector<8x128xf32> -> vector<8x128xf32>
    %359 = vector.extract_strided_slice %351 {offsets = [0, 128], sizes = [8, 128], strides = [1, 1]} : vector<8x512xf32> to vector<8x128xf32>
    %cst_186 = arith.constant 0.000000e+00 : f32
    %360 = vector.broadcast %cst_186 : f32 to vector<8x128xf32>
    %361 = arith.subf %360, %359 : vector<8x128xf32>
    %362 = math.exp %361 : vector<8x128xf32>
    %cst_187 = arith.constant 1.000000e+00 : f32
    %363 = vector.broadcast %cst_187 : f32 to vector<8x128xf32>
    %364 = arith.addf %363, %362 : vector<8x128xf32>
    %365 = tpu.reciprocal %364 {approx = true} : vector<8x128xf32> -> vector<8x128xf32>
    %366 = vector.extract_strided_slice %351 {offsets = [0, 256], sizes = [8, 128], strides = [1, 1]} : vector<8x512xf32> to vector<8x128xf32>
    %367 = math.tanh %366 : vector<8x128xf32>
    %368 = vector.extract_strided_slice %351 {offsets = [0, 384], sizes = [8, 128], strides = [1, 1]} : vector<8x512xf32> to vector<8x128xf32>
    %cst_188 = arith.constant 0.000000e+00 : f32
    %369 = vector.broadcast %cst_188 : f32 to vector<8x128xf32>
    %370 = arith.subf %369, %368 : vector<8x128xf32>
    %371 = math.exp %370 : vector<8x128xf32>
    %cst_189 = arith.constant 1.000000e+00 : f32
    %372 = vector.broadcast %cst_189 : f32 to vector<8x128xf32>
    %373 = arith.addf %372, %371 : vector<8x128xf32>
    %374 = tpu.reciprocal %373 {approx = true} : vector<8x128xf32> -> vector<8x128xf32>
    %375 = arith.mulf %365, %347 : vector<8x128xf32>
    %376 = arith.mulf %358, %367 : vector<8x128xf32>
    %377 = arith.addf %375, %376 : vector<8x128xf32>
    %378 = math.tanh %377 : vector<8x128xf32>
    %379 = arith.mulf %374, %378 : vector<8x128xf32>
    %c0_190 = arith.constant 0 : index
    %c0_191 = arith.constant 0 : index
    %380 = vector.load %arg14[%c0_190, %c0_191] : memref<8x128xf32, #tpu.memory_space<vmem>>, vector<8x128xf32>
    tpu.vector_store %arg14[%c0_190, %c0_191], %377 {strides = array<i32>} : memref<8x128xf32, #tpu.memory_space<vmem>>, vector<8x128xf32>,
    %c0_192 = arith.constant 0 : index
    %c0_193 = arith.constant 0 : index
    %381 = vector.load %arg13[%c0_192, %c0_193] : memref<8x128xf32, #tpu.memory_space<vmem>>, vector<8x128xf32>
    tpu.vector_store %arg13[%c0_192, %c0_193], %379 {strides = array<i32>} : memref<8x128xf32, #tpu.memory_space<vmem>>, vector<8x128xf32>,
    %c1_i32_194 = arith.constant 1 : i32
    %c8_i32_195 = arith.constant 8 : i32
    %382 = arith.muli %c1_i32_194, %c8_i32_195 : i32
    %383 = tpu.assume_multiple %382, 8 : i32
    %c0_196 = arith.constant 0 : index
    %c0_197 = arith.constant 0 : index
    %384 = vector.load %arg13[%c0_196, %c0_197] : memref<8x128xf32, #tpu.memory_space<vmem>>, vector<8x128xf32>
    %c0_198 = arith.constant 0 : index
    %c0_199 = arith.constant 0 : index
    %385 = vector.load %arg14[%c0_198, %c0_199] : memref<8x128xf32, #tpu.memory_space<vmem>>, vector<8x128xf32>
    %386 = arith.index_cast %383 : i32 to index
    %c0_200 = arith.constant 0 : index
    %387 = vector.load %arg12[%386, %c0_200] : memref<64x512xf32, #tpu.memory_space<vmem>>, vector<8x512xf32>
    %cst_201 = arith.constant dense<0.000000e+00> : vector<8x512xf32>
    %388 = tpu.matmul %384, %343, %cst_201 {dimension_numbers = #tpu.dot_dimension_numbers<[1], [0], [0], [1], [0, 0, 1, 1], [], []>} : vector<8x128xf32>, vector<128x512xf32>, vector<8x512xf32> -> vector<8x512xf32>
    %389 = arith.addf %387, %388 : vector<8x512xf32>
    %390 = vector.extract_strided_slice %389 {offsets = [0, 0], sizes = [8, 128], strides = [1, 1]} : vector<8x512xf32> to vector<8x128xf32>
    %cst_202 = arith.constant 0.000000e+00 : f32
    %391 = vector.broadcast %cst_202 : f32 to vector<8x128xf32>
    %392 = arith.subf %391, %390 : vector<8x128xf32>
    %393 = math.exp %392 : vector<8x128xf32>
    %cst_203 = arith.constant 1.000000e+00 : f32
    %394 = vector.broadcast %cst_203 : f32 to vector<8x128xf32>
    %395 = arith.addf %394, %393 : vector<8x128xf32>
    %396 = tpu.reciprocal %395 {approx = true} : vector<8x128xf32> -> vector<8x128xf32>
    %397 = vector.extract_strided_slice %389 {offsets = [0, 128], sizes = [8, 128], strides = [1, 1]} : vector<8x512xf32> to vector<8x128xf32>
    %cst_204 = arith.constant 0.000000e+00 : f32
    %398 = vector.broadcast %cst_204 : f32 to vector<8x128xf32>
    %399 = arith.subf %398, %397 : vector<8x128xf32>
    %400 = math.exp %399 : vector<8x128xf32>
    %cst_205 = arith.constant 1.000000e+00 : f32
    %401 = vector.broadcast %cst_205 : f32 to vector<8x128xf32>
    %402 = arith.addf %401, %400 : vector<8x128xf32>
    %403 = tpu.reciprocal %402 {approx = true} : vector<8x128xf32> -> vector<8x128xf32>
    %404 = vector.extract_strided_slice %389 {offsets = [0, 256], sizes = [8, 128], strides = [1, 1]} : vector<8x512xf32> to vector<8x128xf32>
    %405 = math.tanh %404 : vector<8x128xf32>
    %406 = vector.extract_strided_slice %389 {offsets = [0, 384], sizes = [8, 128], strides = [1, 1]} : vector<8x512xf32> to vector<8x128xf32>
    %cst_206 = arith.constant 0.000000e+00 : f32
    %407 = vector.broadcast %cst_206 : f32 to vector<8x128xf32>
    %408 = arith.subf %407, %406 : vector<8x128xf32>
    %409 = math.exp %408 : vector<8x128xf32>
    %cst_207 = arith.constant 1.000000e+00 : f32
    %410 = vector.broadcast %cst_207 : f32 to vector<8x128xf32>
    %411 = arith.addf %410, %409 : vector<8x128xf32>
    %412 = tpu.reciprocal %411 {approx = true} : vector<8x128xf32> -> vector<8x128xf32>
    %413 = arith.mulf %403, %385 : vector<8x128xf32>
    %414 = arith.mulf %396, %405 : vector<8x128xf32>
    %415 = arith.addf %413, %414 : vector<8x128xf32>
    %416 = math.tanh %415 : vector<8x128xf32>
    %417 = arith.mulf %412, %416 : vector<8x128xf32>
    %c0_208 = arith.constant 0 : index
    %c0_209 = arith.constant 0 : index
    %418 = vector.load %arg14[%c0_208, %c0_209] : memref<8x128xf32, #tpu.memory_space<vmem>>, vector<8x128xf32>
    tpu.vector_store %arg14[%c0_208, %c0_209], %415 {strides = array<i32>} : memref<8x128xf32, #tpu.memory_space<vmem>>, vector<8x128xf32>,
    %c0_210 = arith.constant 0 : index
    %c0_211 = arith.constant 0 : index
    %419 = vector.load %arg13[%c0_210, %c0_211] : memref<8x128xf32, #tpu.memory_space<vmem>>, vector<8x128xf32>
    tpu.vector_store %arg13[%c0_210, %c0_211], %417 {strides = array<i32>} : memref<8x128xf32, #tpu.memory_space<vmem>>, vector<8x128xf32>,
    %c2_i32_212 = arith.constant 2 : i32
    %c8_i32_213 = arith.constant 8 : i32
    %420 = arith.muli %c2_i32_212, %c8_i32_213 : i32
    %421 = tpu.assume_multiple %420, 8 : i32
    %c0_214 = arith.constant 0 : index
    %c0_215 = arith.constant 0 : index
    %422 = vector.load %arg13[%c0_214, %c0_215] : memref<8x128xf32, #tpu.memory_space<vmem>>, vector<8x128xf32>
    %c0_216 = arith.constant 0 : index
    %c0_217 = arith.constant 0 : index
    %423 = vector.load %arg14[%c0_216, %c0_217] : memref<8x128xf32, #tpu.memory_space<vmem>>, vector<8x128xf32>
    %424 = arith.index_cast %421 : i32 to index
    %c0_218 = arith.constant 0 : index
    %425 = vector.load %arg12[%424, %c0_218] : memref<64x512xf32, #tpu.memory_space<vmem>>, vector<8x512xf32>
    %cst_219 = arith.constant dense<0.000000e+00> : vector<8x512xf32>
    %426 = tpu.matmul %422, %343, %cst_219 {dimension_numbers = #tpu.dot_dimension_numbers<[1], [0], [0], [1], [0, 0, 1, 1], [], []>} : vector<8x128xf32>, vector<128x512xf32>, vector<8x512xf32> -> vector<8x512xf32>
    %427 = arith.addf %425, %426 : vector<8x512xf32>
    %428 = vector.extract_strided_slice %427 {offsets = [0, 0], sizes = [8, 128], strides = [1, 1]} : vector<8x512xf32> to vector<8x128xf32>
    %cst_220 = arith.constant 0.000000e+00 : f32
    %429 = vector.broadcast %cst_220 : f32 to vector<8x128xf32>
    %430 = arith.subf %429, %428 : vector<8x128xf32>
    %431 = math.exp %430 : vector<8x128xf32>
    %cst_221 = arith.constant 1.000000e+00 : f32
    %432 = vector.broadcast %cst_221 : f32 to vector<8x128xf32>
    %433 = arith.addf %432, %431 : vector<8x128xf32>
    %434 = tpu.reciprocal %433 {approx = true} : vector<8x128xf32> -> vector<8x128xf32>
    %435 = vector.extract_strided_slice %427 {offsets = [0, 128], sizes = [8, 128], strides = [1, 1]} : vector<8x512xf32> to vector<8x128xf32>
    %cst_222 = arith.constant 0.000000e+00 : f32
    %436 = vector.broadcast %cst_222 : f32 to vector<8x128xf32>
    %437 = arith.subf %436, %435 : vector<8x128xf32>
    %438 = math.exp %437 : vector<8x128xf32>
    %cst_223 = arith.constant 1.000000e+00 : f32
    %439 = vector.broadcast %cst_223 : f32 to vector<8x128xf32>
    %440 = arith.addf %439, %438 : vector<8x128xf32>
    %441 = tpu.reciprocal %440 {approx = true} : vector<8x128xf32> -> vector<8x128xf32>
    %442 = vector.extract_strided_slice %427 {offsets = [0, 256], sizes = [8, 128], strides = [1, 1]} : vector<8x512xf32> to vector<8x128xf32>
    %443 = math.tanh %442 : vector<8x128xf32>
    %444 = vector.extract_strided_slice %427 {offsets = [0, 384], sizes = [8, 128], strides = [1, 1]} : vector<8x512xf32> to vector<8x128xf32>
    %cst_224 = arith.constant 0.000000e+00 : f32
    %445 = vector.broadcast %cst_224 : f32 to vector<8x128xf32>
    %446 = arith.subf %445, %444 : vector<8x128xf32>
    %447 = math.exp %446 : vector<8x128xf32>
    %cst_225 = arith.constant 1.000000e+00 : f32
    %448 = vector.broadcast %cst_225 : f32 to vector<8x128xf32>
    %449 = arith.addf %448, %447 : vector<8x128xf32>
    %450 = tpu.reciprocal %449 {approx = true} : vector<8x128xf32> -> vector<8x128xf32>
    %451 = arith.mulf %441, %423 : vector<8x128xf32>
    %452 = arith.mulf %434, %443 : vector<8x128xf32>
    %453 = arith.addf %451, %452 : vector<8x128xf32>
    %454 = math.tanh %453 : vector<8x128xf32>
    %455 = arith.mulf %450, %454 : vector<8x128xf32>
    %c0_226 = arith.constant 0 : index
    %c0_227 = arith.constant 0 : index
    %456 = vector.load %arg14[%c0_226, %c0_227] : memref<8x128xf32, #tpu.memory_space<vmem>>, vector<8x128xf32>
    tpu.vector_store %arg14[%c0_226, %c0_227], %453 {strides = array<i32>} : memref<8x128xf32, #tpu.memory_space<vmem>>, vector<8x128xf32>,
    %c0_228 = arith.constant 0 : index
    %c0_229 = arith.constant 0 : index
    %457 = vector.load %arg13[%c0_228, %c0_229] : memref<8x128xf32, #tpu.memory_space<vmem>>, vector<8x128xf32>
    tpu.vector_store %arg13[%c0_228, %c0_229], %455 {strides = array<i32>} : memref<8x128xf32, #tpu.memory_space<vmem>>, vector<8x128xf32>,
    %c3_i32_230 = arith.constant 3 : i32
    %c8_i32_231 = arith.constant 8 : i32
    %458 = arith.muli %c3_i32_230, %c8_i32_231 : i32
    %459 = tpu.assume_multiple %458, 8 : i32
    %c0_232 = arith.constant 0 : index
    %c0_233 = arith.constant 0 : index
    %460 = vector.load %arg13[%c0_232, %c0_233] : memref<8x128xf32, #tpu.memory_space<vmem>>, vector<8x128xf32>
    %c0_234 = arith.constant 0 : index
    %c0_235 = arith.constant 0 : index
    %461 = vector.load %arg14[%c0_234, %c0_235] : memref<8x128xf32, #tpu.memory_space<vmem>>, vector<8x128xf32>
    %462 = arith.index_cast %459 : i32 to index
    %c0_236 = arith.constant 0 : index
    %463 = vector.load %arg12[%462, %c0_236] : memref<64x512xf32, #tpu.memory_space<vmem>>, vector<8x512xf32>
    %cst_237 = arith.constant dense<0.000000e+00> : vector<8x512xf32>
    %464 = tpu.matmul %460, %343, %cst_237 {dimension_numbers = #tpu.dot_dimension_numbers<[1], [0], [0], [1], [0, 0, 1, 1], [], []>} : vector<8x128xf32>, vector<128x512xf32>, vector<8x512xf32> -> vector<8x512xf32>
    %465 = arith.addf %463, %464 : vector<8x512xf32>
    %466 = vector.extract_strided_slice %465 {offsets = [0, 0], sizes = [8, 128], strides = [1, 1]} : vector<8x512xf32> to vector<8x128xf32>
    %cst_238 = arith.constant 0.000000e+00 : f32
    %467 = vector.broadcast %cst_238 : f32 to vector<8x128xf32>
    %468 = arith.subf %467, %466 : vector<8x128xf32>
    %469 = math.exp %468 : vector<8x128xf32>
    %cst_239 = arith.constant 1.000000e+00 : f32
    %470 = vector.broadcast %cst_239 : f32 to vector<8x128xf32>
    %471 = arith.addf %470, %469 : vector<8x128xf32>
    %472 = tpu.reciprocal %471 {approx = true} : vector<8x128xf32> -> vector<8x128xf32>
    %473 = vector.extract_strided_slice %465 {offsets = [0, 128], sizes = [8, 128], strides = [1, 1]} : vector<8x512xf32> to vector<8x128xf32>
    %cst_240 = arith.constant 0.000000e+00 : f32
    %474 = vector.broadcast %cst_240 : f32 to vector<8x128xf32>
    %475 = arith.subf %474, %473 : vector<8x128xf32>
    %476 = math.exp %475 : vector<8x128xf32>
    %cst_241 = arith.constant 1.000000e+00 : f32
    %477 = vector.broadcast %cst_241 : f32 to vector<8x128xf32>
    %478 = arith.addf %477, %476 : vector<8x128xf32>
    %479 = tpu.reciprocal %478 {approx = true} : vector<8x128xf32> -> vector<8x128xf32>
    %480 = vector.extract_strided_slice %465 {offsets = [0, 256], sizes = [8, 128], strides = [1, 1]} : vector<8x512xf32> to vector<8x128xf32>
    %481 = math.tanh %480 : vector<8x128xf32>
    %482 = vector.extract_strided_slice %465 {offsets = [0, 384], sizes = [8, 128], strides = [1, 1]} : vector<8x512xf32> to vector<8x128xf32>
    %cst_242 = arith.constant 0.000000e+00 : f32
    %483 = vector.broadcast %cst_242 : f32 to vector<8x128xf32>
    %484 = arith.subf %483, %482 : vector<8x128xf32>
    %485 = math.exp %484 : vector<8x128xf32>
    %cst_243 = arith.constant 1.000000e+00 : f32
    %486 = vector.broadcast %cst_243 : f32 to vector<8x128xf32>
    %487 = arith.addf %486, %485 : vector<8x128xf32>
    %488 = tpu.reciprocal %487 {approx = true} : vector<8x128xf32> -> vector<8x128xf32>
    %489 = arith.mulf %479, %461 : vector<8x128xf32>
    %490 = arith.mulf %472, %481 : vector<8x128xf32>
    %491 = arith.addf %489, %490 : vector<8x128xf32>
    %492 = math.tanh %491 : vector<8x128xf32>
    %493 = arith.mulf %488, %492 : vector<8x128xf32>
    %c0_244 = arith.constant 0 : index
    %c0_245 = arith.constant 0 : index
    %494 = vector.load %arg14[%c0_244, %c0_245] : memref<8x128xf32, #tpu.memory_space<vmem>>, vector<8x128xf32>
    tpu.vector_store %arg14[%c0_244, %c0_245], %491 {strides = array<i32>} : memref<8x128xf32, #tpu.memory_space<vmem>>, vector<8x128xf32>,
    %c0_246 = arith.constant 0 : index
    %c0_247 = arith.constant 0 : index
    %495 = vector.load %arg13[%c0_246, %c0_247] : memref<8x128xf32, #tpu.memory_space<vmem>>, vector<8x128xf32>
    tpu.vector_store %arg13[%c0_246, %c0_247], %493 {strides = array<i32>} : memref<8x128xf32, #tpu.memory_space<vmem>>, vector<8x128xf32>,
    %c4_i32_248 = arith.constant 4 : i32
    %c8_i32_249 = arith.constant 8 : i32
    %496 = arith.muli %c4_i32_248, %c8_i32_249 : i32
    %497 = tpu.assume_multiple %496, 8 : i32
    %c0_250 = arith.constant 0 : index
    %c0_251 = arith.constant 0 : index
    %498 = vector.load %arg13[%c0_250, %c0_251] : memref<8x128xf32, #tpu.memory_space<vmem>>, vector<8x128xf32>
    %c0_252 = arith.constant 0 : index
    %c0_253 = arith.constant 0 : index
    %499 = vector.load %arg14[%c0_252, %c0_253] : memref<8x128xf32, #tpu.memory_space<vmem>>, vector<8x128xf32>
    %500 = arith.index_cast %497 : i32 to index
    %c0_254 = arith.constant 0 : index
    %501 = vector.load %arg12[%500, %c0_254] : memref<64x512xf32, #tpu.memory_space<vmem>>, vector<8x512xf32>
    %cst_255 = arith.constant dense<0.000000e+00> : vector<8x512xf32>
    %502 = tpu.matmul %498, %343, %cst_255 {dimension_numbers = #tpu.dot_dimension_numbers<[1], [0], [0], [1], [0, 0, 1, 1], [], []>} : vector<8x128xf32>, vector<128x512xf32>, vector<8x512xf32> -> vector<8x512xf32>
    %503 = arith.addf %501, %502 : vector<8x512xf32>
    %504 = vector.extract_strided_slice %503 {offsets = [0, 0], sizes = [8, 128], strides = [1, 1]} : vector<8x512xf32> to vector<8x128xf32>
    %cst_256 = arith.constant 0.000000e+00 : f32
    %505 = vector.broadcast %cst_256 : f32 to vector<8x128xf32>
    %506 = arith.subf %505, %504 : vector<8x128xf32>
    %507 = math.exp %506 : vector<8x128xf32>
    %cst_257 = arith.constant 1.000000e+00 : f32
    %508 = vector.broadcast %cst_257 : f32 to vector<8x128xf32>
    %509 = arith.addf %508, %507 : vector<8x128xf32>
    %510 = tpu.reciprocal %509 {approx = true} : vector<8x128xf32> -> vector<8x128xf32>
    %511 = vector.extract_strided_slice %503 {offsets = [0, 128], sizes = [8, 128], strides = [1, 1]} : vector<8x512xf32> to vector<8x128xf32>
    %cst_258 = arith.constant 0.000000e+00 : f32
    %512 = vector.broadcast %cst_258 : f32 to vector<8x128xf32>
    %513 = arith.subf %512, %511 : vector<8x128xf32>
    %514 = math.exp %513 : vector<8x128xf32>
    %cst_259 = arith.constant 1.000000e+00 : f32
    %515 = vector.broadcast %cst_259 : f32 to vector<8x128xf32>
    %516 = arith.addf %515, %514 : vector<8x128xf32>
    %517 = tpu.reciprocal %516 {approx = true} : vector<8x128xf32> -> vector<8x128xf32>
    %518 = vector.extract_strided_slice %503 {offsets = [0, 256], sizes = [8, 128], strides = [1, 1]} : vector<8x512xf32> to vector<8x128xf32>
    %519 = math.tanh %518 : vector<8x128xf32>
    %520 = vector.extract_strided_slice %503 {offsets = [0, 384], sizes = [8, 128], strides = [1, 1]} : vector<8x512xf32> to vector<8x128xf32>
    %cst_260 = arith.constant 0.000000e+00 : f32
    %521 = vector.broadcast %cst_260 : f32 to vector<8x128xf32>
    %522 = arith.subf %521, %520 : vector<8x128xf32>
    %523 = math.exp %522 : vector<8x128xf32>
    %cst_261 = arith.constant 1.000000e+00 : f32
    %524 = vector.broadcast %cst_261 : f32 to vector<8x128xf32>
    %525 = arith.addf %524, %523 : vector<8x128xf32>
    %526 = tpu.reciprocal %525 {approx = true} : vector<8x128xf32> -> vector<8x128xf32>
    %527 = arith.mulf %517, %499 : vector<8x128xf32>
    %528 = arith.mulf %510, %519 : vector<8x128xf32>
    %529 = arith.addf %527, %528 : vector<8x128xf32>
    %530 = math.tanh %529 : vector<8x128xf32>
    %531 = arith.mulf %526, %530 : vector<8x128xf32>
    %c0_262 = arith.constant 0 : index
    %c0_263 = arith.constant 0 : index
    %532 = vector.load %arg14[%c0_262, %c0_263] : memref<8x128xf32, #tpu.memory_space<vmem>>, vector<8x128xf32>
    tpu.vector_store %arg14[%c0_262, %c0_263], %529 {strides = array<i32>} : memref<8x128xf32, #tpu.memory_space<vmem>>, vector<8x128xf32>,
    %c0_264 = arith.constant 0 : index
    %c0_265 = arith.constant 0 : index
    %533 = vector.load %arg13[%c0_264, %c0_265] : memref<8x128xf32, #tpu.memory_space<vmem>>, vector<8x128xf32>
    tpu.vector_store %arg13[%c0_264, %c0_265], %531 {strides = array<i32>} : memref<8x128xf32, #tpu.memory_space<vmem>>, vector<8x128xf32>,
    %c5_i32_266 = arith.constant 5 : i32
    %c8_i32_267 = arith.constant 8 : i32
    %534 = arith.muli %c5_i32_266, %c8_i32_267 : i32
    %535 = tpu.assume_multiple %534, 8 : i32
    %c0_268 = arith.constant 0 : index
    %c0_269 = arith.constant 0 : index
    %536 = vector.load %arg13[%c0_268, %c0_269] : memref<8x128xf32, #tpu.memory_space<vmem>>, vector<8x128xf32>
    %c0_270 = arith.constant 0 : index
    %c0_271 = arith.constant 0 : index
    %537 = vector.load %arg14[%c0_270, %c0_271] : memref<8x128xf32, #tpu.memory_space<vmem>>, vector<8x128xf32>
    %538 = arith.index_cast %535 : i32 to index
    %c0_272 = arith.constant 0 : index
    %539 = vector.load %arg12[%538, %c0_272] : memref<64x512xf32, #tpu.memory_space<vmem>>, vector<8x512xf32>
    %cst_273 = arith.constant dense<0.000000e+00> : vector<8x512xf32>
    %540 = tpu.matmul %536, %343, %cst_273 {dimension_numbers = #tpu.dot_dimension_numbers<[1], [0], [0], [1], [0, 0, 1, 1], [], []>} : vector<8x128xf32>, vector<128x512xf32>, vector<8x512xf32> -> vector<8x512xf32>
    %541 = arith.addf %539, %540 : vector<8x512xf32>
    %542 = vector.extract_strided_slice %541 {offsets = [0, 0], sizes = [8, 128], strides = [1, 1]} : vector<8x512xf32> to vector<8x128xf32>
    %cst_274 = arith.constant 0.000000e+00 : f32
    %543 = vector.broadcast %cst_274 : f32 to vector<8x128xf32>
    %544 = arith.subf %543, %542 : vector<8x128xf32>
    %545 = math.exp %544 : vector<8x128xf32>
    %cst_275 = arith.constant 1.000000e+00 : f32
    %546 = vector.broadcast %cst_275 : f32 to vector<8x128xf32>
    %547 = arith.addf %546, %545 : vector<8x128xf32>
    %548 = tpu.reciprocal %547 {approx = true} : vector<8x128xf32> -> vector<8x128xf32>
    %549 = vector.extract_strided_slice %541 {offsets = [0, 128], sizes = [8, 128], strides = [1, 1]} : vector<8x512xf32> to vector<8x128xf32>
    %cst_276 = arith.constant 0.000000e+00 : f32
    %550 = vector.broadcast %cst_276 : f32 to vector<8x128xf32>
    %551 = arith.subf %550, %549 : vector<8x128xf32>
    %552 = math.exp %551 : vector<8x128xf32>
    %cst_277 = arith.constant 1.000000e+00 : f32
    %553 = vector.broadcast %cst_277 : f32 to vector<8x128xf32>
    %554 = arith.addf %553, %552 : vector<8x128xf32>
    %555 = tpu.reciprocal %554 {approx = true} : vector<8x128xf32> -> vector<8x128xf32>
    %556 = vector.extract_strided_slice %541 {offsets = [0, 256], sizes = [8, 128], strides = [1, 1]} : vector<8x512xf32> to vector<8x128xf32>
    %557 = math.tanh %556 : vector<8x128xf32>
    %558 = vector.extract_strided_slice %541 {offsets = [0, 384], sizes = [8, 128], strides = [1, 1]} : vector<8x512xf32> to vector<8x128xf32>
    %cst_278 = arith.constant 0.000000e+00 : f32
    %559 = vector.broadcast %cst_278 : f32 to vector<8x128xf32>
    %560 = arith.subf %559, %558 : vector<8x128xf32>
    %561 = math.exp %560 : vector<8x128xf32>
    %cst_279 = arith.constant 1.000000e+00 : f32
    %562 = vector.broadcast %cst_279 : f32 to vector<8x128xf32>
    %563 = arith.addf %562, %561 : vector<8x128xf32>
    %564 = tpu.reciprocal %563 {approx = true} : vector<8x128xf32> -> vector<8x128xf32>
    %565 = arith.mulf %555, %537 : vector<8x128xf32>
    %566 = arith.mulf %548, %557 : vector<8x128xf32>
    %567 = arith.addf %565, %566 : vector<8x128xf32>
    %568 = math.tanh %567 : vector<8x128xf32>
    %569 = arith.mulf %564, %568 : vector<8x128xf32>
    %c0_280 = arith.constant 0 : index
    %c0_281 = arith.constant 0 : index
    %570 = vector.load %arg14[%c0_280, %c0_281] : memref<8x128xf32, #tpu.memory_space<vmem>>, vector<8x128xf32>
    tpu.vector_store %arg14[%c0_280, %c0_281], %567 {strides = array<i32>} : memref<8x128xf32, #tpu.memory_space<vmem>>, vector<8x128xf32>,
    %c0_282 = arith.constant 0 : index
    %c0_283 = arith.constant 0 : index
    %571 = vector.load %arg13[%c0_282, %c0_283] : memref<8x128xf32, #tpu.memory_space<vmem>>, vector<8x128xf32>
    tpu.vector_store %arg13[%c0_282, %c0_283], %569 {strides = array<i32>} : memref<8x128xf32, #tpu.memory_space<vmem>>, vector<8x128xf32>,
    %c6_i32_284 = arith.constant 6 : i32
    %c8_i32_285 = arith.constant 8 : i32
    %572 = arith.muli %c6_i32_284, %c8_i32_285 : i32
    %573 = tpu.assume_multiple %572, 8 : i32
    %c0_286 = arith.constant 0 : index
    %c0_287 = arith.constant 0 : index
    %574 = vector.load %arg13[%c0_286, %c0_287] : memref<8x128xf32, #tpu.memory_space<vmem>>, vector<8x128xf32>
    %c0_288 = arith.constant 0 : index
    %c0_289 = arith.constant 0 : index
    %575 = vector.load %arg14[%c0_288, %c0_289] : memref<8x128xf32, #tpu.memory_space<vmem>>, vector<8x128xf32>
    %576 = arith.index_cast %573 : i32 to index
    %c0_290 = arith.constant 0 : index
    %577 = vector.load %arg12[%576, %c0_290] : memref<64x512xf32, #tpu.memory_space<vmem>>, vector<8x512xf32>
    %cst_291 = arith.constant dense<0.000000e+00> : vector<8x512xf32>
    %578 = tpu.matmul %574, %343, %cst_291 {dimension_numbers = #tpu.dot_dimension_numbers<[1], [0], [0], [1], [0, 0, 1, 1], [], []>} : vector<8x128xf32>, vector<128x512xf32>, vector<8x512xf32> -> vector<8x512xf32>
    %579 = arith.addf %577, %578 : vector<8x512xf32>
    %580 = vector.extract_strided_slice %579 {offsets = [0, 0], sizes = [8, 128], strides = [1, 1]} : vector<8x512xf32> to vector<8x128xf32>
    %cst_292 = arith.constant 0.000000e+00 : f32
    %581 = vector.broadcast %cst_292 : f32 to vector<8x128xf32>
    %582 = arith.subf %581, %580 : vector<8x128xf32>
    %583 = math.exp %582 : vector<8x128xf32>
    %cst_293 = arith.constant 1.000000e+00 : f32
    %584 = vector.broadcast %cst_293 : f32 to vector<8x128xf32>
    %585 = arith.addf %584, %583 : vector<8x128xf32>
    %586 = tpu.reciprocal %585 {approx = true} : vector<8x128xf32> -> vector<8x128xf32>
    %587 = vector.extract_strided_slice %579 {offsets = [0, 128], sizes = [8, 128], strides = [1, 1]} : vector<8x512xf32> to vector<8x128xf32>
    %cst_294 = arith.constant 0.000000e+00 : f32
    %588 = vector.broadcast %cst_294 : f32 to vector<8x128xf32>
    %589 = arith.subf %588, %587 : vector<8x128xf32>
    %590 = math.exp %589 : vector<8x128xf32>
    %cst_295 = arith.constant 1.000000e+00 : f32
    %591 = vector.broadcast %cst_295 : f32 to vector<8x128xf32>
    %592 = arith.addf %591, %590 : vector<8x128xf32>
    %593 = tpu.reciprocal %592 {approx = true} : vector<8x128xf32> -> vector<8x128xf32>
    %594 = vector.extract_strided_slice %579 {offsets = [0, 256], sizes = [8, 128], strides = [1, 1]} : vector<8x512xf32> to vector<8x128xf32>
    %595 = math.tanh %594 : vector<8x128xf32>
    %596 = vector.extract_strided_slice %579 {offsets = [0, 384], sizes = [8, 128], strides = [1, 1]} : vector<8x512xf32> to vector<8x128xf32>
    %cst_296 = arith.constant 0.000000e+00 : f32
    %597 = vector.broadcast %cst_296 : f32 to vector<8x128xf32>
    %598 = arith.subf %597, %596 : vector<8x128xf32>
    %599 = math.exp %598 : vector<8x128xf32>
    %cst_297 = arith.constant 1.000000e+00 : f32
    %600 = vector.broadcast %cst_297 : f32 to vector<8x128xf32>
    %601 = arith.addf %600, %599 : vector<8x128xf32>
    %602 = tpu.reciprocal %601 {approx = true} : vector<8x128xf32> -> vector<8x128xf32>
    %603 = arith.mulf %593, %575 : vector<8x128xf32>
    %604 = arith.mulf %586, %595 : vector<8x128xf32>
    %605 = arith.addf %603, %604 : vector<8x128xf32>
    %606 = math.tanh %605 : vector<8x128xf32>
    %607 = arith.mulf %602, %606 : vector<8x128xf32>
    %c0_298 = arith.constant 0 : index
    %c0_299 = arith.constant 0 : index
    %608 = vector.load %arg14[%c0_298, %c0_299] : memref<8x128xf32, #tpu.memory_space<vmem>>, vector<8x128xf32>
    tpu.vector_store %arg14[%c0_298, %c0_299], %605 {strides = array<i32>} : memref<8x128xf32, #tpu.memory_space<vmem>>, vector<8x128xf32>,
    %c0_300 = arith.constant 0 : index
    %c0_301 = arith.constant 0 : index
    %609 = vector.load %arg13[%c0_300, %c0_301] : memref<8x128xf32, #tpu.memory_space<vmem>>, vector<8x128xf32>
    tpu.vector_store %arg13[%c0_300, %c0_301], %607 {strides = array<i32>} : memref<8x128xf32, #tpu.memory_space<vmem>>, vector<8x128xf32>,
    %c7_i32_302 = arith.constant 7 : i32
    %c8_i32_303 = arith.constant 8 : i32
    %610 = arith.muli %c7_i32_302, %c8_i32_303 : i32
    %611 = tpu.assume_multiple %610, 8 : i32
    %c0_304 = arith.constant 0 : index
    %c0_305 = arith.constant 0 : index
    %612 = vector.load %arg13[%c0_304, %c0_305] : memref<8x128xf32, #tpu.memory_space<vmem>>, vector<8x128xf32>
    %c0_306 = arith.constant 0 : index
    %c0_307 = arith.constant 0 : index
    %613 = vector.load %arg14[%c0_306, %c0_307] : memref<8x128xf32, #tpu.memory_space<vmem>>, vector<8x128xf32>
    %614 = arith.index_cast %611 : i32 to index
    %c0_308 = arith.constant 0 : index
    %615 = vector.load %arg12[%614, %c0_308] : memref<64x512xf32, #tpu.memory_space<vmem>>, vector<8x512xf32>
    %cst_309 = arith.constant dense<0.000000e+00> : vector<8x512xf32>
    %616 = tpu.matmul %612, %343, %cst_309 {dimension_numbers = #tpu.dot_dimension_numbers<[1], [0], [0], [1], [0, 0, 1, 1], [], []>} : vector<8x128xf32>, vector<128x512xf32>, vector<8x512xf32> -> vector<8x512xf32>
    %617 = arith.addf %615, %616 : vector<8x512xf32>
    %618 = vector.extract_strided_slice %617 {offsets = [0, 0], sizes = [8, 128], strides = [1, 1]} : vector<8x512xf32> to vector<8x128xf32>
    %cst_310 = arith.constant 0.000000e+00 : f32
    %619 = vector.broadcast %cst_310 : f32 to vector<8x128xf32>
    %620 = arith.subf %619, %618 : vector<8x128xf32>
    %621 = math.exp %620 : vector<8x128xf32>
    %cst_311 = arith.constant 1.000000e+00 : f32
    %622 = vector.broadcast %cst_311 : f32 to vector<8x128xf32>
    %623 = arith.addf %622, %621 : vector<8x128xf32>
    %624 = tpu.reciprocal %623 {approx = true} : vector<8x128xf32> -> vector<8x128xf32>
    %625 = vector.extract_strided_slice %617 {offsets = [0, 128], sizes = [8, 128], strides = [1, 1]} : vector<8x512xf32> to vector<8x128xf32>
    %cst_312 = arith.constant 0.000000e+00 : f32
    %626 = vector.broadcast %cst_312 : f32 to vector<8x128xf32>
    %627 = arith.subf %626, %625 : vector<8x128xf32>
    %628 = math.exp %627 : vector<8x128xf32>
    %cst_313 = arith.constant 1.000000e+00 : f32
    %629 = vector.broadcast %cst_313 : f32 to vector<8x128xf32>
    %630 = arith.addf %629, %628 : vector<8x128xf32>
    %631 = tpu.reciprocal %630 {approx = true} : vector<8x128xf32> -> vector<8x128xf32>
    %632 = vector.extract_strided_slice %617 {offsets = [0, 256], sizes = [8, 128], strides = [1, 1]} : vector<8x512xf32> to vector<8x128xf32>
    %633 = math.tanh %632 : vector<8x128xf32>
    %634 = vector.extract_strided_slice %617 {offsets = [0, 384], sizes = [8, 128], strides = [1, 1]} : vector<8x512xf32> to vector<8x128xf32>
    %cst_314 = arith.constant 0.000000e+00 : f32
    %635 = vector.broadcast %cst_314 : f32 to vector<8x128xf32>
    %636 = arith.subf %635, %634 : vector<8x128xf32>
    %637 = math.exp %636 : vector<8x128xf32>
    %cst_315 = arith.constant 1.000000e+00 : f32
    %638 = vector.broadcast %cst_315 : f32 to vector<8x128xf32>
    %639 = arith.addf %638, %637 : vector<8x128xf32>
    %640 = tpu.reciprocal %639 {approx = true} : vector<8x128xf32> -> vector<8x128xf32>
    %641 = arith.mulf %631, %613 : vector<8x128xf32>
    %642 = arith.mulf %624, %633 : vector<8x128xf32>
    %643 = arith.addf %641, %642 : vector<8x128xf32>
    %644 = math.tanh %643 : vector<8x128xf32>
    %645 = arith.mulf %640, %644 : vector<8x128xf32>
    %c0_316 = arith.constant 0 : index
    %c0_317 = arith.constant 0 : index
    %646 = vector.load %arg14[%c0_316, %c0_317] : memref<8x128xf32, #tpu.memory_space<vmem>>, vector<8x128xf32>
    tpu.vector_store %arg14[%c0_316, %c0_317], %643 {strides = array<i32>} : memref<8x128xf32, #tpu.memory_space<vmem>>, vector<8x128xf32>,
    %c0_318 = arith.constant 0 : index
    %c0_319 = arith.constant 0 : index
    %647 = vector.load %arg13[%c0_318, %c0_319] : memref<8x128xf32, #tpu.memory_space<vmem>>, vector<8x128xf32>
    tpu.vector_store %arg13[%c0_318, %c0_319], %645 {strides = array<i32>} : memref<8x128xf32, #tpu.memory_space<vmem>>, vector<8x128xf32>,
    %c8_i32_320 = arith.constant 8 : i32
    %c0_321 = arith.constant 0 : index
    %c0_322 = arith.constant 0 : index
    %648 = vector.load %arg13[%c0_321, %c0_322] : memref<8x128xf32, #tpu.memory_space<vmem>>, vector<8x128xf32>
    %c0_323 = arith.constant 0 : index
    %c0_324 = arith.constant 0 : index
    %649 = vector.load %arg8[%c0_323, %c0_324] : memref<128x128xf32, #tpu.memory_space<vmem>>, vector<128x128xf32>
    %cst_325 = arith.constant dense<0.000000e+00> : vector<8x128xf32>
    %650 = tpu.matmul %648, %649, %cst_325 {dimension_numbers = #tpu.dot_dimension_numbers<[1], [0], [0], [1], [0, 0, 1, 1], [], []>} : vector<8x128xf32>, vector<128x128xf32>, vector<8x128xf32> -> vector<8x128xf32>
    %c0_326 = arith.constant 0 : index
    %c0_327 = arith.constant 0 : index
    %651 = vector.load %arg9[%c0_326, %c0_327] : memref<1x128xf32, #tpu.memory_space<vmem>>, vector<1x128xf32>
    %652 = vector.broadcast %651 : vector<1x128xf32> to vector<8x128xf32>
    %653 = arith.addf %650, %652 : vector<8x128xf32>
    %c0_328 = arith.constant 0 : index
    %c0_329 = arith.constant 0 : index
    %654 = vector.load %arg10[%c0_328, %c0_329] : memref<8x128xf32, #tpu.memory_space<vmem>>, vector<8x128xf32>
    tpu.vector_store %arg10[%c0_328, %c0_329], %653 {strides = array<i32>} : memref<8x128xf32, #tpu.memory_space<vmem>>, vector<8x128xf32>,
    return
  }
  func.func @transform_0(%arg0: i32) -> (i32, i32) {
    %c0_i32 = arith.constant 0 : i32
    %c0_i32_0 = arith.constant 0 : i32
    %c0_i32_1 = arith.constant 0 : i32
    return %c0_i32, %c0_i32_0 : i32, i32
  }
  func.func @transform_1(%arg0: i32) -> (i32, i32) {
    %c0_i32 = arith.constant 0 : i32
    %c0_i32_0 = arith.constant 0 : i32
    %c0_i32_1 = arith.constant 0 : i32
    return %c0_i32, %c0_i32_0 : i32, i32
  }
  func.func @transform_2(%arg0: i32) -> (i32, i32) {
    %c0_i32 = arith.constant 0 : i32
    %c0_i32_0 = arith.constant 0 : i32
    %c0_i32_1 = arith.constant 0 : i32
    return %c0_i32, %c0_i32_0 : i32, i32
  }
  func.func @transform_3(%arg0: i32) -> (i32, i32) {
    %c0_i32 = arith.constant 0 : i32
    %c0_i32_0 = arith.constant 0 : i32
    %c0_i32_1 = arith.constant 0 : i32
    return %c0_i32, %c0_i32_0 : i32, i32
  }
  func.func @transform_4(%arg0: i32) -> (i32, i32) {
    %c0_i32 = arith.constant 0 : i32
    %c0_i32_0 = arith.constant 0 : i32
    %c0_i32_1 = arith.constant 0 : i32
    return %c0_i32, %c0_i32_0 : i32, i32
  }
  func.func @transform_5(%arg0: i32) -> (i32, i32) {
    %c0_i32 = arith.constant 0 : i32
    %c0_i32_0 = arith.constant 0 : i32
    %c0_i32_1 = arith.constant 0 : i32
    return %c0_i32, %c0_i32_0 : i32, i32
  }
  func.func @transform_6(%arg0: i32) -> (i32, i32) {
    %c0_i32 = arith.constant 0 : i32
    %c0_i32_0 = arith.constant 0 : i32
    %c0_i32_1 = arith.constant 0 : i32
    return %c0_i32, %c0_i32_0 : i32, i32
  }
  func.func @transform_7(%arg0: i32) -> (i32, i32) {
    %c0_i32 = arith.constant 0 : i32
    %c0_i32_0 = arith.constant 0 : i32
    %c0_i32_1 = arith.constant 0 : i32
    return %c0_i32, %c0_i32_0 : i32, i32
  }
  func.func @transform_8(%arg0: i32) -> (i32, i32) {
    %c0_i32 = arith.constant 0 : i32
    %c0_i32_0 = arith.constant 0 : i32
    %c0_i32_1 = arith.constant 0 : i32
    return %c0_i32, %c0_i32_0 : i32, i32
  }
  func.func @transform_9(%arg0: i32) -> (i32, i32) {
    %c0_i32 = arith.constant 0 : i32
    %c0_i32_0 = arith.constant 0 : i32
    %c0_i32_1 = arith.constant 0 : i32
    return %c0_i32, %c0_i32_0 : i32, i32
  }
}

</mosaic_0001>

<bundles_post_ra>
// kernel: lstm_model_forward.1
= control target key start
LH: loop header
LB: loop body
LE: loop exit
PB: predicated region body
PF: predicated region fallthrough
CT: control target
= control target key end

     0   :  { %14 = vsyncpa [#allocation7], 0  ;;  %s6635_s0 = inlined_call_operand.vmem [shape: f32[64,16], index: 0, kind: input, shape index: {}]   ;;  %s6636_s1 = inlined_call_operand.vmem [shape: f32[16,512], index: 1, kind: input, shape index: {}]   ;;  %s6637_s2 = inlined_call_operand.hbm [shape: f32[128,512], index: 2, kind: input, shape index: {}]   ;;  %s6638_s3 = inlined_call_operand.vmem [shape: f32[1,512], index: 3, kind: input, shape index: {}]   ;;  %s6639_s4 = inlined_call_operand.hbm [shape: f32[128,512], index: 4, kind: input, shape index: {}]   ;;  %s6640_s5 = inlined_call_operand.hbm [shape: f32[128,512], index: 5, kind: input, shape index: {}]   ;;  %s6641_s6 = inlined_call_operand.vmem [shape: f32[1,512], index: 6, kind: input, shape index: {}]   ;;  %s6642_s7 = inlined_call_operand.hbm [shape: f32[128,128], index: 7, kind: input, shape index: {}]   ;;  %s6643_s8 = inlined_call_operand.vmem [shape: f32[1,128], index: 8, kind: input, shape index: {}]   ;;  %s6644_s9 = inlined_call_operand.vmem [shape: f32[8,128], index: 9, kind: output, shape index: {}]  }
   0x1   :  { %15 = vsyncpa [#allocation9], 0 }
   0x2   :  { %16 = vsyncpa [#allocation12], 0  ;;  %s5518_s30 = smov [#allocation8]   ;;  %s5519_s11 = smov [#allocation6]  }
   0x3   :  { %s40_s10 = sshll.u32 %s5518_s30, 4  ;;  %s26_s12 = sshll.u32 %s5519_s11, 4  ;;  %s41_s10 = int_to_ptr.vmem [resolvable:$true] %s40_s10  ;;  %s5579_s12 = int_to_ptr.vmem [resolvable:$true] %s26_s12 }
   0x4   :  { %s5424_s15 = scalar_lea.hbm %s6639_s4, 8192 }
   0x5   :  { %p5425_p0 = scmp.ne.s32.totalorder %s6639_s4, %s5424_s15  ;;  %p5428_p1 = scmp.lt.u32.totalorder %s5424_s15, %s6639_s4 }
   0x7   :  { %p5430_p2 = pnand %p5428_p1, %p5425_p0 }
   0x9   :  { %5433 = shalt.err (!%p5430_p2)
}
   0xa   :  { %s5434_s20 = scalar_lea.vmem %s41_s10, 8192  ;;  %p5439_p4 = scmp.lt.s32.totalorder %s41_s10, %s41_s10 }
   0xb   :  { %p5435_p3 = scmp.ne.s32.totalorder %s41_s10, %s5434_s20  ;;  %p5440_p5 = scmp.lt.s32.totalorder %s5434_s20, %s5434_s20 }
   0xd   :  { %p5441_p6 = por %p5440_p5, %p5439_p4 }
   0xf   :  { %p5442_p7 = pnand %p5441_p6, %p5435_p3 }
  0x11   :  { %5445 = shalt.err (!%p5442_p7)
}
  0x12   :  { %s5520_s21 = smov 512   ;;  %s5521_s22 = smov 32  }
  0x13   :  { %46 = dma.hbm_to_vmem [thread:$0]  %s6639_s4, 8192, %s41_s10, [#allocation9], %s5520_s21, %s5520_s21, %s5521_s22  }
  0x14   :  { %s5446_s27 = scalar_lea.hbm %s6637_s2, 8192 }
  0x15   :  { %p5447_p8 = scmp.ne.s32.totalorder %s6637_s2, %s5446_s27  ;;  %p5450_p9 = scmp.lt.u32.totalorder %s5446_s27, %s6637_s2 }
  0x17   :  { %p5452_p10 = pnand %p5450_p9, %p5447_p8 }
  0x19   :  { %5455 = shalt.err (!%p5452_p10)
}
  0x1a   :  { %s5456_s13 = scalar_lea.vmem %s5579_s12, 8192  ;;  %p5461_p12 = scmp.lt.s32.totalorder %s5579_s12, %s5579_s12 }
  0x1b   :  { %p5457_p11 = scmp.ne.s32.totalorder %s5579_s12, %s5456_s13  ;;  %p5462_p13 = scmp.lt.s32.totalorder %s5456_s13, %s5456_s13 }
  0x1d   :  { %p5463_p0 = por %p5462_p13, %p5461_p12 }
  0x1f   :  { %p5464_p1 = pnand %p5463_p0, %p5457_p11 }
  0x21   :  { %5467 = shalt.err (!%p5464_p1)
}
  0x22   :  { %32 = dma.hbm_to_vmem [thread:$0]  %s6637_s2, 8192, %s5579_s12, [#allocation7], %s5520_s21, %s5520_s21, %s5521_s22  }
  0x23   :  { %s5522_s14 = smov [#allocation10]   ;;  %s5523_s16 = smov [#allocation11]  }
  0x24   :  { %s52_s15 = sshll.u32 %s5522_s14, 4  ;;  %s66_s17 = sshll.u32 %s5523_s16, 4  ;;  %s53_s15 = int_to_ptr.vmem [resolvable:$true] %s52_s15  ;;  %s5616_s17 = int_to_ptr.vmem [resolvable:$true] %s66_s17 }
  0x25   :  { %s5468_s20 = scalar_lea.hbm %s6640_s5, 8192 }
  0x26   :  { %p5469_p2 = scmp.ne.s32.totalorder %s6640_s5, %s5468_s20  ;;  %p5472_p3 = scmp.lt.u32.totalorder %s5468_s20, %s6640_s5 }
  0x28   :  { %p5474_p4 = pnand %p5472_p3, %p5469_p2 }
  0x2a   :  { %5477 = shalt.err (!%p5474_p4)
}
  0x2b   :  { %s5478_s2 = scalar_lea.vmem %s53_s15, 8192  ;;  %p5483_p6 = scmp.lt.s32.totalorder %s53_s15, %s53_s15 }
  0x2c   :  { %p5479_p5 = scmp.ne.s32.totalorder %s53_s15, %s5478_s2  ;;  %p5484_p7 = scmp.lt.s32.totalorder %s5478_s2, %s5478_s2 }
  0x2e   :  { %p5485_p8 = por %p5484_p7, %p5483_p6 }
  0x30   :  { %p5486_p9 = pnand %p5485_p8, %p5479_p5 }
  0x32   :  { %5489 = shalt.err (!%p5486_p9)
}
  0x33   :  { %58 = dma.hbm_to_vmem [thread:$0]  %s6640_s5, 8192, %s53_s15, [#allocation9], %s5520_s21, %s5520_s21, %s5521_s22  }
  0x34   :  { %s5490_s30 = scalar_lea.hbm %s6642_s7, 2048 }
  0x35   :  { %p5491_p10 = scmp.ne.s32.totalorder %s6642_s7, %s5490_s30  ;;  %p5494_p11 = scmp.lt.u32.totalorder %s5490_s30, %s6642_s7 }
  0x37   :  { %p5496_p12 = pnand %p5494_p11, %p5491_p10 }
  0x39   :  { %5499 = shalt.err (!%p5496_p12)
}
  0x3a   :  { %s5500_s14 = scalar_lea.vmem %s5616_s17, 2048  ;;  %p5505_p0 = scmp.lt.s32.totalorder %s5616_s17, %s5616_s17 }
  0x3b   :  { %p5501_p13 = scmp.ne.s32.totalorder %s5616_s17, %s5500_s14  ;;  %p5506_p1 = scmp.lt.s32.totalorder %s5500_s14, %s5500_s14 }
  0x3d   :  { %p5507_p2 = por %p5506_p1, %p5505_p0 }
  0x3f   :  { %p5508_p3 = pnand %p5507_p2, %p5501_p13 }
  0x41   :  { %5511 = shalt.err (!%p5508_p3)
}
  0x42   :  { %s5524_s5 = smov 128   ;;  %s5525_s21 = smov 8  }
  0x43   :  { %72 = dma.hbm_to_vmem [thread:$0]  %s6642_s7, 2048, %s5616_s17, [#allocation12], %s5524_s5, %s5524_s5, %s5525_s21  }
  0x44   :  { %5512 = dma.done.wait [#allocation7], 8192  }
  0x45   :  { %5513 = vsyncadd [#allocation7], 4294959104 }
  0x46   :  { %5514 = dma.done.wait [#allocation9], 16384  }
  0x47   :  { %5515 = vsyncadd [#allocation9], 4294950912 }
  0x48   :  { %5516 = dma.done.wait [#allocation12], 2048  }
  0x49   :  { %5517 = vsyncadd [#allocation12], 4294965248  ;;  %v5526_v0 = vmov 0.0   ;;  %v96_v1 = vld [vmem:[%s6636_s1 + $0x8] sm:$0xff]  ;;  %v98_v3 = vld [vmem:[%s6636_s1 + $0x18] sm:$0xff]  ;;  %vm125_vm0 = vcmask 130048  }
  0x4a   :  { %214 = vmatprep.mubr.f32.mxu0 %v5526_v0  ;;  %327 = vmatprep.mubr.f32.mxu1 %v5526_v0  ;;  %v100_v2 = vld [vmem:[%s6636_s1 + $0x28] sm:$0xff]  ;;  %v102_v5 = vld [vmem:[%s6636_s1 + $0x38] sm:$0xff]  ;;  %v95_v6 = vld [vmem:[%s6636_s1] sm:$0xff]  ;;  %vm5528_vm1 = vmmov 0  }
  0x4b   :  { %v3909_v4 = vpack.c.bf16 %v100_v2, %v96_v1  ;;  %v99_v7 = vld [vmem:[%s6636_s1 + $0x20] sm:$0xff]  ;;  %v3913_v8 = vpack.c.bf16 %v102_v5, %v98_v3  ;;  %v97_v10 = vld [vmem:[%s6636_s1 + $0x10] sm:$0xff]  ;;  %v411_v14 = vld [vmem:[#allocation6 + $0x8] sm:$0xff] }
  0x4c   :  { %v3911_v9 = vpack.c.bf16 %v99_v7, %v95_v6  ;;  %v101_v11 = vld [vmem:[%s6636_s1 + $0x30] sm:$0xff]  ;;  %v87_v12 = vld [vmem:[%s6635_s0] sm:$0xff]  ;;  %v415_v15 = vld [vmem:[#allocation6 + $0x28] sm:$0xff] }
  0x4d   :  { %3910 = vmatprep.subr.bf16.mxu0 %v3909_v4  ;;  %v3915_v13 = vpack.c.bf16 %v101_v11, %v97_v10  ;;  %v413_v16 = vld [vmem:[#allocation6 + $0x18] sm:$0xff]  ;;  %3914 = vmatprep.subr.bf16.mxu1 %v3913_v8  ;;  %v5679_v17 = vpack.c.bf16 %v415_v15, %v411_v14  ;;  %v410_v19 = vld [vmem:[#allocation6] sm:$0xff]  ;;  %v412_v23 = vld [vmem:[#allocation6 + $0x10] sm:$0xff] }
  0x4e   :  { %3912 = vmatpush1.bf16.msra.mxu0 %v3911_v9  ;;  %v417_v18 = vld [vmem:[#allocation6 + $0x38] sm:$0xff]  ;;  %v414_v20 = vld [vmem:[#allocation6 + $0x20] sm:$0xff]  ;;  %v416_v24 = vld [vmem:[#allocation6 + $0x30] sm:$0xff] }
  0x4f   :  { %3916 = vmatpush1.bf16.msra.mxu1 %v3915_v13  ;;  %v5681_v21 = vpack.c.bf16 %v417_v18, %v413_v16  ;;  %v5683_v22 = vpack.c.bf16 %v414_v20, %v410_v19  ;;  %3918 = vmatprep.subr.bf16.mxu0 %v5679_v17  ;;  %v5686_v25 = vpack.c.bf16 %v416_v24, %v412_v23  ;;  %v419_v26 = vld [vmem:[#allocation6 + $0x48] sm:$0xff]  ;;  %v421_v28 = vld [vmem:[#allocation6 + $0x58] sm:$0xff]  ;;  %v418_v31 = vld [vmem:[#allocation6 + $0x40] sm:$0xff] }
  0x50   :  { %v423_v27 = vld [vmem:[#allocation6 + $0x68] sm:$0xff]  ;;  %v425_v30 = vld [vmem:[#allocation6 + $0x78] sm:$0xff]  ;;  %v422_v32 = vld [vmem:[#allocation6 + $0x60] sm:$0xff] }
  0x51   :  { %3840 = vmatmul.mubr.msk.f32.vlgmr.msra.gmra.mrb[0].mxu0 %vm125_vm0, %v87_v12  ;;  %3950 = vmatprep.subr.bf16.mxu1 %v5681_v21  ;;  %v5690_v29 = vpack.c.bf16 %v423_v27, %v419_v26  ;;  %v88_v33 = vld [vmem:[%s6635_s0 + $0x8] sm:$0xff]  ;;  %v5697_v34 = vpack.c.bf16 %v425_v30, %v421_v28  ;;  %v5699_v35 = vpack.c.bf16 %v422_v32, %v418_v31  ;;  %v420_v36 = vld [vmem:[#allocation6 + $0x50] sm:$0xff]  ;;  %v429_v41 = vld [vmem:[#allocation6 + $0x98] sm:$0xff] }
  0x52   :  { %3848 = vmatmul.mubr.msk.f32.vlgmr.msra.gmra.mrb[0].mxu1 %vm125_vm0, %v87_v12  ;;  %3920 = vmatpush1.bf16.msra.mxu0 %v5683_v22  ;;  %v424_v37 = vld [vmem:[#allocation6 + $0x70] sm:$0xff]  ;;  %v427_v39 = vld [vmem:[#allocation6 + $0x88] sm:$0xff]  ;;  %v433_v43 = vld [vmem:[#allocation6 + $0xb8] sm:$0xff] }
  0x53   :  { %3952 = vmatpush1.bf16.msra.mxu1 %v5686_v25  ;;  %220 = vmatprep.mubr.f32.mxu0 %v5526_v0  ;;  %v5703_v38 = vpack.c.bf16 %v424_v37, %v420_v36  ;;  %v431_v40 = vld [vmem:[#allocation6 + $0xa8] sm:$0xff]  ;;  %v426_v44 = vld [vmem:[#allocation6 + $0x80] sm:$0xff]  ;;  %v89_v46 = vld [vmem:[%s6635_s0 + $0x10] sm:$0xff]  ;;  %v5714_v47 = vpack.c.bf16 %v433_v43, %v429_v41 }
  0x54   :  { %333 = vmatprep.mubr.f32.mxu1 %v5526_v0  ;;  %3922 = vmatprep.subr.bf16.mxu0 %v5690_v29  ;;  %v5707_v42 = vpack.c.bf16 %v431_v40, %v427_v39  ;;  %v430_v45 = vld [vmem:[#allocation6 + $0xa0] sm:$0xff]  ;;  %v428_v48 = vld [vmem:[#allocation6 + $0x90] sm:$0xff]  ;;  %v435_v51 = vld [vmem:[#allocation6 + $0xc8] sm:$0xff] }
  0x55   :  { %3841 = vmatmul.mubr.msk.f32.gmra.mrb[2].mxu0 %vm125_vm0, %v88_v33  ;;  %3954 = vmatprep.subr.bf16.mxu1 %v5697_v34  ;;  %v432_v49 = vld [vmem:[#allocation6 + $0xb0] sm:$0xff]  ;;  %v5718_v50 = vpack.c.bf16 %v430_v45, %v426_v44  ;;  %v439_v52 = vld [vmem:[#allocation6 + $0xe8] sm:$0xff]  ;;  %v437_v53 = vld [vmem:[#allocation6 + $0xd8] sm:$0xff] }
  0x56   :  { %3849 = vmatmul.mubr.msk.f32.gmra.mrb[2].mxu1 %vm125_vm0, %v88_v33  ;;  %3924 = vmatpush1.bf16.msra.mxu0 %v5699_v35  ;;  %v5722_v54 = vpack.c.bf16 %v432_v49, %v428_v48  ;;  %v441_v55 = vld [vmem:[#allocation6 + $0xf8] sm:$0xff]  ;;  %v434_v56 = vld [vmem:[#allocation6 + $0xc0] sm:$0xff]  ;;  %v5726_v58 = vpack.c.bf16 %v439_v52, %v435_v51  ;;  %v436_v59 = vld [vmem:[#allocation6 + $0xd0] sm:$0xff] }
  0x57   :  { %3956 = vmatpush1.bf16.msra.mxu1 %v5703_v38  ;;  %226 = vmatprep.mubr.f32.mxu0 %v5526_v0  ;;  %v438_v57 = vld [vmem:[#allocation6 + $0xe0] sm:$0xff]  ;;  %v440_v60 = vld [vmem:[#allocation6 + $0xf0] sm:$0xff]  ;;  %v5730_v61 = vpack.c.bf16 %v441_v55, %v437_v53  ;;  %v443_v62 = vld [vmem:[#allocation6 + $0x108] sm:$0xff] }
  0x58   :  { %339 = vmatprep.mubr.f32.mxu1 %v5526_v0  ;;  %3926 = vmatprep.subr.bf16.mxu0 %v5707_v42  ;;  %v447_v63 = vld [vmem:[#allocation6 + $0x128] sm:$0xff]  ;;  %v90_v1 = vld [vmem:[%s6635_s0 + $0x18] sm:$0xff]  ;;  %v5737_v2 = vpack.c.bf16 %v438_v57, %v434_v56  ;;  %v5741_v5 = vpack.c.bf16 %v440_v60, %v436_v59  ;;  %v442_v6 = vld [vmem:[#allocation6 + $0x100] sm:$0xff] }
  0x59   :  { %3842 = vmatmul.mubr.msk.f32.gmra.mrb[4].mxu0 %vm125_vm0, %v89_v46  ;;  %3958 = vmatprep.subr.bf16.mxu1 %v5714_v47  ;;  %v445_v3 = vld [vmem:[#allocation6 + $0x118] sm:$0xff]  ;;  %v446_v7 = vld [vmem:[#allocation6 + $0x120] sm:$0xff]  ;;  %v5745_v8 = vpack.c.bf16 %v447_v63, %v443_v62  ;;  %v444_v9 = vld [vmem:[#allocation6 + $0x110] sm:$0xff] }
  0x5a   :  { %3850 = vmatmul.mubr.msk.f32.gmra.mrb[4].mxu1 %vm125_vm0, %v89_v46  ;;  %3928 = vmatpush1.bf16.msra.mxu0 %v5718_v50  ;;  %v449_v4 = vld [vmem:[#allocation6 + $0x138] sm:$0xff]  ;;  %v448_v10 = vld [vmem:[#allocation6 + $0x130] sm:$0xff]  ;;  %v451_v12 = vld [vmem:[#allocation6 + $0x148] sm:$0xff]  ;;  %v5756_v15 = vpack.c.bf16 %v446_v7, %v442_v6  ;;  %v105_v7 = vlaneseq }
  0x5b   :  { %3960 = vmatpush1.bf16.msra.mxu1 %v5722_v54  ;;  %232 = vmatprep.mubr.f32.mxu0 %v5526_v0  ;;  %v5749_v11 = vpack.c.bf16 %v449_v4, %v445_v3  ;;  %v455_v13 = vld [vmem:[#allocation6 + $0x168] sm:$0xff]  ;;  %v91_v14 = vld [vmem:[%s6635_s0 + $0x20] sm:$0xff]  ;;  %v453_v16 = vld [vmem:[#allocation6 + $0x158] sm:$0xff]  ;;  %v5760_v19 = vpack.c.bf16 %v448_v10, %v444_v9 }
  0x5c   :  { %345 = vmatprep.mubr.f32.mxu1 %v5526_v0  ;;  %3930 = vmatprep.subr.bf16.mxu0 %v5726_v58  ;;  %v457_v18 = vld [vmem:[#allocation6 + $0x178] sm:$0xff]  ;;  %v450_v20 = vld [vmem:[#allocation6 + $0x140] sm:$0xff]  ;;  %v5764_v24 = vpack.c.bf16 %v455_v13, %v451_v12  ;;  %v452_v26 = vld [vmem:[#allocation6 + $0x150] sm:$0xff]  ;;  %v5866_v9 = vshrl.u32 %v105_v7, 7 }
  0x5d   :  { %3843 = vmatmul.mubr.msk.f32.gmra.mrb[6].mxu0 %vm125_vm0, %v90_v1  ;;  %3962 = vmatprep.subr.bf16.mxu1 %v5730_v61  ;;  %v454_v23 = vld [vmem:[#allocation6 + $0x160] sm:$0xff]  ;;  %v456_v27 = vld [vmem:[#allocation6 + $0x170] sm:$0xff]  ;;  %v5768_v28 = vpack.c.bf16 %v457_v18, %v453_v16  ;;  %v459_v30 = vld [vmem:[#allocation6 + $0x188] sm:$0xff] }
  0x5e   :  { %3851 = vmatmul.mubr.msk.f32.gmra.mrb[6].mxu1 %vm125_vm0, %v90_v1  ;;  %3932 = vmatpush1.bf16.msra.mxu0 %v5737_v2  ;;  %v463_v31 = vld [vmem:[#allocation6 + $0x1a8] sm:$0xff]  ;;  %v5775_v33 = vpack.c.bf16 %v454_v23, %v450_v20  ;;  %v461_v36 = vld [vmem:[#allocation6 + $0x198] sm:$0xff]  ;;  %v5779_v39 = vpack.c.bf16 %v456_v27, %v452_v26  ;;  %v458_v40 = vld [vmem:[#allocation6 + $0x180] sm:$0xff]  ;;  %v107_v10 = vsub.s32 0, %v5866_v9  ;;  %v111_v13 = vsub.s32 1, %v5866_v9 }
  0x5f   :  { %3964 = vmatpush1.bf16.msra.mxu1 %v5741_v5  ;;  %238 = vmatprep.mubr.f32.mxu0 %v5526_v0  ;;  %v92_v32 = vld [vmem:[%s6635_s0 + $0x28] sm:$0xff]  ;;  %v465_v37 = vld [vmem:[#allocation6 + $0x1b8] sm:$0xff]  ;;  %v462_v41 = vld [vmem:[#allocation6 + $0x1a0] sm:$0xff]  ;;  %v5783_v43 = vpack.c.bf16 %v463_v31, %v459_v30  ;;  %v119_v18 = vsub.s32 3, %v5866_v9 }
  0x60   :  { %351 = vmatprep.mubr.f32.mxu1 %v5526_v0  ;;  %3934 = vmatprep.subr.bf16.mxu0 %v5745_v8  ;;  %v460_v44 = vld [vmem:[#allocation6 + $0x190] sm:$0xff]  ;;  %v5787_v46 = vpack.c.bf16 %v465_v37, %v461_v36  ;;  %v467_v48 = vld [vmem:[#allocation6 + $0x1c8] sm:$0xff]  ;;  %v5794_v52 = vpack.c.bf16 %v462_v41, %v458_v40  ;;  %v469_v53 = vld [vmem:[#allocation6 + $0x1d8] sm:$0xff] }
  0x61   :  { %3844 = vmatmul.mubr.msk.f32.gmra.mrb[8].mxu0 %vm125_vm0, %v91_v14  ;;  %3966 = vmatprep.subr.bf16.mxu1 %v5749_v11  ;;  %v464_v45 = vld [vmem:[#allocation6 + $0x1b0] sm:$0xff]  ;;  %v471_v49 = vld [vmem:[#allocation6 + $0x1e8] sm:$0xff]  ;;  %v473_v55 = vld [vmem:[#allocation6 + $0x1f8] sm:$0xff] }
  0x62   :  { %3852 = vmatmul.mubr.msk.f32.gmra.mrb[8].mxu1 %vm125_vm0, %v91_v14  ;;  %3936 = vmatpush1.bf16.msra.mxu0 %v5756_v15  ;;  %v93_v51 = vld [vmem:[%s6635_s0 + $0x30] sm:$0xff]  ;;  %v5798_v56 = vpack.c.bf16 %v464_v45, %v460_v44  ;;  %v466_v57 = vld [vmem:[#allocation6 + $0x1c0] sm:$0xff]  ;;  %v5802_v60 = vpack.c.bf16 %v471_v49, %v467_v48  ;;  %v5806_v1 = vpack.c.bf16 %v473_v55, %v469_v53  ;;  %v94_v3 = vld [vmem:[%s6635_s0 + $0x38] sm:$0xff]  ;;  %v115_v45 = vsub.s32 2, %v5866_v9 }
  0x63   :  { %3968 = vmatpush1.bf16.msra.mxu1 %v5760_v19  ;;  %244 = vmatprep.mubr.f32.mxu0 %v5526_v0  ;;  %v470_v59 = vld [vmem:[#allocation6 + $0x1e0] sm:$0xff]  ;;  %v468_v62 = vld [vmem:[#allocation6 + $0x1d0] sm:$0xff] }
  0x64   :  { %357 = vmatprep.mubr.f32.mxu1 %v5526_v0  ;;  %3938 = vmatprep.subr.bf16.mxu0 %v5764_v24  ;;  %v472_v63 = vld [vmem:[#allocation6 + $0x1f0] sm:$0xff]  ;;  %v5813_v4 = vpack.c.bf16 %v470_v59, %v466_v57  ;;  %v103_v12 = vld [vmem:[%s6638_s3] sm:$0xf] }
  0x65   :  { %3845 = vmatmul.mubr.msk.f32.gmra.mrb[10].mxu0 %vm125_vm0, %v92_v32  ;;  %3970 = vmatprep.subr.bf16.mxu1 %v5768_v28  ;;  %v5817_v6 = vpack.c.bf16 %v472_v63, %v468_v62  ;;  %v5875_v14 = vrot.slane %v103_v12, %v107_v10  ;;  %v5879_v16 = vrot.slane %v103_v12, %v111_v13 }
  0x66   :  { %3853 = vmatmul.mubr.msk.f32.gmra.mrb[10].mxu1 %vm125_vm0, %v92_v32  ;;  %3940 = vmatpush1.bf16.msra.mxu0 %v5775_v33  ;;  %v5886_v31 = vrot.slane %v103_v12, %v119_v18  ;;  %v5892_v49 = vrot.slane %v103_v12, %v115_v45 }
  0x67   :  { %3972 = vmatpush1.bf16.msra.mxu1 %v5779_v39  ;;  %250 = vmatprep.mubr.f32.mxu0 %v5526_v0 }
  0x68   :  { %363 = vmatprep.mubr.f32.mxu1 %v5526_v0  ;;  %3942 = vmatprep.subr.bf16.mxu0 %v5783_v43 }
  0x69   :  { %3846 = vmatmul.mubr.msk.f32.gmra.mrb[12].mxu0 %vm125_vm0, %v93_v51  ;;  %3974 = vmatprep.subr.bf16.mxu1 %v5787_v46 }
  0x6a   :  { %3854 = vmatmul.mubr.msk.f32.gmra.mrb[12].mxu1 %vm125_vm0, %v93_v51  ;;  %3944 = vmatpush1.bf16.msra.mxu0 %v5794_v52 }
  0x6b   :  { %3976 = vmatpush1.bf16.msra.mxu1 %v5798_v56  ;;  %256 = vmatprep.mubr.f32.mxu0 %v5526_v0 }
  0x6c   :  { %369 = vmatprep.mubr.f32.mxu1 %v5526_v0  ;;  %3946 = vmatprep.subr.bf16.mxu0 %v5802_v60 }
  0x6d   :  { %3847 = vmatmul.mubr.msk.f32.gmra.mrb[14].mxu0 %vm125_vm0, %v94_v3  ;;  %3978 = vmatprep.subr.bf16.mxu1 %v5806_v1 }
  0x6e   :  { %3855 = vmatmul.mubr.msk.f32.gmra.mrb[14].mxu1 %vm125_vm0, %v94_v3  ;;  %3948 = vmatpush1.bf16.msra.mxu0 %v5813_v4 }
  0x6f   :  { %3980 = vmatpush1.bf16.msra.mxu1 %v5817_v6  ;;  %547 = vmatprep.mubr.f32.mxu0 %v5526_v0 }
  0x70   :  { %618 = vmatprep.mubr.f32.mxu1 %v5526_v0  ;;  %3982 = vmatprep.subr.bf16.mxu0 %v5679_v17 }
  0x71   :  { %548 = vmatmul.mubr.f32.vlgmr.msra.gmra.mrb[0].mxu0 %v5526_v0  ;;  %4014 = vmatprep.subr.bf16.mxu1 %v5681_v21 }
  0x72   :  { %619 = vmatmul.mubr.f32.vlgmr.msra.gmra.mrb[0].mxu1 %v5526_v0  ;;  %3984 = vmatpush1.bf16.msra.mxu0 %v5683_v22 }
  0x73   :  { %4016 = vmatpush1.bf16.msra.mxu1 %v5686_v25  ;;  %3986 = vmatprep.subr.bf16.mxu0 %v5690_v29 }
  0x74   :  { %4018 = vmatprep.subr.bf16.mxu1 %v5697_v34  ;;  %726 = vmatprep.mubr.f32.mxu0 %v5526_v0 }
  0x75   :  { %797 = vmatprep.mubr.f32.mxu1 %v5526_v0 }
  0x76   :  { %3988 = vmatpush1.bf16.msra.mxu0 %v5699_v35 }
  0x77   :  { %4020 = vmatpush1.bf16.msra.mxu1 %v5703_v38  ;;  %3990 = vmatprep.subr.bf16.mxu0 %v5707_v42 }
  0x78   :  { %4022 = vmatprep.subr.bf16.mxu1 %v5714_v47 }
  0x7a   :  { %3992 = vmatpush1.bf16.msra.mxu0 %v5718_v50 }
  0x7b   :  { %4024 = vmatpush1.bf16.msra.mxu1 %v5722_v54  ;;  %3994 = vmatprep.subr.bf16.mxu0 %v5726_v58 }
  0x7c   :  { %4026 = vmatprep.subr.bf16.mxu1 %v5730_v61 }
  0x7e   :  { %3996 = vmatpush1.bf16.msra.mxu0 %v5737_v2 }
  0x7f   :  { %4028 = vmatpush1.bf16.msra.mxu1 %v5741_v5  ;;  %3998 = vmatprep.subr.bf16.mxu0 %v5745_v8 }
  0x80   :  { %4030 = vmatprep.subr.bf16.mxu1 %v5749_v11 }
  0x82   :  { %4000 = vmatpush1.bf16.msra.mxu0 %v5756_v15 }
  0x83   :  { %4032 = vmatpush1.bf16.msra.mxu1 %v5760_v19  ;;  %4002 = vmatprep.subr.bf16.mxu0 %v5764_v24 }
  0x84   :  { %4034 = vmatprep.subr.bf16.mxu1 %v5768_v28 }
  0x86   :  { %4004 = vmatpush1.bf16.msra.mxu0 %v5775_v33 }
  0x87   :  { %4036 = vmatpush1.bf16.msra.mxu1 %v5779_v39  ;;  %4006 = vmatprep.subr.bf16.mxu0 %v5783_v43 }
  0x88   :  { %4038 = vmatprep.subr.bf16.mxu1 %v5787_v46 }
  0x8a   :  { %4008 = vmatpush1.bf16.msra.mxu0 %v5794_v52 }
  0x8b   :  { %4040 = vmatpush1.bf16.msra.mxu1 %v5798_v56  ;;  %4010 = vmatprep.subr.bf16.mxu0 %v5802_v60 }
  0x8c   :  { %4042 = vmatprep.subr.bf16.mxu1 %v5806_v1 }
  0x8e   :  { %4012 = vmatpush1.bf16.msra.mxu0 %v5813_v4 }
  0x8f   :  { %4044 = vmatpush1.bf16.msra.mxu1 %v5817_v6  ;;  %4046 = vmatprep.subr.bf16.mxu0 %v5679_v17 }
  0x90   :  { %4078 = vmatprep.subr.bf16.mxu1 %v5681_v21 }
 0x144   :  { %v549_v20 = vpop.f32.mrb[0].mxu0 }
 0x145   :  { %v5029_v23 = vadd.f32 %v549_v20, %v5875_v14  ;;  %v620_v26 = vpop.f32.mrb[0].mxu1  ;;  %v551_v27 = vpop.f32.mrb[1].mxu0 }
 0x146   :  { %v5030_v30 = vadd.f32 %v551_v27, %v5879_v16  ;;  %v622_v32 = vpop.f32.mrb[1].mxu1  ;;  %v5045_v53 = vadd.f32 %v620_v26, %v5892_v49 }
 0x147   :  { %v629_v36 = vsub.f32 0.0, %v5029_v23  ;;  %v5046_v44 = vadd.f32 %v622_v32, %v5886_v31 }
 0x148   :  { %v634_v37 = vsub.f32 0.0, %v5030_v30 }
 0x149   :  { %v630_v40 = vmul.f32 1.442695, %v629_v36  ;;  %v640_v48 = vsub.f32 0.0, %v5046_v44 }
 0x14a   :  { %v635_v41 = vmul.f32 1.442695, %v634_v37 }
 0x14b   :  { %5168 = vpow2.f32 %v630_v40  ;;  %v641_v51 = vmul.f32 1.442695, %v640_v48 }
 0x14c   :  { %5170 = vpow2.f32 %v635_v41 }
 0x14d   :  { %5172 = vpow2.f32 %v641_v51 }
 0x14e   :  { %5174 = vtanh.f32 %v5045_v53 }
 0x155   :  { %v5169_v55 = vpop.eup %5168 }
 0x156   :  { %v5171_v57 = vpop.eup %5170  ;;  %v632_v59 = vadd.f32 1.0, %v5169_v55 }
 0x157   :  { %v637_v62 = vadd.f32 1.0, %v5171_v57  ;;  %v5173_v63 = vpop.eup %5172 }
 0x158   :  { %5176 = vrcp.f32 %v632_v59  ;;  %v5175_v3 = vpop.eup %5174  ;;  %v643_v27 = vadd.f32 1.0, %v5173_v63 }
 0x159   :  { %5178 = vrcp.f32 %v637_v62 }
 0x15a   :  { %5180 = vrcp.f32 %v643_v27 }
 0x162   :  { %v5177_v7 = vpop.eup %5176 }
 0x163   :  { %v5179_v20 = vpop.eup %5178  ;;  %v646_v23 = vmul.f32 %v5177_v7, %v5175_v3 }
 0x164   :  { %v645_v30 = vmul.f32 0.0, %v5179_v20  ;;  %v5181_v26 = vpop.eup %5180 }
 0x166   :  { %v5895_v12 = vadd.f32 %v646_v23, %v645_v30 }
 0x168   :  { %5182 = vtanh.f32 %v5895_v12 }
 0x172   :  { %v5183_v32 = vpop.eup %5182 }
 0x173   :  { %v5898_v36 = vmul.f32 %v5183_v32, %v5181_v26 }
 0x175   :  { %727 = vmatmul.mubr.f32.vlgmr.msra.gmra.mrb[2].mxu0 %v5898_v36  ;;  %798 = vmatmul.mubr.f32.vlgmr.msra.gmra.mrb[2].mxu1 %v5898_v36 }
 0x176   :  { %4048 = vmatpush1.bf16.msra.mxu0 %v5683_v22  ;;  %4080 = vmatpush1.bf16.msra.mxu1 %v5686_v25 }
 0x177   :  { %4050 = vmatprep.subr.bf16.mxu0 %v5690_v29  ;;  %4082 = vmatprep.subr.bf16.mxu1 %v5697_v34 }
 0x178   :  { %906 = vmatprep.mubr.f32.mxu0 %v5526_v0  ;;  %977 = vmatprep.mubr.f32.mxu1 %v5526_v0 }
 0x17a   :  { %4052 = vmatpush1.bf16.msra.mxu0 %v5699_v35  ;;  %4084 = vmatpush1.bf16.msra.mxu1 %v5703_v38 }
 0x17b   :  { %4054 = vmatprep.subr.bf16.mxu0 %v5707_v42  ;;  %4086 = vmatprep.subr.bf16.mxu1 %v5714_v47 }
 0x17e   :  { %4056 = vmatpush1.bf16.msra.mxu0 %v5718_v50  ;;  %4088 = vmatpush1.bf16.msra.mxu1 %v5722_v54 }
 0x17f   :  { %4058 = vmatprep.subr.bf16.mxu0 %v5726_v58  ;;  %4090 = vmatprep.subr.bf16.mxu1 %v5730_v61 }
 0x182   :  { %4060 = vmatpush1.bf16.msra.mxu0 %v5737_v2  ;;  %4092 = vmatpush1.bf16.msra.mxu1 %v5741_v5 }
 0x183   :  { %4062 = vmatprep.subr.bf16.mxu0 %v5745_v8  ;;  %4094 = vmatprep.subr.bf16.mxu1 %v5749_v11 }
 0x186   :  { %4064 = vmatpush1.bf16.msra.mxu0 %v5756_v15  ;;  %4096 = vmatpush1.bf16.msra.mxu1 %v5760_v19 }
 0x187   :  { %4066 = vmatprep.subr.bf16.mxu0 %v5764_v24  ;;  %4098 = vmatprep.subr.bf16.mxu1 %v5768_v28 }
 0x18a   :  { %4068 = vmatpush1.bf16.msra.mxu0 %v5775_v33  ;;  %4100 = vmatpush1.bf16.msra.mxu1 %v5779_v39 }
 0x18b   :  { %4070 = vmatprep.subr.bf16.mxu0 %v5783_v43  ;;  %4102 = vmatprep.subr.bf16.mxu1 %v5787_v46 }
 0x18e   :  { %4072 = vmatpush1.bf16.msra.mxu0 %v5794_v52  ;;  %4104 = vmatpush1.bf16.msra.mxu1 %v5798_v56 }
 0x18f   :  { %4074 = vmatprep.subr.bf16.mxu0 %v5802_v60  ;;  %4106 = vmatprep.subr.bf16.mxu1 %v5806_v1 }
 0x192   :  { %4076 = vmatpush1.bf16.msra.mxu0 %v5813_v4  ;;  %4108 = vmatpush1.bf16.msra.mxu1 %v5817_v6 }
 0x193   :  { %4110 = vmatprep.subr.bf16.mxu0 %v5679_v17  ;;  %4142 = vmatprep.subr.bf16.mxu1 %v5681_v21 }
 0x248   :  { %v728_v37 = vpop.f32.mrb[2].mxu0  ;;  %v799_v40 = vpop.f32.mrb[2].mxu1 }
 0x249   :  { %v5031_v41 = vadd.f32 %v728_v37, %v5875_v14  ;;  %v730_v44 = vpop.f32.mrb[3].mxu0  ;;  %v801_v48 = vpop.f32.mrb[3].mxu1  ;;  %v5047_v7 = vadd.f32 %v799_v40, %v5892_v49 }
 0x24a   :  { %v5032_v51 = vadd.f32 %v730_v44, %v5879_v16  ;;  %v5048_v62 = vadd.f32 %v801_v48, %v5886_v31 }
 0x24b   :  { %v808_v53 = vsub.f32 0.0, %v5031_v41 }
 0x24c   :  { %v813_v55 = vsub.f32 0.0, %v5032_v51  ;;  %v819_v63 = vsub.f32 0.0, %v5048_v62 }
 0x24d   :  { %v809_v57 = vmul.f32 1.442695, %v808_v53 }
 0x24e   :  { %v814_v59 = vmul.f32 1.442695, %v813_v55  ;;  %v820_v3 = vmul.f32 1.442695, %v819_v63 }
 0x24f   :  { %5184 = vpow2.f32 %v809_v57 }
 0x250   :  { %5186 = vpow2.f32 %v814_v59 }
 0x251   :  { %5188 = vpow2.f32 %v820_v3 }
 0x252   :  { %5190 = vtanh.f32 %v5047_v7 }
 0x259   :  { %v5185_v20 = vpop.eup %5184 }
 0x25a   :  { %v5187_v23 = vpop.eup %5186  ;;  %v811_v27 = vadd.f32 1.0, %v5185_v20 }
 0x25b   :  { %v816_v30 = vadd.f32 1.0, %v5187_v23  ;;  %v5189_v26 = vpop.eup %5188 }
 0x25c   :  { %5192 = vrcp.f32 %v811_v27  ;;  %v5191_v32 = vpop.eup %5190  ;;  %v822_v48 = vadd.f32 1.0, %v5189_v26 }
 0x25d   :  { %5194 = vrcp.f32 %v816_v30 }
 0x25e   :  { %5196 = vrcp.f32 %v822_v48 }
 0x266   :  { %v5193_v37 = vpop.eup %5192 }
 0x267   :  { %v5195_v41 = vpop.eup %5194  ;;  %v825_v44 = vmul.f32 %v5193_v37, %v5191_v32 }
 0x268   :  { %v824_v51 = vmul.f32 %v5195_v41, %v5895_v12  ;;  %v5197_v40 = vpop.eup %5196 }
 0x26a   :  { %v5941_v53 = vadd.f32 %v825_v44, %v824_v51 }
 0x26c   :  { %5198 = vtanh.f32 %v5941_v53 }
 0x276   :  { %v5199_v55 = vpop.eup %5198 }
 0x277   :  { %v5944_v57 = vmul.f32 %v5199_v55, %v5197_v40 }
 0x279   :  { %907 = vmatmul.mubr.f32.vlgmr.msra.gmra.mrb[4].mxu0 %v5944_v57  ;;  %978 = vmatmul.mubr.f32.vlgmr.msra.gmra.mrb[4].mxu1 %v5944_v57 }
 0x27a   :  { %4112 = vmatpush1.bf16.msra.mxu0 %v5683_v22  ;;  %4144 = vmatpush1.bf16.msra.mxu1 %v5686_v25 }
 0x27b   :  { %4114 = vmatprep.subr.bf16.mxu0 %v5690_v29  ;;  %4146 = vmatprep.subr.bf16.mxu1 %v5697_v34 }
 0x27c   :  { %1086 = vmatprep.mubr.f32.mxu0 %v5526_v0  ;;  %1157 = vmatprep.mubr.f32.mxu1 %v5526_v0 }
 0x27e   :  { %4116 = vmatpush1.bf16.msra.mxu0 %v5699_v35  ;;  %4148 = vmatpush1.bf16.msra.mxu1 %v5703_v38 }
 0x27f   :  { %4118 = vmatprep.subr.bf16.mxu0 %v5707_v42  ;;  %4150 = vmatprep.subr.bf16.mxu1 %v5714_v47 }
 0x282   :  { %4120 = vmatpush1.bf16.msra.mxu0 %v5718_v50  ;;  %4152 = vmatpush1.bf16.msra.mxu1 %v5722_v54 }
 0x283   :  { %4122 = vmatprep.subr.bf16.mxu0 %v5726_v58  ;;  %4154 = vmatprep.subr.bf16.mxu1 %v5730_v61 }
 0x286   :  { %4124 = vmatpush1.bf16.msra.mxu0 %v5737_v2  ;;  %4156 = vmatpush1.bf16.msra.mxu1 %v5741_v5 }
 0x287   :  { %4126 = vmatprep.subr.bf16.mxu0 %v5745_v8  ;;  %4158 = vmatprep.subr.bf16.mxu1 %v5749_v11 }
 0x28a   :  { %4128 = vmatpush1.bf16.msra.mxu0 %v5756_v15  ;;  %4160 = vmatpush1.bf16.msra.mxu1 %v5760_v19 }
 0x28b   :  { %4130 = vmatprep.subr.bf16.mxu0 %v5764_v24  ;;  %4162 = vmatprep.subr.bf16.mxu1 %v5768_v28 }
 0x28e   :  { %4132 = vmatpush1.bf16.msra.mxu0 %v5775_v33  ;;  %4164 = vmatpush1.bf16.msra.mxu1 %v5779_v39 }
 0x28f   :  { %4134 = vmatprep.subr.bf16.mxu0 %v5783_v43  ;;  %4166 = vmatprep.subr.bf16.mxu1 %v5787_v46 }
 0x292   :  { %4136 = vmatpush1.bf16.msra.mxu0 %v5794_v52  ;;  %4168 = vmatpush1.bf16.msra.mxu1 %v5798_v56 }
 0x293   :  { %4138 = vmatprep.subr.bf16.mxu0 %v5802_v60  ;;  %4170 = vmatprep.subr.bf16.mxu1 %v5806_v1 }
 0x296   :  { %4140 = vmatpush1.bf16.msra.mxu0 %v5813_v4  ;;  %4172 = vmatpush1.bf16.msra.mxu1 %v5817_v6 }
 0x297   :  { %4174 = vmatprep.subr.bf16.mxu0 %v5679_v17  ;;  %4206 = vmatprep.subr.bf16.mxu1 %v5681_v21 }
 0x34c   :  { %v908_v12 = vpop.f32.mrb[4].mxu0  ;;  %v979_v59 = vpop.f32.mrb[4].mxu1 }
 0x34d   :  { %v5033_v62 = vadd.f32 %v908_v12, %v5875_v14  ;;  %v910_v63 = vpop.f32.mrb[5].mxu0  ;;  %v981_v3 = vpop.f32.mrb[5].mxu1  ;;  %v5049_v41 = vadd.f32 %v979_v59, %v5892_v49 }
 0x34e   :  { %v5034_v7 = vadd.f32 %v910_v63, %v5879_v16  ;;  %v5050_v26 = vadd.f32 %v981_v3, %v5886_v31 }
 0x34f   :  { %v988_v20 = vsub.f32 0.0, %v5033_v62 }
 0x350   :  { %v993_v23 = vsub.f32 0.0, %v5034_v7  ;;  %v999_v32 = vsub.f32 0.0, %v5050_v26 }
 0x351   :  { %v989_v27 = vmul.f32 1.442695, %v988_v20 }
 0x352   :  { %v994_v30 = vmul.f32 1.442695, %v993_v23  ;;  %v1000_v37 = vmul.f32 1.442695, %v999_v32 }
 0x353   :  { %5200 = vpow2.f32 %v989_v27 }
 0x354   :  { %5202 = vpow2.f32 %v994_v30 }
 0x355   :  { %5204 = vpow2.f32 %v1000_v37 }
 0x356   :  { %5206 = vtanh.f32 %v5049_v41 }
 0x35d   :  { %v5201_v44 = vpop.eup %5200 }
 0x35e   :  { %v5203_v48 = vpop.eup %5202  ;;  %v991_v51 = vadd.f32 1.0, %v5201_v44 }
 0x35f   :  { %v996_v40 = vadd.f32 1.0, %v5203_v48  ;;  %v5205_v55 = vpop.eup %5204 }
 0x360   :  { %5208 = vrcp.f32 %v991_v51  ;;  %v5207_v12 = vpop.eup %5206  ;;  %v1002_v3 = vadd.f32 1.0, %v5205_v55 }
 0x361   :  { %5210 = vrcp.f32 %v996_v40 }
 0x362   :  { %5212 = vrcp.f32 %v1002_v3 }
 0x36a   :  { %v5209_v62 = vpop.eup %5208 }
 0x36b   :  { %v5211_v63 = vpop.eup %5210  ;;  %v1005_v7 = vmul.f32 %v5209_v62, %v5207_v12 }
 0x36c   :  { %v1004_v20 = vmul.f32 %v5211_v63, %v5941_v53  ;;  %v5213_v59 = vpop.eup %5212 }
 0x36e   :  { %v5987_v23 = vadd.f32 %v1005_v7, %v1004_v20 }
 0x370   :  { %5214 = vtanh.f32 %v5987_v23 }
 0x37a   :  { %v5215_v27 = vpop.eup %5214 }
 0x37b   :  { %v5990_v30 = vmul.f32 %v5215_v27, %v5213_v59 }
 0x37d   :  { %1087 = vmatmul.mubr.f32.vlgmr.msra.gmra.mrb[6].mxu0 %v5990_v30  ;;  %1158 = vmatmul.mubr.f32.vlgmr.msra.gmra.mrb[6].mxu1 %v5990_v30 }
 0x37e   :  { %4176 = vmatpush1.bf16.msra.mxu0 %v5683_v22  ;;  %4208 = vmatpush1.bf16.msra.mxu1 %v5686_v25 }
 0x37f   :  { %4178 = vmatprep.subr.bf16.mxu0 %v5690_v29  ;;  %4210 = vmatprep.subr.bf16.mxu1 %v5697_v34 }
 0x380   :  { %1266 = vmatprep.mubr.f32.mxu0 %v5526_v0  ;;  %1337 = vmatprep.mubr.f32.mxu1 %v5526_v0 }
 0x382   :  { %4180 = vmatpush1.bf16.msra.mxu0 %v5699_v35  ;;  %4212 = vmatpush1.bf16.msra.mxu1 %v5703_v38 }
 0x383   :  { %4182 = vmatprep.subr.bf16.mxu0 %v5707_v42  ;;  %4214 = vmatprep.subr.bf16.mxu1 %v5714_v47 }
 0x386   :  { %4184 = vmatpush1.bf16.msra.mxu0 %v5718_v50  ;;  %4216 = vmatpush1.bf16.msra.mxu1 %v5722_v54 }
 0x387   :  { %4186 = vmatprep.subr.bf16.mxu0 %v5726_v58  ;;  %4218 = vmatprep.subr.bf16.mxu1 %v5730_v61 }
 0x38a   :  { %4188 = vmatpush1.bf16.msra.mxu0 %v5737_v2  ;;  %4220 = vmatpush1.bf16.msra.mxu1 %v5741_v5 }
 0x38b   :  { %4190 = vmatprep.subr.bf16.mxu0 %v5745_v8  ;;  %4222 = vmatprep.subr.bf16.mxu1 %v5749_v11 }
 0x38e   :  { %4192 = vmatpush1.bf16.msra.mxu0 %v5756_v15  ;;  %4224 = vmatpush1.bf16.msra.mxu1 %v5760_v19 }
 0x38f   :  { %4194 = vmatprep.subr.bf16.mxu0 %v5764_v24  ;;  %4226 = vmatprep.subr.bf16.mxu1 %v5768_v28 }
 0x392   :  { %4196 = vmatpush1.bf16.msra.mxu0 %v5775_v33  ;;  %4228 = vmatpush1.bf16.msra.mxu1 %v5779_v39 }
 0x393   :  { %4198 = vmatprep.subr.bf16.mxu0 %v5783_v43  ;;  %4230 = vmatprep.subr.bf16.mxu1 %v5787_v46 }
 0x396   :  { %4200 = vmatpush1.bf16.msra.mxu0 %v5794_v52  ;;  %4232 = vmatpush1.bf16.msra.mxu1 %v5798_v56 }
 0x397   :  { %4202 = vmatprep.subr.bf16.mxu0 %v5802_v60  ;;  %4234 = vmatprep.subr.bf16.mxu1 %v5806_v1 }
 0x39a   :  { %4204 = vmatpush1.bf16.msra.mxu0 %v5813_v4  ;;  %4236 = vmatpush1.bf16.msra.mxu1 %v5817_v6 }
 0x39b   :  { %4238 = vmatprep.subr.bf16.mxu0 %v5679_v17  ;;  %4270 = vmatprep.subr.bf16.mxu1 %v5681_v21 }
 0x450   :  { %v1088_v53 = vpop.f32.mrb[6].mxu0  ;;  %v1159_v26 = vpop.f32.mrb[6].mxu1 }
 0x451   :  { %v5035_v32 = vadd.f32 %v1088_v53, %v5875_v14  ;;  %v1090_v37 = vpop.f32.mrb[7].mxu0  ;;  %v1161_v41 = vpop.f32.mrb[7].mxu1  ;;  %v5051_v7 = vadd.f32 %v1159_v26, %v5892_v49 }
 0x452   :  { %v5036_v44 = vadd.f32 %v1090_v37, %v5879_v16  ;;  %v5052_v12 = vadd.f32 %v1161_v41, %v5886_v31 }
 0x453   :  { %v1168_v48 = vsub.f32 0.0, %v5035_v32 }
 0x454   :  { %v1173_v51 = vsub.f32 0.0, %v5036_v44  ;;  %v1179_v62 = vsub.f32 0.0, %v5052_v12 }
 0x455   :  { %v1169_v40 = vmul.f32 1.442695, %v1168_v48 }
 0x456   :  { %v1174_v55 = vmul.f32 1.442695, %v1173_v51  ;;  %v1180_v63 = vmul.f32 1.442695, %v1179_v62 }
 0x457   :  { %5216 = vpow2.f32 %v1169_v40 }
 0x458   :  { %5218 = vpow2.f32 %v1174_v55 }
 0x459   :  { %5220 = vpow2.f32 %v1180_v63 }
 0x45a   :  { %5222 = vtanh.f32 %v5051_v7 }
 0x461   :  { %v5217_v3 = vpop.eup %5216 }
 0x462   :  { %v5219_v20 = vpop.eup %5218  ;;  %v1171_v59 = vadd.f32 1.0, %v5217_v3 }
 0x463   :  { %v1176_v27 = vadd.f32 1.0, %v5219_v20  ;;  %v5221_v53 = vpop.eup %5220 }
 0x464   :  { %5224 = vrcp.f32 %v1171_v59  ;;  %v5223_v32 = vpop.eup %5222  ;;  %v1182_v41 = vadd.f32 1.0, %v5221_v53 }
 0x465   :  { %5226 = vrcp.f32 %v1176_v27 }
 0x466   :  { %5228 = vrcp.f32 %v1182_v41 }
 0x46e   :  { %v5225_v37 = vpop.eup %5224 }
 0x46f   :  { %v5227_v44 = vpop.eup %5226  ;;  %v1185_v48 = vmul.f32 %v5225_v37, %v5223_v32 }
 0x470   :  { %v1184_v51 = vmul.f32 %v5227_v44, %v5987_v23  ;;  %v5229_v26 = vpop.eup %5228 }
 0x472   :  { %v6033_v40 = vadd.f32 %v1185_v48, %v1184_v51 }
 0x474   :  { %5230 = vtanh.f32 %v6033_v40 }
 0x47e   :  { %v5231_v55 = vpop.eup %5230 }
 0x47f   :  { %v6036_v12 = vmul.f32 %v5231_v55, %v5229_v26 }
 0x481   :  { %1267 = vmatmul.mubr.f32.vlgmr.msra.gmra.mrb[8].mxu0 %v6036_v12  ;;  %1338 = vmatmul.mubr.f32.vlgmr.msra.gmra.mrb[8].mxu1 %v6036_v12 }
 0x482   :  { %4240 = vmatpush1.bf16.msra.mxu0 %v5683_v22  ;;  %4272 = vmatpush1.bf16.msra.mxu1 %v5686_v25 }
 0x483   :  { %4242 = vmatprep.subr.bf16.mxu0 %v5690_v29  ;;  %4274 = vmatprep.subr.bf16.mxu1 %v5697_v34 }
 0x484   :  { %1446 = vmatprep.mubr.f32.mxu0 %v5526_v0  ;;  %1517 = vmatprep.mubr.f32.mxu1 %v5526_v0 }
 0x486   :  { %4244 = vmatpush1.bf16.msra.mxu0 %v5699_v35  ;;  %4276 = vmatpush1.bf16.msra.mxu1 %v5703_v38 }
 0x487   :  { %4246 = vmatprep.subr.bf16.mxu0 %v5707_v42  ;;  %4278 = vmatprep.subr.bf16.mxu1 %v5714_v47 }
 0x48a   :  { %4248 = vmatpush1.bf16.msra.mxu0 %v5718_v50  ;;  %4280 = vmatpush1.bf16.msra.mxu1 %v5722_v54 }
 0x48b   :  { %4250 = vmatprep.subr.bf16.mxu0 %v5726_v58  ;;  %4282 = vmatprep.subr.bf16.mxu1 %v5730_v61 }
 0x48e   :  { %4252 = vmatpush1.bf16.msra.mxu0 %v5737_v2  ;;  %4284 = vmatpush1.bf16.msra.mxu1 %v5741_v5 }
 0x48f   :  { %4254 = vmatprep.subr.bf16.mxu0 %v5745_v8  ;;  %4286 = vmatprep.subr.bf16.mxu1 %v5749_v11 }
 0x492   :  { %4256 = vmatpush1.bf16.msra.mxu0 %v5756_v15  ;;  %4288 = vmatpush1.bf16.msra.mxu1 %v5760_v19 }
 0x493   :  { %4258 = vmatprep.subr.bf16.mxu0 %v5764_v24  ;;  %4290 = vmatprep.subr.bf16.mxu1 %v5768_v28 }
 0x496   :  { %4260 = vmatpush1.bf16.msra.mxu0 %v5775_v33  ;;  %4292 = vmatpush1.bf16.msra.mxu1 %v5779_v39 }
 0x497   :  { %4262 = vmatprep.subr.bf16.mxu0 %v5783_v43  ;;  %4294 = vmatprep.subr.bf16.mxu1 %v5787_v46 }
 0x49a   :  { %4264 = vmatpush1.bf16.msra.mxu0 %v5794_v52  ;;  %4296 = vmatpush1.bf16.msra.mxu1 %v5798_v56 }
 0x49b   :  { %4266 = vmatprep.subr.bf16.mxu0 %v5802_v60  ;;  %4298 = vmatprep.subr.bf16.mxu1 %v5806_v1 }
 0x49e   :  { %4268 = vmatpush1.bf16.msra.mxu0 %v5813_v4  ;;  %4300 = vmatpush1.bf16.msra.mxu1 %v5817_v6 }
 0x49f   :  { %4302 = vmatprep.subr.bf16.mxu0 %v5679_v17  ;;  %4334 = vmatprep.subr.bf16.mxu1 %v5681_v21 }
 0x554   :  { %v1268_v23 = vpop.f32.mrb[8].mxu0  ;;  %v1339_v62 = vpop.f32.mrb[8].mxu1 }
 0x555   :  { %v5037_v63 = vadd.f32 %v1268_v23, %v5875_v14  ;;  %v1270_v7 = vpop.f32.mrb[9].mxu0  ;;  %v1341_v3 = vpop.f32.mrb[9].mxu1  ;;  %v5053_v41 = vadd.f32 %v1339_v62, %v5892_v49 }
 0x556   :  { %v5038_v20 = vadd.f32 %v1270_v7, %v5879_v16  ;;  %v5054_v37 = vadd.f32 %v1341_v3, %v5886_v31 }
 0x557   :  { %v1348_v59 = vsub.f32 0.0, %v5037_v63 }
 0x558   :  { %v1353_v27 = vsub.f32 0.0, %v5038_v20  ;;  %v1359_v44 = vsub.f32 0.0, %v5054_v37 }
 0x559   :  { %v1349_v53 = vmul.f32 1.442695, %v1348_v59 }
 0x55a   :  { %v1354_v32 = vmul.f32 1.442695, %v1353_v27  ;;  %v1360_v48 = vmul.f32 1.442695, %v1359_v44 }
 0x55b   :  { %5232 = vpow2.f32 %v1349_v53 }
 0x55c   :  { %5234 = vpow2.f32 %v1354_v32 }
 0x55d   :  { %5236 = vpow2.f32 %v1360_v48 }
 0x55e   :  { %5238 = vtanh.f32 %v5053_v41 }
 0x565   :  { %v5233_v51 = vpop.eup %5232 }
 0x566   :  { %v5235_v26 = vpop.eup %5234  ;;  %v1351_v55 = vadd.f32 1.0, %v5233_v51 }
 0x567   :  { %v1356_v23 = vadd.f32 1.0, %v5235_v26  ;;  %v5237_v63 = vpop.eup %5236 }
 0x568   :  { %5240 = vrcp.f32 %v1351_v55  ;;  %v5239_v7 = vpop.eup %5238  ;;  %v1362_v3 = vadd.f32 1.0, %v5237_v63 }
 0x569   :  { %5242 = vrcp.f32 %v1356_v23 }
 0x56a   :  { %5244 = vrcp.f32 %v1362_v3 }
 0x572   :  { %v5241_v20 = vpop.eup %5240 }
 0x573   :  { %v5243_v59 = vpop.eup %5242  ;;  %v1365_v27 = vmul.f32 %v5241_v20, %v5239_v7 }
 0x574   :  { %v1364_v53 = vmul.f32 %v5243_v59, %v6033_v40  ;;  %v5245_v62 = vpop.eup %5244 }
 0x576   :  { %v6079_v32 = vadd.f32 %v1365_v27, %v1364_v53 }
 0x578   :  { %5246 = vtanh.f32 %v6079_v32 }
 0x582   :  { %v5247_v37 = vpop.eup %5246 }
 0x583   :  { %v6082_v44 = vmul.f32 %v5247_v37, %v5245_v62 }
 0x585   :  { %1447 = vmatmul.mubr.f32.vlgmr.msra.gmra.mrb[10].mxu0 %v6082_v44  ;;  %1518 = vmatmul.mubr.f32.vlgmr.msra.gmra.mrb[10].mxu1 %v6082_v44 }
 0x586   :  { %4304 = vmatpush1.bf16.msra.mxu0 %v5683_v22  ;;  %4336 = vmatpush1.bf16.msra.mxu1 %v5686_v25 }
 0x587   :  { %4306 = vmatprep.subr.bf16.mxu0 %v5690_v29  ;;  %4338 = vmatprep.subr.bf16.mxu1 %v5697_v34 }
 0x588   :  { %1626 = vmatprep.mubr.f32.mxu0 %v5526_v0  ;;  %1697 = vmatprep.mubr.f32.mxu1 %v5526_v0 }
 0x58a   :  { %4308 = vmatpush1.bf16.msra.mxu0 %v5699_v35  ;;  %4340 = vmatpush1.bf16.msra.mxu1 %v5703_v38 }
 0x58b   :  { %4310 = vmatprep.subr.bf16.mxu0 %v5707_v42  ;;  %4342 = vmatprep.subr.bf16.mxu1 %v5714_v47 }
 0x58e   :  { %4312 = vmatpush1.bf16.msra.mxu0 %v5718_v50  ;;  %4344 = vmatpush1.bf16.msra.mxu1 %v5722_v54 }
 0x58f   :  { %4314 = vmatprep.subr.bf16.mxu0 %v5726_v58  ;;  %4346 = vmatprep.subr.bf16.mxu1 %v5730_v61 }
 0x592   :  { %4316 = vmatpush1.bf16.msra.mxu0 %v5737_v2  ;;  %4348 = vmatpush1.bf16.msra.mxu1 %v5741_v5 }
 0x593   :  { %4318 = vmatprep.subr.bf16.mxu0 %v5745_v8  ;;  %4350 = vmatprep.subr.bf16.mxu1 %v5749_v11 }
 0x596   :  { %4320 = vmatpush1.bf16.msra.mxu0 %v5756_v15  ;;  %4352 = vmatpush1.bf16.msra.mxu1 %v5760_v19 }
 0x597   :  { %4322 = vmatprep.subr.bf16.mxu0 %v5764_v24  ;;  %4354 = vmatprep.subr.bf16.mxu1 %v5768_v28 }
 0x59a   :  { %4324 = vmatpush1.bf16.msra.mxu0 %v5775_v33  ;;  %4356 = vmatpush1.bf16.msra.mxu1 %v5779_v39 }
 0x59b   :  { %4326 = vmatprep.subr.bf16.mxu0 %v5783_v43  ;;  %4358 = vmatprep.subr.bf16.mxu1 %v5787_v46 }
 0x59e   :  { %4328 = vmatpush1.bf16.msra.mxu0 %v5794_v52  ;;  %4360 = vmatpush1.bf16.msra.mxu1 %v5798_v56 }
 0x59f   :  { %4330 = vmatprep.subr.bf16.mxu0 %v5802_v60  ;;  %4362 = vmatprep.subr.bf16.mxu1 %v5806_v1 }
 0x5a2   :  { %4332 = vmatpush1.bf16.msra.mxu0 %v5813_v4  ;;  %4364 = vmatpush1.bf16.msra.mxu1 %v5817_v6 }
 0x5a3   :  { %4366 = vmatprep.subr.bf16.mxu0 %v5679_v17  ;;  %4398 = vmatprep.subr.bf16.mxu1 %v5681_v21 }
 0x658   :  { %v1448_v40 = vpop.f32.mrb[10].mxu0  ;;  %v1519_v48 = vpop.f32.mrb[10].mxu1 }
 0x659   :  { %v5039_v41 = vadd.f32 %v1448_v40, %v5875_v14  ;;  %v1450_v51 = vpop.f32.mrb[11].mxu0  ;;  %v1521_v26 = vpop.f32.mrb[11].mxu1  ;;  %v5055_v21 = vadd.f32 %v1519_v48, %v5892_v49 }
 0x65a   :  { %v5040_v55 = vadd.f32 %v1450_v51, %v5879_v16  ;;  %v5056_v59 = vadd.f32 %v1521_v26, %v5886_v31 }
 0x65b   :  { %v1528_v23 = vsub.f32 0.0, %v5039_v41 }
 0x65c   :  { %v1533_v63 = vsub.f32 0.0, %v5040_v55  ;;  %v1539_v27 = vsub.f32 0.0, %v5056_v59 }
 0x65d   :  { %v1529_v7 = vmul.f32 1.442695, %v1528_v23 }
 0x65e   :  { %v1534_v20 = vmul.f32 1.442695, %v1533_v63  ;;  %v1540_v17 = vmul.f32 1.442695, %v1539_v27 }
 0x65f   :  { %5248 = vpow2.f32 %v1529_v7 }
 0x660   :  { %5250 = vpow2.f32 %v1534_v20 }
 0x661   :  { %5252 = vpow2.f32 %v1540_v17  ;;  %v1921_v17 = vld [vmem:[#allocation8] sm:$0xff] }
 0x662   :  { %5254 = vtanh.f32 %v5055_v21  ;;  %v1925_v21 = vld [vmem:[#allocation8 + $0x20] sm:$0xff] }
 0x669   :  { %v5249_v3 = vpop.eup %5248 }
 0x66a   :  { %v5251_v53 = vpop.eup %5250  ;;  %v1531_v62 = vadd.f32 1.0, %v5249_v3  ;;  %v1923_v3 = vld [vmem:[#allocation8 + $0x10] sm:$0xff] }
 0x66b   :  { %v1536_v37 = vadd.f32 1.0, %v5251_v53  ;;  %v5253_v40 = vpop.eup %5252  ;;  %v1927_v53 = vld [vmem:[#allocation8 + $0x30] sm:$0xff] }
 0x66c   :  { %5256 = vrcp.f32 %v1531_v62  ;;  %v5255_v41 = vpop.eup %5254  ;;  %v1542_v26 = vadd.f32 1.0, %v5253_v40  ;;  %v1930_v62 = vld [vmem:[#allocation8 + $0x48] sm:$0xff]  ;;  %v1932_v40 = vld [vmem:[#allocation8 + $0x58] sm:$0xff] }
 0x66d   :  { %5258 = vrcp.f32 %v1536_v37  ;;  %v1934_v37 = vld [vmem:[#allocation8 + $0x68] sm:$0xff] }
 0x66e   :  { %5260 = vrcp.f32 %v1542_v26  ;;  %v4463_v26 = vpack.c.bf16 %v1927_v53, %v1923_v3  ;;  %v1953_v3 = vld [vmem:[#allocation8 + $0x100] sm:$0xff] }
 0x66f   :  { %v1957_v53 = vld [vmem:[#allocation8 + $0x120] sm:$0xff] }
 0x676   :  { %v5257_v51 = vpop.eup %5256 }
 0x677   :  { %v5259_v55 = vpop.eup %5258  ;;  %v1545_v23 = vmul.f32 %v5257_v51, %v5255_v41  ;;  %v1936_v41 = vld [vmem:[#allocation8 + $0x78] sm:$0xff] }
 0x678   :  { %v1544_v63 = vmul.f32 %v5259_v55, %v6079_v32  ;;  %v5261_v48 = vpop.eup %5260 }
 0x67a   :  { %v6125_v7 = vadd.f32 %v1545_v23, %v1544_v63  ;;  %v4431_v23 = vpack.c.bf16 %v1925_v21, %v1921_v17  ;;  %v1929_v63 = vld [vmem:[#allocation8 + $0x40] sm:$0xff] }
 0x67c   :  { %5262 = vtanh.f32 %v6125_v7 }
 0x686   :  { %v5263_v20 = vpop.eup %5262 }
 0x687   :  { %v6128_v59 = vmul.f32 %v5263_v20, %v5261_v48  ;;  %v1933_v48 = vld [vmem:[#allocation8 + $0x60] sm:$0xff]  ;;  %v4433_v20 = vpack.c.bf16 %v1934_v37, %v1930_v62 }
 0x689   :  { %1627 = vmatmul.mubr.f32.vlgmr.msra.gmra.mrb[12].mxu0 %v6128_v59  ;;  %1698 = vmatmul.mubr.f32.vlgmr.msra.gmra.mrb[12].mxu1 %v6128_v59 }
 0x68a   :  { %4368 = vmatpush1.bf16.msra.mxu0 %v5683_v22  ;;  %4400 = vmatpush1.bf16.msra.mxu1 %v5686_v25  ;;  %v1922_v22 = vld [vmem:[#allocation8 + $0x8] sm:$0xff] }
 0x68b   :  { %4370 = vmatprep.subr.bf16.mxu0 %v5690_v29  ;;  %4402 = vmatprep.subr.bf16.mxu1 %v5697_v34  ;;  %v1926_v25 = vld [vmem:[#allocation8 + $0x28] sm:$0xff]  ;;  %v1924_v29 = vld [vmem:[#allocation8 + $0x18] sm:$0xff] }
 0x68c   :  { %1806 = vmatprep.mubr.f32.mxu0 %v5526_v0  ;;  %1877 = vmatprep.mubr.f32.mxu1 %v5526_v0  ;;  %v4429_v34 = vpack.c.bf16 %v1926_v25, %v1922_v22  ;;  %v4465_v22 = vpack.c.bf16 %v1936_v41, %v1932_v40  ;;  %v1931_v25 = vld [vmem:[#allocation8 + $0x50] sm:$0xff] }
 0x68d   :  { %v1955_v40 = vld [vmem:[#allocation8 + $0x110] sm:$0xff] }
 0x68e   :  { %4372 = vmatpush1.bf16.msra.mxu0 %v5699_v35  ;;  %4404 = vmatpush1.bf16.msra.mxu1 %v5703_v38  ;;  %v1928_v35 = vld [vmem:[#allocation8 + $0x38] sm:$0xff]  ;;  %v1959_v41 = vld [vmem:[#allocation8 + $0x130] sm:$0xff] }
 0x68f   :  { %4374 = vmatprep.subr.bf16.mxu0 %v5707_v42  ;;  %4406 = vmatprep.subr.bf16.mxu1 %v5714_v47  ;;  %v4461_v38 = vpack.c.bf16 %v1928_v35, %v1924_v29  ;;  %v1935_v29 = vld [vmem:[#allocation8 + $0x70] sm:$0xff]  ;;  %v1942_v35 = vld [vmem:[#allocation8 + $0xa8] sm:$0xff] }
 0x692   :  { %4376 = vmatpush1.bf16.msra.mxu0 %v5718_v50  ;;  %4408 = vmatpush1.bf16.msra.mxu1 %v5722_v54 }
 0x693   :  { %4378 = vmatprep.subr.bf16.mxu0 %v5726_v58  ;;  %4410 = vmatprep.subr.bf16.mxu1 %v5730_v61 }
 0x696   :  { %4380 = vmatpush1.bf16.msra.mxu0 %v5737_v2  ;;  %4412 = vmatpush1.bf16.msra.mxu1 %v5741_v5 }
 0x697   :  { %4382 = vmatprep.subr.bf16.mxu0 %v5745_v8  ;;  %4414 = vmatprep.subr.bf16.mxu1 %v5749_v11 }
 0x69a   :  { %4384 = vmatpush1.bf16.msra.mxu0 %v5756_v15  ;;  %4416 = vmatpush1.bf16.msra.mxu1 %v5760_v19 }
 0x69b   :  { %4386 = vmatprep.subr.bf16.mxu0 %v5764_v24  ;;  %4418 = vmatprep.subr.bf16.mxu1 %v5768_v28 }
 0x69e   :  { %4388 = vmatpush1.bf16.msra.mxu0 %v5775_v33  ;;  %4420 = vmatpush1.bf16.msra.mxu1 %v5779_v39 }
 0x69f   :  { %4390 = vmatprep.subr.bf16.mxu0 %v5783_v43  ;;  %4422 = vmatprep.subr.bf16.mxu1 %v5787_v46 }
 0x6a2   :  { %4392 = vmatpush1.bf16.msra.mxu0 %v5794_v52  ;;  %4424 = vmatpush1.bf16.msra.mxu1 %v5798_v56 }
 0x6a3   :  { %4394 = vmatprep.subr.bf16.mxu0 %v5802_v60  ;;  %4426 = vmatprep.subr.bf16.mxu1 %v5806_v1 }
 0x6a6   :  { %4396 = vmatpush1.bf16.msra.mxu0 %v5813_v4  ;;  %4428 = vmatpush1.bf16.msra.mxu1 %v5817_v6 }
 0x6a7   :  { %4430 = vmatprep.subr.bf16.mxu0 %v4429_v34  ;;  %4462 = vmatprep.subr.bf16.mxu1 %v4461_v38  ;;  %v1938_v34 = vld [vmem:[#allocation8 + $0x88] sm:$0xff]  ;;  %v1940_v38 = vld [vmem:[#allocation8 + $0x98] sm:$0xff] }
 0x75c   :  { %v1628_v42 = vpop.f32.mrb[12].mxu0  ;;  %v1699_v47 = vpop.f32.mrb[12].mxu1 }
 0x75d   :  { %v5041_v50 = vadd.f32 %v1628_v42, %v5875_v14  ;;  %v1630_v54 = vpop.f32.mrb[13].mxu0  ;;  %v1701_v58 = vpop.f32.mrb[13].mxu1  ;;  %v5057_v28 = vadd.f32 %v1699_v47, %v5892_v49  ;;  %v1944_v42 = vld [vmem:[#allocation8 + $0xb8] sm:$0xff]  ;;  %v4435_v47 = vpack.c.bf16 %v1933_v48, %v1929_v63  ;;  %v4447_v63 = vpack.c.bf16 %v1957_v53, %v1953_v3  ;;  %v2269_v53 = vld [vmem:[#allocation10 + $0x10] sm:$0xff] }
 0x75e   :  { %v5042_v61 = vadd.f32 %v1630_v54, %v5879_v16  ;;  %v5058_v15 = vadd.f32 %v1701_v58, %v5886_v31  ;;  %v1937_v54 = vld [vmem:[#allocation8 + $0x80] sm:$0xff]  ;;  %v4479_v48 = vpack.c.bf16 %v1959_v41, %v1955_v40  ;;  %v2280_v40 = vld [vmem:[#allocation10 + $0x68] sm:$0xff]  ;;  %v2278_v41 = vld [vmem:[#allocation10 + $0x58] sm:$0xff] }
 0x75f   :  { %v1708_v2 = vsub.f32 0.0, %v5041_v50  ;;  %v4467_v50 = vpack.c.bf16 %v1935_v29, %v1931_v25  ;;  %v1941_v58 = vld [vmem:[#allocation8 + $0xa0] sm:$0xff] }
 0x760   :  { %v1713_v5 = vsub.f32 0.0, %v5042_v61  ;;  %v1719_v19 = vsub.f32 0.0, %v5058_v15  ;;  %v4437_v61 = vpack.c.bf16 %v1942_v35, %v1938_v34  ;;  %v1950_v15 = vld [vmem:[#allocation8 + $0xe8] sm:$0xff]  ;;  %v1963_v34 = vld [vmem:[#allocation8 + $0x150] sm:$0xff] }
 0x761   :  { %v1709_v8 = vmul.f32 1.442695, %v1708_v2  ;;  %v4469_v2 = vpack.c.bf16 %v1944_v42, %v1940_v38  ;;  %v1967_v35 = vld [vmem:[#allocation8 + $0x170] sm:$0xff]  ;;  %v1970_v38 = vld [vmem:[#allocation8 + $0x188] sm:$0xff] }
 0x762   :  { %v1714_v11 = vmul.f32 1.442695, %v1713_v5  ;;  %v1720_v24 = vmul.f32 1.442695, %v1719_v19  ;;  %v1939_v5 = vld [vmem:[#allocation8 + $0x90] sm:$0xff]  ;;  %v1948_v19 = vld [vmem:[#allocation8 + $0xd8] sm:$0xff] }
 0x763   :  { %5264 = vpow2.f32 %v1709_v8  ;;  %v1943_v8 = vld [vmem:[#allocation8 + $0xb0] sm:$0xff]  ;;  %v1974_v42 = vld [vmem:[#allocation8 + $0x1a8] sm:$0xff] }
 0x764   :  { %5266 = vpow2.f32 %v1714_v11  ;;  %v1946_v11 = vld [vmem:[#allocation8 + $0xc8] sm:$0xff] }
 0x765   :  { %5268 = vpow2.f32 %v1720_v24  ;;  %v1952_v24 = vld [vmem:[#allocation8 + $0xf8] sm:$0xff] }
 0x766   :  { %5270 = vtanh.f32 %v5057_v28  ;;  %v4439_v28 = vpack.c.bf16 %v1941_v58, %v1937_v54  ;;  %v4483_v58 = vpack.c.bf16 %v1967_v35, %v1963_v34  ;;  %v2288_v34 = vld [vmem:[#allocation10 + $0xa8] sm:$0xff]  ;;  %v2286_v35 = vld [vmem:[#allocation10 + $0x98] sm:$0xff] }
 0x76d   :  { %v5265_v33 = vpop.eup %5264 }
 0x76e   :  { %v5267_v39 = vpop.eup %5266  ;;  %v1711_v43 = vadd.f32 1.0, %v5265_v33  ;;  %v4471_v33 = vpack.c.bf16 %v1943_v8, %v1939_v5  ;;  %v4453_v5 = vpack.c.bf16 %v1974_v42, %v1970_v38  ;;  %v2290_v42 = vld [vmem:[#allocation10 + $0xb8] sm:$0xff] }
 0x76f   :  { %v1716_v46 = vadd.f32 1.0, %v5267_v39  ;;  %v5269_v52 = vpop.eup %5268  ;;  %v1945_v39 = vld [vmem:[#allocation8 + $0xc0] sm:$0xff] }
 0x770   :  { %5272 = vrcp.f32 %v1711_v43  ;;  %v5271_v56 = vpop.eup %5270  ;;  %v1722_v6 = vadd.f32 1.0, %v5269_v52  ;;  %v1949_v43 = vld [vmem:[#allocation8 + $0xe0] sm:$0xff]  ;;  %v4473_v52 = vpack.c.bf16 %v1952_v24, %v1948_v19  ;;  %v1978_v19 = vld [vmem:[#allocation8 + $0x1c8] sm:$0xff] }
 0x771   :  { %5274 = vrcp.f32 %v1716_v46  ;;  %v4441_v46 = vpack.c.bf16 %v1950_v15, %v1946_v11  ;;  %v4443_v17 = vpack.c.bf16 %v1949_v43, %v1945_v39  ;;  %v1971_v11 = vld [vmem:[#allocation8 + $0x190] sm:$0xff]  ;;  %v1982_v24 = vld [vmem:[#allocation8 + $0x1e8] sm:$0xff] }
 0x772   :  { %5276 = vrcp.f32 %v1722_v6  ;;  %v1956_v6 = vld [vmem:[#allocation8 + $0x118] sm:$0xff]  ;;  %v1975_v15 = vld [vmem:[#allocation8 + $0x1b0] sm:$0xff] }
 0x773   :  { %v4487_v43 = vpack.c.bf16 %v1975_v15, %v1971_v11  ;;  %v2296_v11 = vld [vmem:[#allocation10 + $0xe8] sm:$0xff]  ;;  %v2294_v15 = vld [vmem:[#allocation10 + $0xd8] sm:$0xff] }
 0x77a   :  { %v5273_v60 = vpop.eup %5272 }
 0x77b   :  { %v5275_v1 = vpop.eup %5274  ;;  %v1725_v4 = vmul.f32 %v5273_v60, %v5271_v56  ;;  %v1947_v56 = vld [vmem:[#allocation8 + $0xd0] sm:$0xff] }
 0x77c   :  { %v1724_v32 = vmul.f32 %v5275_v1, %v6125_v7  ;;  %v5277_v51 = vpop.eup %5276  ;;  %v1951_v60 = vld [vmem:[#allocation8 + $0xf0] sm:$0xff]  ;;  %v1954_v1 = vld [vmem:[#allocation8 + $0x108] sm:$0xff] }
 0x77d   :  { %v4475_v21 = vpack.c.bf16 %v1951_v60, %v1947_v56  ;;  %v1981_v60 = vld [vmem:[#allocation8 + $0x1e0] sm:$0xff] }
 0x77e   :  { %v6169_v27 = vadd.f32 %v1725_v4, %v1724_v32  ;;  %v1958_v4 = vld [vmem:[#allocation8 + $0x128] sm:$0xff]  ;;  %v1960_v32 = vld [vmem:[#allocation8 + $0x138] sm:$0xff] }
 0x77f   :  { %v4445_v62 = vpack.c.bf16 %v1958_v4, %v1954_v1  ;;  %v4477_v37 = vpack.c.bf16 %v1960_v32, %v1956_v6  ;;  %v1979_v1 = vld [vmem:[#allocation8 + $0x1d0] sm:$0xff] }
 0x780   :  { %5278 = vtanh.f32 %v6169_v27  ;;  %v1983_v4 = vld [vmem:[#allocation8 + $0x1f0] sm:$0xff] }
 0x781   :  { %v4491_v32 = vpack.c.bf16 %v1983_v4, %v1979_v1  ;;  %v2304_v1 = vld [vmem:[#allocation10 + $0x128] sm:$0xff]  ;;  %v2302_v4 = vld [vmem:[#allocation10 + $0x118] sm:$0xff] }
 0x78a   :  { %v5279_v55 = vpop.eup %5278 }
 0x78b   :  { %v6172_v7 = vmul.f32 %v5279_v55, %v5277_v51  ;;  %v1962_v51 = vld [vmem:[#allocation8 + $0x148] sm:$0xff] }
 0x78c   :  { %v1966_v55 = vld [vmem:[#allocation8 + $0x168] sm:$0xff] }
 0x78d   :  { %1807 = vmatmul.mubr.f32.vlgmr.msra.gmra.mrb[14].mxu0 %v6172_v7  ;;  %1878 = vmatmul.mubr.f32.vlgmr.msra.gmra.mrb[14].mxu1 %v6172_v7  ;;  %v4449_v25 = vpack.c.bf16 %v1966_v55, %v1962_v51  ;;  %v2282_v55 = vld [vmem:[#allocation10 + $0x78] sm:$0xff] }
 0x78e   :  { %4432 = vmatpush1.bf16.msra.mxu0 %v4431_v23  ;;  %4464 = vmatpush1.bf16.msra.mxu1 %v4463_v26  ;;  %v1964_v23 = vld [vmem:[#allocation8 + $0x158] sm:$0xff] }
 0x78f   :  { %4434 = vmatprep.subr.bf16.mxu0 %v4433_v20  ;;  %4466 = vmatprep.subr.bf16.mxu1 %v4465_v22  ;;  %v1968_v26 = vld [vmem:[#allocation8 + $0x178] sm:$0xff]  ;;  %v1961_v20 = vld [vmem:[#allocation8 + $0x140] sm:$0xff] }
 0x790   :  { %2071 = vmatprep.mubr.f32.mxu0 %v5526_v0  ;;  %2184 = vmatprep.mubr.f32.mxu1 %v5526_v0  ;;  %v1965_v22 = vld [vmem:[#allocation8 + $0x160] sm:$0xff]  ;;  %v4481_v29 = vpack.c.bf16 %v1968_v26, %v1964_v23 }
 0x791   :  { %v4451_v54 = vpack.c.bf16 %v1965_v22, %v1961_v20  ;;  %v2275_v23 = vld [vmem:[#allocation10 + $0x40] sm:$0xff]  ;;  %v2277_v20 = vld [vmem:[#allocation10 + $0x50] sm:$0xff] }
 0x792   :  { %4436 = vmatpush1.bf16.msra.mxu0 %v4435_v47  ;;  %4468 = vmatpush1.bf16.msra.mxu1 %v4467_v50  ;;  %v1972_v47 = vld [vmem:[#allocation8 + $0x198] sm:$0xff]  ;;  %v2279_v26 = vld [vmem:[#allocation10 + $0x60] sm:$0xff]  ;;  %v2281_v22 = vld [vmem:[#allocation10 + $0x70] sm:$0xff] }
 0x793   :  { %4438 = vmatprep.subr.bf16.mxu0 %v4437_v61  ;;  %4470 = vmatprep.subr.bf16.mxu1 %v4469_v2  ;;  %v1976_v50 = vld [vmem:[#allocation8 + $0x1b8] sm:$0xff]  ;;  %v1969_v61 = vld [vmem:[#allocation8 + $0x180] sm:$0xff] }
 0x794   :  { %v1973_v2 = vld [vmem:[#allocation8 + $0x1a0] sm:$0xff]  ;;  %v4485_v8 = vpack.c.bf16 %v1976_v50, %v1972_v47 }
 0x795   :  { %v4455_v39 = vpack.c.bf16 %v1973_v2, %v1969_v61  ;;  %v2283_v47 = vld [vmem:[#allocation10 + $0x80] sm:$0xff]  ;;  %v2285_v61 = vld [vmem:[#allocation10 + $0x90] sm:$0xff] }
 0x796   :  { %4440 = vmatpush1.bf16.msra.mxu0 %v4439_v28  ;;  %4472 = vmatpush1.bf16.msra.mxu1 %v4471_v33  ;;  %v1980_v28 = vld [vmem:[#allocation8 + $0x1d8] sm:$0xff]  ;;  %v2287_v50 = vld [vmem:[#allocation10 + $0xa0] sm:$0xff]  ;;  %v2289_v2 = vld [vmem:[#allocation10 + $0xb0] sm:$0xff] }
 0x797   :  { %4442 = vmatprep.subr.bf16.mxu0 %v4441_v46  ;;  %4474 = vmatprep.subr.bf16.mxu1 %v4473_v52  ;;  %v1984_v33 = vld [vmem:[#allocation8 + $0x1f8] sm:$0xff]  ;;  %v1977_v46 = vld [vmem:[#allocation8 + $0x1c0] sm:$0xff]  ;;  %v4457_v52 = vpack.c.bf16 %v1982_v24, %v1978_v19 }
 0x798   :  { %v4489_v56 = vpack.c.bf16 %v1984_v33, %v1980_v28  ;;  %v4459_v6 = vpack.c.bf16 %v1981_v60, %v1977_v46  ;;  %v2298_v24 = vld [vmem:[#allocation10 + $0xf8] sm:$0xff]  ;;  %v2291_v28 = vld [vmem:[#allocation10 + $0xc0] sm:$0xff]  ;;  %v2293_v46 = vld [vmem:[#allocation10 + $0xd0] sm:$0xff] }
 0x799   :  { %v2295_v33 = vld [vmem:[#allocation10 + $0xe0] sm:$0xff] }
 0x79a   :  { %4444 = vmatpush1.bf16.msra.mxu0 %v4443_v17  ;;  %4476 = vmatpush1.bf16.msra.mxu1 %v4475_v21  ;;  %v2267_v17 = vld [vmem:[#allocation10] sm:$0xff] }
 0x79b   :  { %4446 = vmatprep.subr.bf16.mxu0 %v4445_v62  ;;  %4478 = vmatprep.subr.bf16.mxu1 %v4477_v37  ;;  %v2273_v62 = vld [vmem:[#allocation10 + $0x30] sm:$0xff]  ;;  %v2276_v37 = vld [vmem:[#allocation10 + $0x48] sm:$0xff] }
 0x79c   :  { %v6218_v51 = vpack.c.bf16 %v2280_v40, %v2276_v37 }
 0x79e   :  { %4448 = vmatpush1.bf16.msra.mxu0 %v4447_v63  ;;  %4480 = vmatpush1.bf16.msra.mxu1 %v4479_v48  ;;  %v6220_v63 = vpack.c.bf16 %v2282_v55, %v2278_v41  ;;  %v6222_v48 = vpack.c.bf16 %v2279_v26, %v2275_v23  ;;  %v2310_v41 = vld [vmem:[#allocation10 + $0x158] sm:$0xff]  ;;  %v2307_v23 = vld [vmem:[#allocation10 + $0x140] sm:$0xff] }
 0x79f   :  { %4450 = vmatprep.subr.bf16.mxu0 %v4449_v25  ;;  %4482 = vmatprep.subr.bf16.mxu1 %v4481_v29  ;;  %v6225_v25 = vpack.c.bf16 %v2281_v22, %v2277_v20  ;;  %v2284_v29 = vld [vmem:[#allocation10 + $0x88] sm:$0xff]  ;;  %v2314_v55 = vld [vmem:[#allocation10 + $0x178] sm:$0xff]  ;;  %v2311_v20 = vld [vmem:[#allocation10 + $0x160] sm:$0xff] }
 0x7a0   :  { %v6230_v38 = vpack.c.bf16 %v2288_v34, %v2284_v29  ;;  %v6266_v26 = vpack.c.bf16 %v2314_v55, %v2310_v41  ;;  %v2309_v22 = vld [vmem:[#allocation10 + $0x150] sm:$0xff]  ;;  %v6269_v34 = vpack.c.bf16 %v2311_v20, %v2307_v23 }
 0x7a1   :  { %v2313_v29 = vld [vmem:[#allocation10 + $0x170] sm:$0xff] }
 0x7a2   :  { %4452 = vmatpush1.bf16.msra.mxu0 %v4451_v54  ;;  %4484 = vmatpush1.bf16.msra.mxu1 %v4483_v58  ;;  %v6232_v54 = vpack.c.bf16 %v2290_v42, %v2286_v35  ;;  %v6234_v58 = vpack.c.bf16 %v2287_v50, %v2283_v47  ;;  %v2316_v35 = vld [vmem:[#allocation10 + $0x188] sm:$0xff]  ;;  %v2318_v47 = vld [vmem:[#allocation10 + $0x198] sm:$0xff]  ;;  %v6273_v50 = vpack.c.bf16 %v2313_v29, %v2309_v22 }
 0x7a3   :  { %4454 = vmatprep.subr.bf16.mxu0 %v4453_v5  ;;  %4486 = vmatprep.subr.bf16.mxu1 %v4485_v8  ;;  %v6237_v5 = vpack.c.bf16 %v2289_v2, %v2285_v61  ;;  %v2292_v8 = vld [vmem:[#allocation10 + $0xc8] sm:$0xff]  ;;  %v2322_v2 = vld [vmem:[#allocation10 + $0x1b8] sm:$0xff] }
 0x7a4   :  { %v6242_v19 = vpack.c.bf16 %v2296_v11, %v2292_v8  ;;  %v2320_v42 = vld [vmem:[#allocation10 + $0x1a8] sm:$0xff]  ;;  %v2315_v8 = vld [vmem:[#allocation10 + $0x180] sm:$0xff] }
 0x7a5   :  { %v6275_v61 = vpack.c.bf16 %v2320_v42, %v2316_v35  ;;  %v2319_v11 = vld [vmem:[#allocation10 + $0x1a0] sm:$0xff] }
 0x7a6   :  { %4456 = vmatpush1.bf16.msra.mxu0 %v4455_v39  ;;  %4488 = vmatpush1.bf16.msra.mxu1 %v4487_v43  ;;  %v6244_v39 = vpack.c.bf16 %v2298_v24, %v2294_v15  ;;  %v6246_v43 = vpack.c.bf16 %v2295_v33, %v2291_v28  ;;  %v6278_v15 = vpack.c.bf16 %v2322_v2, %v2318_v47  ;;  %v2317_v24 = vld [vmem:[#allocation10 + $0x190] sm:$0xff] }
 0x7a7   :  { %4458 = vmatprep.subr.bf16.mxu0 %v4457_v52  ;;  %4490 = vmatprep.subr.bf16.mxu1 %v4489_v56  ;;  %v2297_v52 = vld [vmem:[#allocation10 + $0xf0] sm:$0xff]  ;;  %v2300_v56 = vld [vmem:[#allocation10 + $0x108] sm:$0xff]  ;;  %v6281_v33 = vpack.c.bf16 %v2319_v11, %v2315_v8 }
 0x7a8   :  { %v6249_v60 = vpack.c.bf16 %v2297_v52, %v2293_v46  ;;  %v2321_v28 = vld [vmem:[#allocation10 + $0x1b0] sm:$0xff]  ;;  %v2324_v52 = vld [vmem:[#allocation10 + $0x1c8] sm:$0xff] }
 0x7a9   :  { %v6285_v46 = vpack.c.bf16 %v2321_v28, %v2317_v24 }
 0x7aa   :  { %4460 = vmatpush1.bf16.msra.mxu0 %v4459_v6  ;;  %4492 = vmatpush1.bf16.msra.mxu1 %v4491_v32  ;;  %v2306_v6 = vld [vmem:[#allocation10 + $0x138] sm:$0xff]  ;;  %v6253_v32 = vpack.c.bf16 %v2304_v1, %v2300_v56  ;;  %v2328_v56 = vld [vmem:[#allocation10 + $0x1e8] sm:$0xff] }
 0x7ab   :  { %v2326_v1 = vld [vmem:[#allocation10 + $0x1d8] sm:$0xff] }
 0x7ad   :  { %2072 = vmatmul.mubr.f32.vlgmr.msra.gmra.mrb[16].mxu0 %v5898_v36  ;;  %2185 = vmatmul.mubr.f32.vlgmr.msra.gmra.mrb[16].mxu1 %v5898_v36  ;;  %v2268_v36 = vld [vmem:[#allocation10 + $0x8] sm:$0xff] }
 0x7ae   :  { %2077 = vmatprep.mubr.f32.mxu0 %v5526_v0  ;;  %2190 = vmatprep.mubr.f32.mxu1 %v5526_v0 }
 0x7b1   :  { %2078 = vmatmul.mubr.f32.gmra.mrb[18].mxu0 %v5944_v57  ;;  %2191 = vmatmul.mubr.f32.gmra.mrb[18].mxu1 %v5944_v57  ;;  %v2272_v57 = vld [vmem:[#allocation10 + $0x28] sm:$0xff] }
 0x7b2   :  { %2083 = vmatprep.mubr.f32.mxu0 %v5526_v0  ;;  %2196 = vmatprep.mubr.f32.mxu1 %v5526_v0 }
 0x7b5   :  { %2084 = vmatmul.mubr.f32.gmra.mrb[20].mxu0 %v5990_v30  ;;  %2197 = vmatmul.mubr.f32.gmra.mrb[20].mxu1 %v5990_v30  ;;  %v2270_v30 = vld [vmem:[#allocation10 + $0x18] sm:$0xff] }
 0x7b6   :  { %2089 = vmatprep.mubr.f32.mxu0 %v5526_v0  ;;  %2202 = vmatprep.mubr.f32.mxu1 %v5526_v0 }
 0x7b9   :  { %2090 = vmatmul.mubr.f32.gmra.mrb[22].mxu0 %v6036_v12  ;;  %2203 = vmatmul.mubr.f32.gmra.mrb[22].mxu1 %v6036_v12  ;;  %v6206_v12 = vpack.c.bf16 %v2272_v57, %v2268_v36  ;;  %v6255_v36 = vpack.c.bf16 %v2306_v6, %v2302_v4  ;;  %v2299_v57 = vld [vmem:[#allocation10 + $0x100] sm:$0xff]  ;;  %v6290_v4 = vpack.c.bf16 %v2328_v56, %v2324_v52  ;;  %v2330_v6 = vld [vmem:[#allocation10 + $0x1f8] sm:$0xff] }
 0x7ba   :  { %2095 = vmatprep.mubr.f32.mxu0 %v5526_v0  ;;  %2208 = vmatprep.mubr.f32.mxu1 %v5526_v0 }
 0x7bb   :  { %4494 = vmatprep.subr.bf16.mxu0 %v6206_v12 }
 0x7bd   :  { %2096 = vmatmul.mubr.f32.gmra.mrb[24].mxu0 %v6082_v44  ;;  %2209 = vmatmul.mubr.f32.gmra.mrb[24].mxu1 %v6082_v44  ;;  %v2274_v44 = vld [vmem:[#allocation10 + $0x38] sm:$0xff] }
 0x7be   :  { %2101 = vmatprep.mubr.f32.mxu0 %v5526_v0  ;;  %2214 = vmatprep.mubr.f32.mxu1 %v5526_v0  ;;  %v6208_v21 = vpack.c.bf16 %v2274_v44, %v2270_v30  ;;  %v2303_v30 = vld [vmem:[#allocation10 + $0x120] sm:$0xff]  ;;  %v2301_v44 = vld [vmem:[#allocation10 + $0x110] sm:$0xff] }
 0x7c0   :  { %4526 = vmatprep.subr.bf16.mxu1 %v6208_v21 }
 0x7c1   :  { %2102 = vmatmul.mubr.f32.gmra.mrb[26].mxu0 %v6128_v59  ;;  %2215 = vmatmul.mubr.f32.gmra.mrb[26].mxu1 %v6128_v59  ;;  %v2271_v59 = vld [vmem:[#allocation10 + $0x20] sm:$0xff] }
 0x7c2   :  { %2107 = vmatprep.mubr.f32.mxu0 %v5526_v0  ;;  %2220 = vmatprep.mubr.f32.mxu1 %v5526_v0  ;;  %v6210_v3 = vpack.c.bf16 %v2271_v59, %v2267_v17  ;;  %v6258_v17 = vpack.c.bf16 %v2303_v30, %v2299_v57  ;;  %v2305_v59 = vld [vmem:[#allocation10 + $0x130] sm:$0xff]  ;;  %v2323_v57 = vld [vmem:[#allocation10 + $0x1c0] sm:$0xff] }
 0x7c3   :  { %v6262_v37 = vpack.c.bf16 %v2305_v59, %v2301_v44  ;;  %v2327_v30 = vld [vmem:[#allocation10 + $0x1e0] sm:$0xff]  ;;  %v6292_v44 = vpack.c.bf16 %v2330_v6, %v2326_v1 }
 0x7c4   :  { %4496 = vmatpush1.bf16.msra.mxu0 %v6210_v3  ;;  %v6294_v59 = vpack.c.bf16 %v2327_v30, %v2323_v57 }
 0x7c5   :  { %2108 = vmatmul.mubr.f32.gmra.mrb[28].mxu0 %v6172_v7  ;;  %2221 = vmatmul.mubr.f32.gmra.mrb[28].mxu1 %v6172_v7  ;;  %v6213_v7 = vpack.c.bf16 %v2273_v62, %v2269_v53  ;;  %v2308_v53 = vld [vmem:[#allocation10 + $0x148] sm:$0xff] }
 0x7c6   :  { %2113 = vmatprep.mubr.f32.mxu0 %v5526_v0  ;;  %2226 = vmatprep.mubr.f32.mxu1 %v5526_v0  ;;  %v2312_v62 = vld [vmem:[#allocation10 + $0x168] sm:$0xff] }
 0x7c7   :  { %4528 = vmatpush1.bf16.msra.mxu1 %v6213_v7  ;;  %4498 = vmatprep.subr.bf16.mxu0 %v6218_v51  ;;  %v6264_v40 = vpack.c.bf16 %v2312_v62, %v2308_v53  ;;  %v2325_v53 = vld [vmem:[#allocation10 + $0x1d0] sm:$0xff] }
 0x7c8   :  { %4530 = vmatprep.subr.bf16.mxu1 %v6220_v63  ;;  %4500 = vmatpush1.bf16.msra.mxu0 %v6222_v48  ;;  %v2329_v62 = vld [vmem:[#allocation10 + $0x1f0] sm:$0xff] }
 0x7c9   :  { %4502 = vmatprep.subr.bf16.mxu0 %v6230_v38  ;;  %v6297_v41 = vpack.c.bf16 %v2329_v62, %v2325_v53 }
 0x7cb   :  { %4532 = vmatpush1.bf16.msra.mxu1 %v6225_v25 }
 0x7cc   :  { %4534 = vmatprep.subr.bf16.mxu1 %v6232_v54  ;;  %4504 = vmatpush1.bf16.msra.mxu0 %v6234_v58 }
 0x7cd   :  { %4506 = vmatprep.subr.bf16.mxu0 %v6242_v19 }
 0x7cf   :  { %4536 = vmatpush1.bf16.msra.mxu1 %v6237_v5 }
 0x7d0   :  { %4538 = vmatprep.subr.bf16.mxu1 %v6244_v39  ;;  %4508 = vmatpush1.bf16.msra.mxu0 %v6246_v43 }
 0x7d1   :  { %4510 = vmatprep.subr.bf16.mxu0 %v6253_v32 }
 0x7d3   :  { %4540 = vmatpush1.bf16.msra.mxu1 %v6249_v60 }
 0x7d4   :  { %4542 = vmatprep.subr.bf16.mxu1 %v6255_v36  ;;  %4512 = vmatpush1.bf16.msra.mxu0 %v6258_v17 }
 0x7d5   :  { %4514 = vmatprep.subr.bf16.mxu0 %v6264_v40 }
 0x7d7   :  { %4544 = vmatpush1.bf16.msra.mxu1 %v6262_v37 }
 0x7d8   :  { %4546 = vmatprep.subr.bf16.mxu1 %v6266_v26  ;;  %4516 = vmatpush1.bf16.msra.mxu0 %v6269_v34 }
 0x7d9   :  { %4518 = vmatprep.subr.bf16.mxu0 %v6275_v61 }
 0x7db   :  { %4548 = vmatpush1.bf16.msra.mxu1 %v6273_v50 }
 0x7dc   :  { %4550 = vmatprep.subr.bf16.mxu1 %v6278_v15  ;;  %4520 = vmatpush1.bf16.msra.mxu0 %v6281_v33 }
 0x7dd   :  { %4522 = vmatprep.subr.bf16.mxu0 %v6290_v4 }
 0x7df   :  { %4552 = vmatpush1.bf16.msra.mxu1 %v6285_v46 }
 0x7e0   :  { %4554 = vmatprep.subr.bf16.mxu1 %v6292_v44  ;;  %4524 = vmatpush1.bf16.msra.mxu0 %v6294_v59 }
 0x7e1   :  { %4558 = vmatprep.subr.bf16.mxu0 %v6206_v12 }
 0x7e3   :  { %4556 = vmatpush1.bf16.msra.mxu1 %v6297_v41 }
 0x7e4   :  { %4590 = vmatprep.subr.bf16.mxu1 %v6208_v21 }
 0x860   :  { %v1808_v55 = vpop.f32.mrb[14].mxu0  ;;  %v1879_v23 = vpop.f32.mrb[14].mxu1 }
 0x861   :  { %v5043_v20 = vadd.f32 %v1808_v55, %v5875_v14  ;;  %v1810_v22 = vpop.f32.mrb[15].mxu0  ;;  %v1881_v29 = vpop.f32.mrb[15].mxu1  ;;  %v5059_v52 = vadd.f32 %v1879_v23, %v5892_v49 }
 0x862   :  { %v5044_v35 = vadd.f32 %v1810_v22, %v5879_v16  ;;  %v5060_v11 = vadd.f32 %v1881_v29, %v5886_v31 }
 0x863   :  { %v1888_v42 = vsub.f32 0.0, %v5043_v20 }
 0x864   :  { %v1893_v47 = vsub.f32 0.0, %v5044_v35  ;;  %v1899_v24 = vsub.f32 0.0, %v5060_v11 }
 0x865   :  { %v1889_v2 = vmul.f32 1.442695, %v1888_v42 }
 0x866   :  { %v1894_v8 = vmul.f32 1.442695, %v1893_v47  ;;  %v1900_v28 = vmul.f32 1.442695, %v1899_v24 }
 0x867   :  { %5280 = vpow2.f32 %v1889_v2 }
 0x868   :  { %5282 = vpow2.f32 %v1894_v8 }
 0x869   :  { %5284 = vpow2.f32 %v1900_v28 }
 0x86a   :  { %5286 = vtanh.f32 %v5059_v52 }
 0x871   :  { %v5281_v56 = vpop.eup %5280 }
 0x872   :  { %v5283_v1 = vpop.eup %5282  ;;  %v1891_v6 = vadd.f32 1.0, %v5281_v56 }
 0x873   :  { %v1896_v14 = vadd.f32 1.0, %v5283_v1  ;;  %v5285_v16 = vpop.eup %5284 }
 0x874   :  { %5288 = vrcp.f32 %v1891_v6  ;;  %v5287_v57 = vpop.eup %5286  ;;  %v1902_v31 = vadd.f32 1.0, %v5285_v16 }
 0x875   :  { %5290 = vrcp.f32 %v1896_v14 }
 0x876   :  { %5292 = vrcp.f32 %v1902_v31 }
 0x87e   :  { %v5289_v30 = vpop.eup %5288 }
 0x87f   :  { %v5291_v53 = vpop.eup %5290  ;;  %v1905_v62 = vmul.f32 %v5289_v30, %v5287_v57 }
 0x880   :  { %v1904_v55 = vmul.f32 %v5291_v53, %v6169_v27  ;;  %v5293_v49 = vpop.eup %5292  ;;  %v1985_v27 = vld [vmem:[%s6641_s6] sm:$0xf] }
 0x881   :  { %v6352_v29 = vrot.slane %v1985_v27, %v107_v10  ;;  %v6356_v35 = vrot.slane %v1985_v27, %v111_v13  ;;  %v6362_v28 = vrot.slane %v1985_v27, %v119_v18  ;;  %v6367_v14 = vrot.slane %v1985_v27, %v115_v45 }
 0x882   :  { %v1906_v20 = vadd.f32 %v1905_v62, %v1904_v55 }
 0x884   :  { %5294 = vtanh.f32 %v1906_v20 }
 0x88e   :  { %v5295_v23 = vpop.eup %5294 }
 0x88f   :  { %v1908_v22 = vmul.f32 %v5295_v23, %v5293_v49 }
 0x891   :  { %2114 = vmatmul.mubr.f32.gmra.mrb[30].mxu0 %v1908_v22  ;;  %2227 = vmatmul.mubr.f32.gmra.mrb[30].mxu1 %v1908_v22 }
 0x892   :  { %2401 = vmatprep.mubr.f32.mxu0 %v5526_v0  ;;  %2472 = vmatprep.mubr.f32.mxu1 %v5526_v0 }
 0x895   :  { %2402 = vmatmul.mubr.f32.vlgmr.msra.gmra.mrb[16].mxu0 %v5526_v0  ;;  %2473 = vmatmul.mubr.f32.vlgmr.msra.gmra.mrb[16].mxu1 %v5526_v0 }
 0x896   :  { %4560 = vmatpush1.bf16.msra.mxu0 %v6210_v3  ;;  %4592 = vmatpush1.bf16.msra.mxu1 %v6213_v7 }
 0x897   :  { %4562 = vmatprep.subr.bf16.mxu0 %v6218_v51  ;;  %4594 = vmatprep.subr.bf16.mxu1 %v6220_v63 }
 0x898   :  { %2576 = vmatprep.mubr.f32.mxu0 %v5526_v0  ;;  %2647 = vmatprep.mubr.f32.mxu1 %v5526_v0 }
 0x89a   :  { %4564 = vmatpush1.bf16.msra.mxu0 %v6222_v48  ;;  %4596 = vmatpush1.bf16.msra.mxu1 %v6225_v25 }
 0x89b   :  { %4566 = vmatprep.subr.bf16.mxu0 %v6230_v38  ;;  %4598 = vmatprep.subr.bf16.mxu1 %v6232_v54 }
 0x89e   :  { %4568 = vmatpush1.bf16.msra.mxu0 %v6234_v58  ;;  %4600 = vmatpush1.bf16.msra.mxu1 %v6237_v5 }
 0x89f   :  { %4570 = vmatprep.subr.bf16.mxu0 %v6242_v19  ;;  %4602 = vmatprep.subr.bf16.mxu1 %v6244_v39 }
 0x8a2   :  { %4572 = vmatpush1.bf16.msra.mxu0 %v6246_v43  ;;  %4604 = vmatpush1.bf16.msra.mxu1 %v6249_v60 }
 0x8a3   :  { %4574 = vmatprep.subr.bf16.mxu0 %v6253_v32  ;;  %4606 = vmatprep.subr.bf16.mxu1 %v6255_v36 }
 0x8a6   :  { %4576 = vmatpush1.bf16.msra.mxu0 %v6258_v17  ;;  %4608 = vmatpush1.bf16.msra.mxu1 %v6262_v37 }
 0x8a7   :  { %4578 = vmatprep.subr.bf16.mxu0 %v6264_v40  ;;  %4610 = vmatprep.subr.bf16.mxu1 %v6266_v26 }
 0x8aa   :  { %4580 = vmatpush1.bf16.msra.mxu0 %v6269_v34  ;;  %4612 = vmatpush1.bf16.msra.mxu1 %v6273_v50 }
 0x8ab   :  { %4582 = vmatprep.subr.bf16.mxu0 %v6275_v61  ;;  %4614 = vmatprep.subr.bf16.mxu1 %v6278_v15 }
 0x8ae   :  { %4584 = vmatpush1.bf16.msra.mxu0 %v6281_v33  ;;  %4616 = vmatpush1.bf16.msra.mxu1 %v6285_v46 }
 0x8af   :  { %4586 = vmatprep.subr.bf16.mxu0 %v6290_v4  ;;  %4618 = vmatprep.subr.bf16.mxu1 %v6292_v44 }
 0x8b2   :  { %4588 = vmatpush1.bf16.msra.mxu0 %v6294_v59  ;;  %4620 = vmatpush1.bf16.msra.mxu1 %v6297_v41 }
 0x8b3   :  { %4622 = vmatprep.subr.bf16.mxu0 %v6206_v12  ;;  %4654 = vmatprep.subr.bf16.mxu1 %v6208_v21 }
 0x968   :  { %v2403_v42 = vpop.f32.mrb[16].mxu0  ;;  %v2474_v47 = vpop.f32.mrb[16].mxu1 }
 0x969   :  { %v5061_v2 = vadd.f32 %v2403_v42, %v6352_v29  ;;  %v2405_v8 = vpop.f32.mrb[17].mxu0  ;;  %v2476_v11 = vpop.f32.mrb[17].mxu1  ;;  %v5077_v57 = vadd.f32 %v2474_v47, %v6367_v14 }
 0x96a   :  { %v5062_v24 = vadd.f32 %v2405_v8, %v6356_v35  ;;  %v5078_v6 = vadd.f32 %v2476_v11, %v6362_v28 }
 0x96b   :  { %v2483_v52 = vsub.f32 0.0, %v5061_v2 }
 0x96c   :  { %v2488_v56 = vsub.f32 0.0, %v5062_v24  ;;  %v2494_v13 = vsub.f32 0.0, %v5078_v6 }
 0x96d   :  { %v2484_v10 = vmul.f32 1.442695, %v2483_v52 }
 0x96e   :  { %v2489_v1 = vmul.f32 1.442695, %v2488_v56  ;;  %v2495_v16 = vmul.f32 1.442695, %v2494_v13 }
 0x96f   :  { %5296 = vpow2.f32 %v2484_v10 }
 0x970   :  { %5298 = vpow2.f32 %v2489_v1 }
 0x971   :  { %5300 = vpow2.f32 %v2495_v16 }
 0x972   :  { %5302 = vtanh.f32 %v5077_v57 }
 0x979   :  { %v5297_v30 = vpop.eup %5296 }
 0x97a   :  { %v5299_v53 = vpop.eup %5298  ;;  %v2486_v18 = vadd.f32 1.0, %v5297_v30 }
 0x97b   :  { %v2491_v62 = vadd.f32 1.0, %v5299_v53  ;;  %v5301_v31 = vpop.eup %5300 }
 0x97c   :  { %5304 = vrcp.f32 %v2486_v18  ;;  %v5303_v55 = vpop.eup %5302  ;;  %v2497_v22 = vadd.f32 1.0, %v5301_v31 }
 0x97d   :  { %5306 = vrcp.f32 %v2491_v62 }
 0x97e   :  { %5308 = vrcp.f32 %v2497_v22 }
 0x986   :  { %v5305_v20 = vpop.eup %5304 }
 0x987   :  { %v5307_v49 = vpop.eup %5306  ;;  %v2500_v23 = vmul.f32 %v5305_v20, %v5303_v55 }
 0x988   :  { %v2499_v9 = vmul.f32 0.0, %v5307_v49  ;;  %v5309_v27 = vpop.eup %5308 }
 0x98a   :  { %v6370_v45 = vadd.f32 %v2500_v23, %v2499_v9 }
 0x98c   :  { %5310 = vtanh.f32 %v6370_v45 }
 0x996   :  { %v5311_v42 = vpop.eup %5310 }
 0x997   :  { %v2503_v47 = vmul.f32 %v5311_v42, %v5309_v27 }
 0x999   :  { %2577 = vmatmul.mubr.f32.vlgmr.msra.gmra.mrb[18].mxu0 %v2503_v47  ;;  %2648 = vmatmul.mubr.f32.vlgmr.msra.gmra.mrb[18].mxu1 %v2503_v47 }
 0x99a   :  { %4624 = vmatpush1.bf16.msra.mxu0 %v6210_v3  ;;  %4656 = vmatpush1.bf16.msra.mxu1 %v6213_v7 }
 0x99b   :  { %4626 = vmatprep.subr.bf16.mxu0 %v6218_v51  ;;  %4658 = vmatprep.subr.bf16.mxu1 %v6220_v63 }
 0x99c   :  { %2751 = vmatprep.mubr.f32.mxu0 %v5526_v0  ;;  %2822 = vmatprep.mubr.f32.mxu1 %v5526_v0 }
 0x99e   :  { %4628 = vmatpush1.bf16.msra.mxu0 %v6222_v48  ;;  %4660 = vmatpush1.bf16.msra.mxu1 %v6225_v25 }
 0x99f   :  { %4630 = vmatprep.subr.bf16.mxu0 %v6230_v38  ;;  %4662 = vmatprep.subr.bf16.mxu1 %v6232_v54 }
 0x9a2   :  { %4632 = vmatpush1.bf16.msra.mxu0 %v6234_v58  ;;  %4664 = vmatpush1.bf16.msra.mxu1 %v6237_v5 }
 0x9a3   :  { %4634 = vmatprep.subr.bf16.mxu0 %v6242_v19  ;;  %4666 = vmatprep.subr.bf16.mxu1 %v6244_v39 }
 0x9a6   :  { %4636 = vmatpush1.bf16.msra.mxu0 %v6246_v43  ;;  %4668 = vmatpush1.bf16.msra.mxu1 %v6249_v60 }
 0x9a7   :  { %4638 = vmatprep.subr.bf16.mxu0 %v6253_v32  ;;  %4670 = vmatprep.subr.bf16.mxu1 %v6255_v36 }
 0x9aa   :  { %4640 = vmatpush1.bf16.msra.mxu0 %v6258_v17  ;;  %4672 = vmatpush1.bf16.msra.mxu1 %v6262_v37 }
 0x9ab   :  { %4642 = vmatprep.subr.bf16.mxu0 %v6264_v40  ;;  %4674 = vmatprep.subr.bf16.mxu1 %v6266_v26 }
 0x9ae   :  { %4644 = vmatpush1.bf16.msra.mxu0 %v6269_v34  ;;  %4676 = vmatpush1.bf16.msra.mxu1 %v6273_v50 }
 0x9af   :  { %4646 = vmatprep.subr.bf16.mxu0 %v6275_v61  ;;  %4678 = vmatprep.subr.bf16.mxu1 %v6278_v15 }
 0x9b2   :  { %4648 = vmatpush1.bf16.msra.mxu0 %v6281_v33  ;;  %4680 = vmatpush1.bf16.msra.mxu1 %v6285_v46 }
 0x9b3   :  { %4650 = vmatprep.subr.bf16.mxu0 %v6290_v4  ;;  %4682 = vmatprep.subr.bf16.mxu1 %v6292_v44 }
 0x9b6   :  { %4652 = vmatpush1.bf16.msra.mxu0 %v6294_v59  ;;  %4684 = vmatpush1.bf16.msra.mxu1 %v6297_v41 }
 0x9b7   :  { %4686 = vmatprep.subr.bf16.mxu0 %v6206_v12  ;;  %4718 = vmatprep.subr.bf16.mxu1 %v6208_v21 }
 0xa6c   :  { %v2578_v2 = vpop.f32.mrb[18].mxu0  ;;  %v2649_v8 = vpop.f32.mrb[18].mxu1 }
 0xa6d   :  { %v5063_v11 = vadd.f32 %v2578_v2, %v6352_v29  ;;  %v2580_v24 = vpop.f32.mrb[19].mxu0  ;;  %v2651_v52 = vpop.f32.mrb[19].mxu1  ;;  %v5079_v53 = vadd.f32 %v2649_v8, %v6367_v14 }
 0xa6e   :  { %v5064_v56 = vadd.f32 %v2580_v24, %v6356_v35  ;;  %v5080_v16 = vadd.f32 %v2651_v52, %v6362_v28 }
 0xa6f   :  { %v2658_v10 = vsub.f32 0.0, %v5063_v11 }
 0xa70   :  { %v2663_v1 = vsub.f32 0.0, %v5064_v56  ;;  %v2669_v57 = vsub.f32 0.0, %v5080_v16 }
 0xa71   :  { %v2659_v6 = vmul.f32 1.442695, %v2658_v10 }
 0xa72   :  { %v2664_v13 = vmul.f32 1.442695, %v2663_v1  ;;  %v2670_v30 = vmul.f32 1.442695, %v2669_v57 }
 0xa73   :  { %5312 = vpow2.f32 %v2659_v6 }
 0xa74   :  { %5314 = vpow2.f32 %v2664_v13 }
 0xa75   :  { %5316 = vpow2.f32 %v2670_v30 }
 0xa76   :  { %5318 = vtanh.f32 %v5079_v53 }
 0xa7d   :  { %v5313_v18 = vpop.eup %5312 }
 0xa7e   :  { %v5315_v62 = vpop.eup %5314  ;;  %v2661_v31 = vadd.f32 1.0, %v5313_v18 }
 0xa7f   :  { %v2666_v55 = vadd.f32 1.0, %v5315_v62  ;;  %v5317_v20 = vpop.eup %5316 }
 0xa80   :  { %5320 = vrcp.f32 %v2661_v31  ;;  %v5319_v49 = vpop.eup %5318  ;;  %v2672_v27 = vadd.f32 1.0, %v5317_v20 }
 0xa81   :  { %5322 = vrcp.f32 %v2666_v55 }
 0xa82   :  { %5324 = vrcp.f32 %v2672_v27 }
 0xa8a   :  { %v5321_v23 = vpop.eup %5320 }
 0xa8b   :  { %v5323_v22 = vpop.eup %5322  ;;  %v2675_v9 = vmul.f32 %v5321_v23, %v5319_v49 }
 0xa8c   :  { %v2674_v42 = vmul.f32 %v5323_v22, %v6370_v45  ;;  %v5325_v2 = vpop.eup %5324 }
 0xa8e   :  { %v6412_v47 = vadd.f32 %v2675_v9, %v2674_v42 }
 0xa90   :  { %5326 = vtanh.f32 %v6412_v47 }
 0xa9a   :  { %v5327_v8 = vpop.eup %5326 }
 0xa9b   :  { %v2678_v11 = vmul.f32 %v5327_v8, %v5325_v2 }
 0xa9d   :  { %2752 = vmatmul.mubr.f32.vlgmr.msra.gmra.mrb[20].mxu0 %v2678_v11  ;;  %2823 = vmatmul.mubr.f32.vlgmr.msra.gmra.mrb[20].mxu1 %v2678_v11 }
 0xa9e   :  { %4688 = vmatpush1.bf16.msra.mxu0 %v6210_v3  ;;  %4720 = vmatpush1.bf16.msra.mxu1 %v6213_v7 }
 0xa9f   :  { %4690 = vmatprep.subr.bf16.mxu0 %v6218_v51  ;;  %4722 = vmatprep.subr.bf16.mxu1 %v6220_v63 }
 0xaa0   :  { %2926 = vmatprep.mubr.f32.mxu0 %v5526_v0  ;;  %2997 = vmatprep.mubr.f32.mxu1 %v5526_v0 }
 0xaa2   :  { %4692 = vmatpush1.bf16.msra.mxu0 %v6222_v48  ;;  %4724 = vmatpush1.bf16.msra.mxu1 %v6225_v25 }
 0xaa3   :  { %4694 = vmatprep.subr.bf16.mxu0 %v6230_v38  ;;  %4726 = vmatprep.subr.bf16.mxu1 %v6232_v54 }
 0xaa6   :  { %4696 = vmatpush1.bf16.msra.mxu0 %v6234_v58  ;;  %4728 = vmatpush1.bf16.msra.mxu1 %v6237_v5 }
 0xaa7   :  { %4698 = vmatprep.subr.bf16.mxu0 %v6242_v19  ;;  %4730 = vmatprep.subr.bf16.mxu1 %v6244_v39 }
 0xaaa   :  { %4700 = vmatpush1.bf16.msra.mxu0 %v6246_v43  ;;  %4732 = vmatpush1.bf16.msra.mxu1 %v6249_v60 }
 0xaab   :  { %4702 = vmatprep.subr.bf16.mxu0 %v6253_v32  ;;  %4734 = vmatprep.subr.bf16.mxu1 %v6255_v36 }
 0xaae   :  { %4704 = vmatpush1.bf16.msra.mxu0 %v6258_v17  ;;  %4736 = vmatpush1.bf16.msra.mxu1 %v6262_v37 }
 0xaaf   :  { %4706 = vmatprep.subr.bf16.mxu0 %v6264_v40  ;;  %4738 = vmatprep.subr.bf16.mxu1 %v6266_v26 }
 0xab2   :  { %4708 = vmatpush1.bf16.msra.mxu0 %v6269_v34  ;;  %4740 = vmatpush1.bf16.msra.mxu1 %v6273_v50 }
 0xab3   :  { %4710 = vmatprep.subr.bf16.mxu0 %v6275_v61  ;;  %4742 = vmatprep.subr.bf16.mxu1 %v6278_v15 }
 0xab6   :  { %4712 = vmatpush1.bf16.msra.mxu0 %v6281_v33  ;;  %4744 = vmatpush1.bf16.msra.mxu1 %v6285_v46 }
 0xab7   :  { %4714 = vmatprep.subr.bf16.mxu0 %v6290_v4  ;;  %4746 = vmatprep.subr.bf16.mxu1 %v6292_v44 }
 0xaba   :  { %4716 = vmatpush1.bf16.msra.mxu0 %v6294_v59  ;;  %4748 = vmatpush1.bf16.msra.mxu1 %v6297_v41 }
 0xabb   :  { %4750 = vmatprep.subr.bf16.mxu0 %v6206_v12  ;;  %4782 = vmatprep.subr.bf16.mxu1 %v6208_v21 }
 0xb70   :  { %v2753_v45 = vpop.f32.mrb[20].mxu0  ;;  %v2824_v24 = vpop.f32.mrb[20].mxu1 }
 0xb71   :  { %v5065_v52 = vadd.f32 %v2753_v45, %v6352_v29  ;;  %v2755_v56 = vpop.f32.mrb[21].mxu0  ;;  %v2826_v10 = vpop.f32.mrb[21].mxu1  ;;  %v5081_v62 = vadd.f32 %v2824_v24, %v6367_v14 }
 0xb72   :  { %v5066_v1 = vadd.f32 %v2755_v56, %v6356_v35  ;;  %v5082_v30 = vadd.f32 %v2826_v10, %v6362_v28 }
 0xb73   :  { %v2833_v6 = vsub.f32 0.0, %v5065_v52 }
 0xb74   :  { %v2838_v13 = vsub.f32 0.0, %v5066_v1  ;;  %v2844_v53 = vsub.f32 0.0, %v5082_v30 }
 0xb75   :  { %v2834_v16 = vmul.f32 1.442695, %v2833_v6 }
 0xb76   :  { %v2839_v57 = vmul.f32 1.442695, %v2838_v13  ;;  %v2845_v18 = vmul.f32 1.442695, %v2844_v53 }
 0xb77   :  { %5328 = vpow2.f32 %v2834_v16 }
 0xb78   :  { %5330 = vpow2.f32 %v2839_v57 }
 0xb79   :  { %5332 = vpow2.f32 %v2845_v18 }
 0xb7a   :  { %5334 = vtanh.f32 %v5081_v62 }
 0xb81   :  { %v5329_v31 = vpop.eup %5328 }
 0xb82   :  { %v5331_v55 = vpop.eup %5330  ;;  %v2836_v20 = vadd.f32 1.0, %v5329_v31 }
 0xb83   :  { %v2841_v49 = vadd.f32 1.0, %v5331_v55  ;;  %v5333_v23 = vpop.eup %5332 }
 0xb84   :  { %5336 = vrcp.f32 %v2836_v20  ;;  %v5335_v22 = vpop.eup %5334  ;;  %v2847_v2 = vadd.f32 1.0, %v5333_v23 }
 0xb85   :  { %5338 = vrcp.f32 %v2841_v49 }
 0xb86   :  { %5340 = vrcp.f32 %v2847_v2 }
 0xb8e   :  { %v5337_v9 = vpop.eup %5336 }
 0xb8f   :  { %v5339_v27 = vpop.eup %5338  ;;  %v2850_v42 = vmul.f32 %v5337_v9, %v5335_v22 }
 0xb90   :  { %v2849_v8 = vmul.f32 %v5339_v27, %v6412_v47  ;;  %v5341_v45 = vpop.eup %5340 }
 0xb92   :  { %v6454_v11 = vadd.f32 %v2850_v42, %v2849_v8 }
 0xb94   :  { %5342 = vtanh.f32 %v6454_v11 }
 0xb9e   :  { %v5343_v24 = vpop.eup %5342 }
 0xb9f   :  { %v2853_v52 = vmul.f32 %v5343_v24, %v5341_v45 }
 0xba1   :  { %2927 = vmatmul.mubr.f32.vlgmr.msra.gmra.mrb[22].mxu0 %v2853_v52  ;;  %2998 = vmatmul.mubr.f32.vlgmr.msra.gmra.mrb[22].mxu1 %v2853_v52 }
 0xba2   :  { %4752 = vmatpush1.bf16.msra.mxu0 %v6210_v3  ;;  %4784 = vmatpush1.bf16.msra.mxu1 %v6213_v7 }
 0xba3   :  { %4754 = vmatprep.subr.bf16.mxu0 %v6218_v51  ;;  %4786 = vmatprep.subr.bf16.mxu1 %v6220_v63 }
 0xba4   :  { %3101 = vmatprep.mubr.f32.mxu0 %v5526_v0  ;;  %3172 = vmatprep.mubr.f32.mxu1 %v5526_v0 }
 0xba6   :  { %4756 = vmatpush1.bf16.msra.mxu0 %v6222_v48  ;;  %4788 = vmatpush1.bf16.msra.mxu1 %v6225_v25 }
 0xba7   :  { %4758 = vmatprep.subr.bf16.mxu0 %v6230_v38  ;;  %4790 = vmatprep.subr.bf16.mxu1 %v6232_v54 }
 0xbaa   :  { %4760 = vmatpush1.bf16.msra.mxu0 %v6234_v58  ;;  %4792 = vmatpush1.bf16.msra.mxu1 %v6237_v5 }
 0xbab   :  { %4762 = vmatprep.subr.bf16.mxu0 %v6242_v19  ;;  %4794 = vmatprep.subr.bf16.mxu1 %v6244_v39 }
 0xbae   :  { %4764 = vmatpush1.bf16.msra.mxu0 %v6246_v43  ;;  %4796 = vmatpush1.bf16.msra.mxu1 %v6249_v60 }
 0xbaf   :  { %4766 = vmatprep.subr.bf16.mxu0 %v6253_v32  ;;  %4798 = vmatprep.subr.bf16.mxu1 %v6255_v36 }
 0xbb2   :  { %4768 = vmatpush1.bf16.msra.mxu0 %v6258_v17  ;;  %4800 = vmatpush1.bf16.msra.mxu1 %v6262_v37 }
 0xbb3   :  { %4770 = vmatprep.subr.bf16.mxu0 %v6264_v40  ;;  %4802 = vmatprep.subr.bf16.mxu1 %v6266_v26 }
 0xbb6   :  { %4772 = vmatpush1.bf16.msra.mxu0 %v6269_v34  ;;  %4804 = vmatpush1.bf16.msra.mxu1 %v6273_v50 }
 0xbb7   :  { %4774 = vmatprep.subr.bf16.mxu0 %v6275_v61  ;;  %4806 = vmatprep.subr.bf16.mxu1 %v6278_v15 }
 0xbba   :  { %4776 = vmatpush1.bf16.msra.mxu0 %v6281_v33  ;;  %4808 = vmatpush1.bf16.msra.mxu1 %v6285_v46 }
 0xbbb   :  { %4778 = vmatprep.subr.bf16.mxu0 %v6290_v4  ;;  %4810 = vmatprep.subr.bf16.mxu1 %v6292_v44 }
 0xbbe   :  { %4780 = vmatpush1.bf16.msra.mxu0 %v6294_v59  ;;  %4812 = vmatpush1.bf16.msra.mxu1 %v6297_v41 }
 0xbbf   :  { %4814 = vmatprep.subr.bf16.mxu0 %v6206_v12  ;;  %4846 = vmatprep.subr.bf16.mxu1 %v6208_v21 }
 0xc74   :  { %v2928_v47 = vpop.f32.mrb[22].mxu0  ;;  %v2999_v56 = vpop.f32.mrb[22].mxu1 }
 0xc75   :  { %v5067_v10 = vadd.f32 %v2928_v47, %v6352_v29  ;;  %v2930_v1 = vpop.f32.mrb[23].mxu0  ;;  %v3001_v6 = vpop.f32.mrb[23].mxu1  ;;  %v5083_v55 = vadd.f32 %v2999_v56, %v6367_v14 }
 0xc76   :  { %v5068_v13 = vadd.f32 %v2930_v1, %v6356_v35  ;;  %v5084_v18 = vadd.f32 %v3001_v6, %v6362_v28 }
 0xc77   :  { %v3008_v16 = vsub.f32 0.0, %v5067_v10 }
 0xc78   :  { %v3013_v57 = vsub.f32 0.0, %v5068_v13  ;;  %v3019_v62 = vsub.f32 0.0, %v5084_v18 }
 0xc79   :  { %v3009_v30 = vmul.f32 1.442695, %v3008_v16 }
 0xc7a   :  { %v3014_v53 = vmul.f32 1.442695, %v3013_v57  ;;  %v3020_v31 = vmul.f32 1.442695, %v3019_v62 }
 0xc7b   :  { %5344 = vpow2.f32 %v3009_v30 }
 0xc7c   :  { %5346 = vpow2.f32 %v3014_v53 }
 0xc7d   :  { %5348 = vpow2.f32 %v3020_v31 }
 0xc7e   :  { %5350 = vtanh.f32 %v5083_v55 }
 0xc85   :  { %v5345_v20 = vpop.eup %5344 }
 0xc86   :  { %v5347_v49 = vpop.eup %5346  ;;  %v3011_v23 = vadd.f32 1.0, %v5345_v20 }
 0xc87   :  { %v3016_v22 = vadd.f32 1.0, %v5347_v49  ;;  %v5349_v9 = vpop.eup %5348 }
 0xc88   :  { %5352 = vrcp.f32 %v3011_v23  ;;  %v5351_v27 = vpop.eup %5350  ;;  %v3022_v45 = vadd.f32 1.0, %v5349_v9 }
 0xc89   :  { %5354 = vrcp.f32 %v3016_v22 }
 0xc8a   :  { %5356 = vrcp.f32 %v3022_v45 }
 0xc92   :  { %v5353_v42 = vpop.eup %5352 }
 0xc93   :  { %v5355_v2 = vpop.eup %5354  ;;  %v3025_v8 = vmul.f32 %v5353_v42, %v5351_v27 }
 0xc94   :  { %v3024_v24 = vmul.f32 %v5355_v2, %v6454_v11  ;;  %v5357_v47 = vpop.eup %5356 }
 0xc96   :  { %v6496_v52 = vadd.f32 %v3025_v8, %v3024_v24 }
 0xc98   :  { %5358 = vtanh.f32 %v6496_v52 }
 0xca2   :  { %v5359_v56 = vpop.eup %5358 }
 0xca3   :  { %v3028_v10 = vmul.f32 %v5359_v56, %v5357_v47 }
 0xca5   :  { %3102 = vmatmul.mubr.f32.vlgmr.msra.gmra.mrb[24].mxu0 %v3028_v10  ;;  %3173 = vmatmul.mubr.f32.vlgmr.msra.gmra.mrb[24].mxu1 %v3028_v10 }
 0xca6   :  { %4816 = vmatpush1.bf16.msra.mxu0 %v6210_v3  ;;  %4848 = vmatpush1.bf16.msra.mxu1 %v6213_v7 }
 0xca7   :  { %4818 = vmatprep.subr.bf16.mxu0 %v6218_v51  ;;  %4850 = vmatprep.subr.bf16.mxu1 %v6220_v63 }
 0xca8   :  { %3276 = vmatprep.mubr.f32.mxu0 %v5526_v0  ;;  %3347 = vmatprep.mubr.f32.mxu1 %v5526_v0 }
 0xcaa   :  { %4820 = vmatpush1.bf16.msra.mxu0 %v6222_v48  ;;  %4852 = vmatpush1.bf16.msra.mxu1 %v6225_v25 }
 0xcab   :  { %4822 = vmatprep.subr.bf16.mxu0 %v6230_v38  ;;  %4854 = vmatprep.subr.bf16.mxu1 %v6232_v54 }
 0xcae   :  { %4824 = vmatpush1.bf16.msra.mxu0 %v6234_v58  ;;  %4856 = vmatpush1.bf16.msra.mxu1 %v6237_v5 }
 0xcaf   :  { %4826 = vmatprep.subr.bf16.mxu0 %v6242_v19  ;;  %4858 = vmatprep.subr.bf16.mxu1 %v6244_v39 }
 0xcb2   :  { %4828 = vmatpush1.bf16.msra.mxu0 %v6246_v43  ;;  %4860 = vmatpush1.bf16.msra.mxu1 %v6249_v60 }
 0xcb3   :  { %4830 = vmatprep.subr.bf16.mxu0 %v6253_v32  ;;  %4862 = vmatprep.subr.bf16.mxu1 %v6255_v36 }
 0xcb6   :  { %4832 = vmatpush1.bf16.msra.mxu0 %v6258_v17  ;;  %4864 = vmatpush1.bf16.msra.mxu1 %v6262_v37 }
 0xcb7   :  { %4834 = vmatprep.subr.bf16.mxu0 %v6264_v40  ;;  %4866 = vmatprep.subr.bf16.mxu1 %v6266_v26 }
 0xcba   :  { %4836 = vmatpush1.bf16.msra.mxu0 %v6269_v34  ;;  %4868 = vmatpush1.bf16.msra.mxu1 %v6273_v50 }
 0xcbb   :  { %4838 = vmatprep.subr.bf16.mxu0 %v6275_v61  ;;  %4870 = vmatprep.subr.bf16.mxu1 %v6278_v15 }
 0xcbe   :  { %4840 = vmatpush1.bf16.msra.mxu0 %v6281_v33  ;;  %4872 = vmatpush1.bf16.msra.mxu1 %v6285_v46 }
 0xcbf   :  { %4842 = vmatprep.subr.bf16.mxu0 %v6290_v4  ;;  %4874 = vmatprep.subr.bf16.mxu1 %v6292_v44 }
 0xcc2   :  { %4844 = vmatpush1.bf16.msra.mxu0 %v6294_v59  ;;  %4876 = vmatpush1.bf16.msra.mxu1 %v6297_v41 }
 0xcc3   :  { %4878 = vmatprep.subr.bf16.mxu0 %v6206_v12  ;;  %4910 = vmatprep.subr.bf16.mxu1 %v6208_v21 }
 0xd78   :  { %v3103_v11 = vpop.f32.mrb[24].mxu0  ;;  %v3174_v1 = vpop.f32.mrb[24].mxu1 }
 0xd79   :  { %v5069_v6 = vadd.f32 %v3103_v11, %v6352_v29  ;;  %v3105_v13 = vpop.f32.mrb[25].mxu0  ;;  %v3176_v16 = vpop.f32.mrb[25].mxu1  ;;  %v5085_v49 = vadd.f32 %v3174_v1, %v6367_v14 }
 0xd7a   :  { %v5070_v57 = vadd.f32 %v3105_v13, %v6356_v35  ;;  %v5086_v31 = vadd.f32 %v3176_v16, %v6362_v28 }
 0xd7b   :  { %v3183_v30 = vsub.f32 0.0, %v5069_v6 }
 0xd7c   :  { %v3188_v53 = vsub.f32 0.0, %v5070_v57  ;;  %v3194_v55 = vsub.f32 0.0, %v5086_v31 }
 0xd7d   :  { %v3184_v18 = vmul.f32 1.442695, %v3183_v30 }
 0xd7e   :  { %v3189_v62 = vmul.f32 1.442695, %v3188_v53  ;;  %v3195_v20 = vmul.f32 1.442695, %v3194_v55 }
 0xd7f   :  { %5360 = vpow2.f32 %v3184_v18 }
 0xd80   :  { %5362 = vpow2.f32 %v3189_v62 }
 0xd81   :  { %5364 = vpow2.f32 %v3195_v20 }
 0xd82   :  { %5366 = vtanh.f32 %v5085_v49 }
 0xd89   :  { %v5361_v23 = vpop.eup %5360 }
 0xd8a   :  { %v5363_v22 = vpop.eup %5362  ;;  %v3186_v9 = vadd.f32 1.0, %v5361_v23 }
 0xd8b   :  { %v3191_v27 = vadd.f32 1.0, %v5363_v22  ;;  %v5365_v42 = vpop.eup %5364 }
 0xd8c   :  { %5368 = vrcp.f32 %v3186_v9  ;;  %v5367_v2 = vpop.eup %5366  ;;  %v3197_v47 = vadd.f32 1.0, %v5365_v42 }
 0xd8d   :  { %5370 = vrcp.f32 %v3191_v27 }
 0xd8e   :  { %5372 = vrcp.f32 %v3197_v47 }
 0xd96   :  { %v5369_v8 = vpop.eup %5368 }
 0xd97   :  { %v5371_v45 = vpop.eup %5370  ;;  %v3200_v24 = vmul.f32 %v5369_v8, %v5367_v2 }
 0xd98   :  { %v3199_v56 = vmul.f32 %v5371_v45, %v6496_v52  ;;  %v5373_v11 = vpop.eup %5372 }
 0xd9a   :  { %v6538_v10 = vadd.f32 %v3200_v24, %v3199_v56 }
 0xd9c   :  { %5374 = vtanh.f32 %v6538_v10 }
 0xda6   :  { %v5375_v1 = vpop.eup %5374 }
 0xda7   :  { %v3203_v6 = vmul.f32 %v5375_v1, %v5373_v11 }
 0xda9   :  { %3277 = vmatmul.mubr.f32.vlgmr.msra.gmra.mrb[26].mxu0 %v3203_v6  ;;  %3348 = vmatmul.mubr.f32.vlgmr.msra.gmra.mrb[26].mxu1 %v3203_v6 }
 0xdaa   :  { %4880 = vmatpush1.bf16.msra.mxu0 %v6210_v3  ;;  %4912 = vmatpush1.bf16.msra.mxu1 %v6213_v7 }
 0xdab   :  { %4882 = vmatprep.subr.bf16.mxu0 %v6218_v51  ;;  %4914 = vmatprep.subr.bf16.mxu1 %v6220_v63 }
 0xdac   :  { %3451 = vmatprep.mubr.f32.mxu0 %v5526_v0  ;;  %3522 = vmatprep.mubr.f32.mxu1 %v5526_v0 }
 0xdae   :  { %4884 = vmatpush1.bf16.msra.mxu0 %v6222_v48  ;;  %4916 = vmatpush1.bf16.msra.mxu1 %v6225_v25 }
 0xdaf   :  { %4886 = vmatprep.subr.bf16.mxu0 %v6230_v38  ;;  %4918 = vmatprep.subr.bf16.mxu1 %v6232_v54 }
 0xdb2   :  { %4888 = vmatpush1.bf16.msra.mxu0 %v6234_v58  ;;  %4920 = vmatpush1.bf16.msra.mxu1 %v6237_v5 }
 0xdb3   :  { %4890 = vmatprep.subr.bf16.mxu0 %v6242_v19  ;;  %4922 = vmatprep.subr.bf16.mxu1 %v6244_v39 }
 0xdb6   :  { %4892 = vmatpush1.bf16.msra.mxu0 %v6246_v43  ;;  %4924 = vmatpush1.bf16.msra.mxu1 %v6249_v60 }
 0xdb7   :  { %4894 = vmatprep.subr.bf16.mxu0 %v6253_v32  ;;  %4926 = vmatprep.subr.bf16.mxu1 %v6255_v36 }
 0xdba   :  { %4896 = vmatpush1.bf16.msra.mxu0 %v6258_v17  ;;  %4928 = vmatpush1.bf16.msra.mxu1 %v6262_v37 }
 0xdbb   :  { %4898 = vmatprep.subr.bf16.mxu0 %v6264_v40  ;;  %4930 = vmatprep.subr.bf16.mxu1 %v6266_v26 }
 0xdbe   :  { %4900 = vmatpush1.bf16.msra.mxu0 %v6269_v34  ;;  %4932 = vmatpush1.bf16.msra.mxu1 %v6273_v50 }
 0xdbf   :  { %4902 = vmatprep.subr.bf16.mxu0 %v6275_v61  ;;  %4934 = vmatprep.subr.bf16.mxu1 %v6278_v15 }
 0xdc2   :  { %4904 = vmatpush1.bf16.msra.mxu0 %v6281_v33  ;;  %4936 = vmatpush1.bf16.msra.mxu1 %v6285_v46 }
 0xdc3   :  { %4906 = vmatprep.subr.bf16.mxu0 %v6290_v4  ;;  %4938 = vmatprep.subr.bf16.mxu1 %v6292_v44 }
 0xdc6   :  { %4908 = vmatpush1.bf16.msra.mxu0 %v6294_v59  ;;  %4940 = vmatpush1.bf16.msra.mxu1 %v6297_v41 }
 0xdc7   :  { %4942 = vmatprep.subr.bf16.mxu0 %v6206_v12  ;;  %4974 = vmatprep.subr.bf16.mxu1 %v6208_v21 }
 0xe7c   :  { %v3278_v52 = vpop.f32.mrb[26].mxu0  ;;  %v3349_v13 = vpop.f32.mrb[26].mxu1 }
 0xe7d   :  { %v5071_v16 = vadd.f32 %v3278_v52, %v6352_v29  ;;  %v3280_v57 = vpop.f32.mrb[27].mxu0  ;;  %v3351_v30 = vpop.f32.mrb[27].mxu1  ;;  %v5087_v21 = vadd.f32 %v3349_v13, %v6367_v14 }
 0xe7e   :  { %v5072_v53 = vadd.f32 %v3280_v57, %v6356_v35  ;;  %v5088_v20 = vadd.f32 %v3351_v30, %v6362_v28  ;;  %v3734_v57 = vld [vmem:[#allocation11 + $0x10] sm:$0xff]  ;;  %v3735_v30 = vld [vmem:[#allocation11 + $0x18] sm:$0xff] }
 0xe7f   :  { %v3358_v18 = vsub.f32 0.0, %v5071_v16  ;;  %v5527_v16 = vmov 0.0|0.0  }
 0xe80   :  { %v3363_v62 = vsub.f32 0.0, %v5072_v53  ;;  %v3369_v49 = vsub.f32 0.0, %v5088_v20  ;;  %v5009_v53 = vpack.c.bf16 %v3735_v30, %v3734_v57  ;;  %v3739_v20 = vld [vmem:[#allocation11 + $0x38] sm:$0xff] }
 0xe81   :  { %v3359_v31 = vmul.f32 1.442695, %v3358_v18  ;;  %v3736_v18 = vld [vmem:[#allocation11 + $0x20] sm:$0xff] }
 0xe82   :  { %v3364_v55 = vmul.f32 1.442695, %v3363_v62  ;;  %v3370_v12 = vmul.f32 1.442695, %v3369_v49  ;;  %v3737_v62 = vld [vmem:[#allocation11 + $0x28] sm:$0xff] }
 0xe83   :  { %5376 = vpow2.f32 %v3359_v31  ;;  %v5012_v31 = vpack.c.bf16 %v3737_v62, %v3736_v18 }
 0xe84   :  { %5378 = vpow2.f32 %v3364_v55  ;;  %v3738_v55 = vld [vmem:[#allocation11 + $0x30] sm:$0xff] }
 0xe85   :  { %5380 = vpow2.f32 %v3370_v12  ;;  %v5015_v49 = vpack.c.bf16 %v3739_v20, %v3738_v55  ;;  %v3740_v12 = vld [vmem:[#allocation11 + $0x40] sm:$0xff] }
 0xe86   :  { %5382 = vtanh.f32 %v5087_v21  ;;  %v3741_v21 = vld [vmem:[#allocation11 + $0x48] sm:$0xff] }
 0xe8d   :  { %v5377_v23 = vpop.eup %5376 }
 0xe8e   :  { %v5379_v22 = vpop.eup %5378  ;;  %v3361_v9 = vadd.f32 1.0, %v5377_v23  ;;  %v5018_v23 = vpack.c.bf16 %v3741_v21, %v3740_v12 }
 0xe8f   :  { %v3366_v27 = vadd.f32 1.0, %v5379_v22  ;;  %v5381_v42 = vpop.eup %5380  ;;  %v3742_v22 = vld [vmem:[#allocation11 + $0x50] sm:$0xff] }
 0xe90   :  { %5384 = vrcp.f32 %v3361_v9  ;;  %v5383_v2 = vpop.eup %5382  ;;  %v3372_v47 = vadd.f32 1.0, %v5381_v42  ;;  %v3743_v9 = vld [vmem:[#allocation11 + $0x58] sm:$0xff]  ;;  %v3744_v42 = vld [vmem:[#allocation11 + $0x60] sm:$0xff] }
 0xe91   :  { %5386 = vrcp.f32 %v3366_v27  ;;  %v5021_v27 = vpack.c.bf16 %v3743_v9, %v3742_v22 }
 0xe92   :  { %5388 = vrcp.f32 %v3372_v47 }
 0xe9a   :  { %v5385_v8 = vpop.eup %5384 }
 0xe9b   :  { %v5387_v45 = vpop.eup %5386  ;;  %v3375_v24 = vmul.f32 %v5385_v8, %v5383_v2  ;;  %v3745_v2 = vld [vmem:[#allocation11 + $0x68] sm:$0xff] }
 0xe9c   :  { %v3374_v56 = vmul.f32 %v5387_v45, %v6538_v10  ;;  %v5389_v1 = vpop.eup %5388  ;;  %v3733_v10 = vld [vmem:[#allocation11 + $0x8] sm:$0xff]  ;;  %v5024_v8 = vpack.c.bf16 %v3745_v2, %v3744_v42  ;;  %v3746_v45 = vld [vmem:[#allocation11 + $0x70] sm:$0xff] }
 0xe9e   :  { %v6580_v11 = vadd.f32 %v3375_v24, %v3374_v56  ;;  %v3747_v24 = vld [vmem:[#allocation11 + $0x78] sm:$0xff] }
 0xe9f   :  { %v5027_v47 = vpack.c.bf16 %v3747_v24, %v3746_v45 }
 0xea0   :  { %5390 = vtanh.f32 %v6580_v11 }
 0xeaa   :  { %v5391_v6 = vpop.eup %5390 }
 0xeab   :  { %v3378_v52 = vmul.f32 %v5391_v6, %v5389_v1 }
 0xead   :  { %3452 = vmatmul.mubr.f32.vlgmr.msra.gmra.mrb[28].mxu0 %v3378_v52  ;;  %3523 = vmatmul.mubr.f32.vlgmr.msra.gmra.mrb[28].mxu1 %v3378_v52 }
 0xeae   :  { %4944 = vmatpush1.bf16.msra.mxu0 %v6210_v3  ;;  %4976 = vmatpush1.bf16.msra.mxu1 %v6213_v7 }
 0xeaf   :  { %4946 = vmatprep.subr.bf16.mxu0 %v6218_v51  ;;  %4978 = vmatprep.subr.bf16.mxu1 %v6220_v63 }
 0xeb0   :  { %3626 = vmatprep.mubr.f32.mxu0 %v5526_v0  ;;  %3697 = vmatprep.mubr.f32.mxu1 %v5526_v0 }
 0xeb2   :  { %4948 = vmatpush1.bf16.msra.mxu0 %v6222_v48  ;;  %4980 = vmatpush1.bf16.msra.mxu1 %v6225_v25 }
 0xeb3   :  { %4950 = vmatprep.subr.bf16.mxu0 %v6230_v38  ;;  %4982 = vmatprep.subr.bf16.mxu1 %v6232_v54 }
 0xeb6   :  { %4952 = vmatpush1.bf16.msra.mxu0 %v6234_v58  ;;  %4984 = vmatpush1.bf16.msra.mxu1 %v6237_v5 }
 0xeb7   :  { %4954 = vmatprep.subr.bf16.mxu0 %v6242_v19  ;;  %4986 = vmatprep.subr.bf16.mxu1 %v6244_v39 }
 0xeba   :  { %4956 = vmatpush1.bf16.msra.mxu0 %v6246_v43  ;;  %4988 = vmatpush1.bf16.msra.mxu1 %v6249_v60 }
 0xebb   :  { %4958 = vmatprep.subr.bf16.mxu0 %v6253_v32  ;;  %4990 = vmatprep.subr.bf16.mxu1 %v6255_v36 }
 0xebe   :  { %4960 = vmatpush1.bf16.msra.mxu0 %v6258_v17  ;;  %4992 = vmatpush1.bf16.msra.mxu1 %v6262_v37 }
 0xebf   :  { %4962 = vmatprep.subr.bf16.mxu0 %v6264_v40  ;;  %4994 = vmatprep.subr.bf16.mxu1 %v6266_v26 }
 0xec2   :  { %4964 = vmatpush1.bf16.msra.mxu0 %v6269_v34  ;;  %4996 = vmatpush1.bf16.msra.mxu1 %v6273_v50 }
 0xec3   :  { %4966 = vmatprep.subr.bf16.mxu0 %v6275_v61  ;;  %4998 = vmatprep.subr.bf16.mxu1 %v6278_v15 }
 0xec6   :  { %4968 = vmatpush1.bf16.msra.mxu0 %v6281_v33  ;;  %5000 = vmatpush1.bf16.msra.mxu1 %v6285_v46 }
 0xec7   :  { %4970 = vmatprep.subr.bf16.mxu0 %v6290_v4  ;;  %5002 = vmatprep.subr.bf16.mxu1 %v6292_v44 }
 0xeca   :  { %4972 = vmatpush1.bf16.msra.mxu0 %v6294_v59  ;;  %5004 = vmatpush1.bf16.msra.mxu1 %v6297_v41  ;;  %v3732_v41 = vld [vmem:[#allocation11] sm:$0xff] }
 0xecb   :  { %v5006_v13 = vpack.c.bf16 %v3733_v10, %v3732_v41  ;;  %5005 = vmatprep.subr.bf16.mxu0 %v5527_v16 }
 0xf80   :  { %v3453_v3 = vpop.f32.mrb[28].mxu0  ;;  %v3524_v7 = vpop.f32.mrb[28].mxu1 }
 0xf81   :  { %v5073_v51 = vadd.f32 %v3453_v3, %v6352_v29  ;;  %v3455_v63 = vpop.f32.mrb[29].mxu0  ;;  %v3526_v48 = vpop.f32.mrb[29].mxu1  ;;  %v5089_v60 = vadd.f32 %v3524_v7, %v6367_v14 }
 0xf82   :  { %v5074_v25 = vadd.f32 %v3455_v63, %v6356_v35  ;;  %v5090_v19 = vadd.f32 %v3526_v48, %v6362_v28 }
 0xf83   :  { %v3533_v38 = vsub.f32 0.0, %v5073_v51 }
 0xf84   :  { %v3538_v54 = vsub.f32 0.0, %v5074_v25  ;;  %v3544_v39 = vsub.f32 0.0, %v5090_v19 }
 0xf85   :  { %v3534_v58 = vmul.f32 1.442695, %v3533_v38 }
 0xf86   :  { %v3539_v5 = vmul.f32 1.442695, %v3538_v54  ;;  %v3545_v43 = vmul.f32 1.442695, %v3544_v39 }
 0xf87   :  { %5392 = vpow2.f32 %v3534_v58 }
 0xf88   :  { %5394 = vpow2.f32 %v3539_v5 }
 0xf89   :  { %5396 = vpow2.f32 %v3545_v43 }
 0xf8a   :  { %5398 = vtanh.f32 %v5089_v60 }
 0xf91   :  { %v5393_v32 = vpop.eup %5392 }
 0xf92   :  { %v5395_v36 = vpop.eup %5394  ;;  %v3536_v17 = vadd.f32 1.0, %v5393_v32 }
 0xf93   :  { %v3541_v37 = vadd.f32 1.0, %v5395_v36  ;;  %v5397_v40 = vpop.eup %5396 }
 0xf94   :  { %5400 = vrcp.f32 %v3536_v17  ;;  %v5399_v26 = vpop.eup %5398  ;;  %v3547_v15 = vadd.f32 1.0, %v5397_v40 }
 0xf95   :  { %5402 = vrcp.f32 %v3541_v37 }
 0xf96   :  { %5404 = vrcp.f32 %v3547_v15 }
 0xf9e   :  { %v5401_v34 = vpop.eup %5400 }
 0xf9f   :  { %v5403_v50 = vpop.eup %5402  ;;  %v3550_v61 = vmul.f32 %v5401_v34, %v5399_v26  ;;  %v3856_v26 = vld [vmem:[%s6643_s8] ss:$0 sm:$0xff] }
 0xfa0   :  { %v3549_v33 = vmul.f32 %v5403_v50, %v6580_v11  ;;  %v5405_v4 = vpop.eup %5404 }
 0xfa2   :  { %v6620_v46 = vadd.f32 %v3550_v61, %v3549_v33 }
 0xfa4   :  { %5406 = vtanh.f32 %v6620_v46 }
 0xfae   :  { %v5407_v44 = vpop.eup %5406 }
 0xfaf   :  { %v3553_v59 = vmul.f32 %v5407_v44, %v5405_v4 }
 0xfb1   :  { %3627 = vmatmul.mubr.f32.vlgmr.msra.gmra.mrb[30].mxu0 %v3553_v59  ;;  %3698 = vmatmul.mubr.f32.vlgmr.msra.gmra.mrb[30].mxu1 %v3553_v59 }
 0xfb2   :  { %5007 = vmatpush3.bf16.msra.mxu0 %v5006_v13  ;;  %3906 = vmatprep.mubr.msk.f32.mxu0 %vm5528_vm1, %v5526_v0 }
 0xfb3   :  { %5008 = vmatprep.subr.bf16.mxu0 %v5527_v16 }
 0xfb6   :  { %5010 = vmatpush3.bf16.msra.mxu0 %v5009_v53 }
 0xfb7   :  { %5011 = vmatprep.subr.bf16.mxu0 %v5527_v16 }
 0xfba   :  { %5013 = vmatpush3.bf16.msra.mxu0 %v5012_v31 }
 0xfbb   :  { %5014 = vmatprep.subr.bf16.mxu0 %v5527_v16 }
 0xfbe   :  { %5016 = vmatpush3.bf16.msra.mxu0 %v5015_v49 }
 0xfbf   :  { %5017 = vmatprep.subr.bf16.mxu0 %v5527_v16 }
 0xfc2   :  { %5019 = vmatpush3.bf16.msra.mxu0 %v5018_v23 }
 0xfc3   :  { %5020 = vmatprep.subr.bf16.mxu0 %v5527_v16 }
 0xfc6   :  { %5022 = vmatpush3.bf16.msra.mxu0 %v5021_v27 }
 0xfc7   :  { %5023 = vmatprep.subr.bf16.mxu0 %v5527_v16 }
 0xfca   :  { %5025 = vmatpush3.bf16.msra.mxu0 %v5024_v8 }
 0xfcb   :  { %5026 = vmatprep.subr.bf16.mxu0 %v5527_v16 }
 0xfce   :  { %5028 = vmatpush3.bf16.msra.mxu0 %v5027_v47 }
0x1084   :  { %v3628_v56 = vpop.f32.mrb[30].mxu0  ;;  %v3699_v11 = vpop.f32.mrb[30].mxu1 }
0x1085   :  { %v5075_v1 = vadd.f32 %v3628_v56, %v6352_v29  ;;  %v3630_v6 = vpop.f32.mrb[31].mxu0  ;;  %v3701_v52 = vpop.f32.mrb[31].mxu1  ;;  %v5091_v54 = vadd.f32 %v3699_v11, %v6367_v14 }
0x1086   :  { %v5076_v0 = vadd.f32 %v3630_v6, %v6356_v35  ;;  %v5092_v48 = vadd.f32 %v3701_v52, %v6362_v28 }
0x1087   :  { %v3708_v3 = vsub.f32 0.0, %v5075_v1 }
0x1088   :  { %v3713_v7 = vsub.f32 0.0, %v5076_v0  ;;  %v3719_v25 = vsub.f32 0.0, %v5092_v48 }
0x1089   :  { %v3709_v51 = vmul.f32 1.442695, %v3708_v3 }
0x108a   :  { %v3714_v63 = vmul.f32 1.442695, %v3713_v7  ;;  %v3720_v38 = vmul.f32 1.442695, %v3719_v25 }
0x108b   :  { %5408 = vpow2.f32 %v3709_v51 }
0x108c   :  { %5410 = vpow2.f32 %v3714_v63 }
0x108d   :  { %5412 = vpow2.f32 %v3720_v38 }
0x108e   :  { %5414 = vtanh.f32 %v5091_v54 }
0x1095   :  { %v5409_v58 = vpop.eup %5408 }
0x1096   :  { %v5411_v5 = vpop.eup %5410  ;;  %v3711_v19 = vadd.f32 1.0, %v5409_v58 }
0x1097   :  { %v3716_v29 = vadd.f32 1.0, %v5411_v5  ;;  %v5413_v35 = vpop.eup %5412 }
0x1098   :  { %5416 = vrcp.f32 %v3711_v19  ;;  %v5415_v39 = vpop.eup %5414  ;;  %v3722_v28 = vadd.f32 1.0, %v5413_v35 }
0x1099   :  { %5418 = vrcp.f32 %v3716_v29 }
0x109a   :  { %5420 = vrcp.f32 %v3722_v28 }
0x10a2   :  { %v5417_v43 = vpop.eup %5416 }
0x10a3   :  { %v5419_v60 = vpop.eup %5418  ;;  %v3725_v32 = vmul.f32 %v5417_v43, %v5415_v39 }
0x10a4   :  { %v3724_v36 = vmul.f32 %v5419_v60, %v6620_v46  ;;  %v5421_v14 = vpop.eup %5420 }
0x10a6   :  { %v3726_v17 = vadd.f32 %v3725_v32, %v3724_v36 }
0x10a8   :  { %5422 = vtanh.f32 %v3726_v17 }
0x10b2   :  { %v5423_v37 = vpop.eup %5422 }
0x10b3   :  { %v3728_v40 = vmul.f32 %v5423_v37, %v5421_v14 }
0x10b5   :  { %3907 = vmatmul.mubr.f32.vlgmr.msra.gmra.mrb[32].mxu0 %v3728_v40 }
0x1188   :  { %v3821_v34 = vpop.f32.mrb[32].mxu0 }
0x1189   :  { %v3822_v50 = vadd.f32 %v3856_v26, %v3821_v34  ;;  %v3908_v61 = vpop.f32.mrb[33].mxu0 }
0x118b   :  { %3825 = vst [vmem:[%s6644_s9] sm:$0xff] %v3822_v50 }
0x118c   :  { %3830 = vsyncpa [#allocation7], 1 }
0x118d   :  { %3831 = vsyncpa [#allocation9], 1 }
0x118e   :  { %3832 = vsyncpa [#allocation12], 1 }

</bundles_post_ra>
